<compile_context>
chip_gen: v7x
topology: tpu7x:2x2x1
jax: 0.10.0
libtpu: 0.0.40
codegen_flags: <defaults>
</compile_context>

<pallas_src>
import functools
import math

import jax
import jax.numpy as jnp
from jax.experimental import pallas as pl
from jax.experimental.pallas import tpu as pltpu

LANE = 128


def _round_up(x, m):
    return (x + m - 1) // m * m


# ----------------------------------------------------------------------------
# Pallas kernel: tiled fused matmul (+ residual) (+ ReLU) (+ fused 1x1 head).
# ----------------------------------------------------------------------------
def _fused_mm_kernel(*refs, relu, has_res, has_head, k_steps):
    it = iter(refs)
    a_ref = next(it)                           # (TM, TK)  bf16 activations
    b_ref = next(it)                           # (TK, NP)  bf16 weights
    c_ref = next(it) if has_res else None      # (TM, NP)  bf16 residual
    w2_ref = next(it) if has_head else None    # (NP, HP)  bf16 head weights
    o_ref = next(it)                           # (TM, NP)  main output
    o2_ref = next(it) if has_head else None    # (TM, HP)  head output
    acc_ref = next(it)                         # (TM, NP)  f32 scratch

    @pl.when(pl.program_id(1) == 0)
    def _init():
        acc_ref[...] = jnp.zeros_like(acc_ref)

    acc_ref[...] += jnp.dot(a_ref[...], b_ref[...],
                            preferred_element_type=jnp.float32)

    @pl.when(pl.program_id(1) == k_steps - 1)
    def _finalize():
        acc = acc_ref[...]
        if has_res:
            acc = acc + c_ref[...].astype(jnp.float32)
        if relu:
            acc = jnp.maximum(acc, 0.0)
        o_ref[...] = acc.astype(o_ref.dtype)
        if has_head:
            h = jnp.dot(acc.astype(w2_ref.dtype), w2_ref[...],
                        preferred_element_type=jnp.float32)
            o2_ref[...] = h.astype(o2_ref.dtype)


def fused_matmul(a, b, *, relu=False, residual=None, head_w=None,
                 out_dtype=jnp.bfloat16, head_out_dtype=jnp.float32, tm=512):
    """out = act(a @ b [+ residual]); optionally head = out @ head_w.

    a: (M, K), b: (K, Nout), residual: (M, Nout), head_w: (Nout, Nhead).
    bf16 inputs, f32 accumulation, lane-dense (128-padded) outputs.
    Returns (out[M, Nout], head[M, Nhead] or None).
    """
    M, K = a.shape
    Nout = b.shape[1]
    npad = _round_up(Nout, LANE)

    # K tiling: single full-K block for this net's small contractions; switch
    # to 512-wide tiles + a K reduction axis once K grows.
    if K <= 1024:
        tk = kpad = K
    else:
        tk = 512
        kpad = _round_up(K, tk)
    k_steps = kpad // tk

    tm = min(tm, _round_up(M, 8))
    mpad = _round_up(M, tm)
    m_steps = mpad // tm

    a_p = jnp.pad(a.astype(jnp.bfloat16), ((0, mpad - M), (0, kpad - K)))
    b_p = jnp.pad(b.astype(jnp.bfloat16), ((0, kpad - K), (0, npad - Nout)))

    inputs = [a_p, b_p]
    in_specs = [
        pl.BlockSpec((tm, tk), lambda i, k: (i, k)),
        pl.BlockSpec((tk, npad), lambda i, k: (k, 0)),
    ]

    has_res = residual is not None
    if has_res:
        r_p = jnp.pad(residual.astype(jnp.bfloat16),
                      ((0, mpad - M), (0, npad - Nout)))
        inputs.append(r_p)
        in_specs.append(pl.BlockSpec((tm, npad), lambda i, k: (i, 0)))

    has_head = head_w is not None
    if has_head:
        nhead = head_w.shape[1]
        hpad = _round_up(nhead, LANE)
        w2_p = jnp.pad(head_w.astype(jnp.bfloat16),
                       ((0, npad - Nout), (0, hpad - nhead)))
        inputs.append(w2_p)
        in_specs.append(pl.BlockSpec((npad, hpad), lambda i, k: (0, 0)))

    out_shapes = [jax.ShapeDtypeStruct((mpad, npad), out_dtype)]
    out_specs = [pl.BlockSpec((tm, npad), lambda i, k: (i, 0))]
    if has_head:
        out_shapes.append(jax.ShapeDtypeStruct((mpad, hpad), head_out_dtype))
        out_specs.append(pl.BlockSpec((tm, hpad), lambda i, k: (i, 0)))

    flops = 2 * mpad * kpad * npad
    if has_head:
        flops += 2 * mpad * npad * hpad
    bytes_accessed = sum(int(x.size) * x.dtype.itemsize for x in inputs)
    bytes_accessed += sum(math.prod(s.shape) * jnp.dtype(s.dtype).itemsize
                          for s in out_shapes)

    kernel = functools.partial(_fused_mm_kernel, relu=relu, has_res=has_res,
                               has_head=has_head, k_steps=k_steps)

    results = pl.pallas_call(
        kernel,
        out_shape=tuple(out_shapes),
        grid=(m_steps, k_steps),
        in_specs=in_specs,
        out_specs=tuple(out_specs),
        scratch_shapes=[pltpu.VMEM((tm, npad), jnp.float32)],
        compiler_params=pltpu.CompilerParams(
            dimension_semantics=("parallel", "arbitrary"),
            vmem_limit_bytes=32 * 1024 * 1024),
        cost_estimate=pl.CostEstimate(flops=flops, transcendentals=0,
                                      bytes_accessed=bytes_accessed),
    )(*inputs)

    if not isinstance(results, (tuple, list)):
        results = (results,)
    out = results[0][:M, :Nout]
    head = results[1][:M, :head_w.shape[1]] if has_head else None
    return out, head


# ----------------------------------------------------------------------------
# Conv / pooling glue (plain-JAX reshapes + the Pallas fused matmul above).
# ----------------------------------------------------------------------------
def _im2col_3x3(x):
    """x: (N,H,W,C) -> (N*H*W, 9*C), stride 1, 'same' padding."""
    N, H, W, C = x.shape
    xp = jnp.pad(x, ((0, 0), (1, 1), (1, 1), (0, 0)))
    cols = [xp[:, dy:dy + H, dx:dx + W, :] for dy in range(3) for dx in range(3)]
    return jnp.concatenate(cols, axis=-1).reshape(N * H * W, 9 * C)


def conv3x3(x, w, *, relu=False, residual=None, head_w=None,
            out_dtype=jnp.bfloat16):
    """x: (N,H,W,Cin), w: (3,3,Cin,Cout) -> (N,H,W,Cout). bias-free."""
    N, H, W, C = x.shape
    Cout = w.shape[-1]
    cols = _im2col_3x3(x)
    wmat = w.reshape(9 * C, Cout)
    res = None if residual is None else residual.reshape(N * H * W, Cout)
    out, head = fused_matmul(cols, wmat, relu=relu, residual=res,
                             head_w=head_w, out_dtype=out_dtype)
    out = out.reshape(N, H, W, Cout)
    if head_w is None:
        return out
    return out, head.reshape(N, H, W, head_w.shape[1])


def conv1x1(x, w, *, relu=False, residual=None, head_w=None,
            out_dtype=jnp.bfloat16):
    """x: (N,H,W,Cin), w: (Cin,Cout)."""
    N, H, W, C = x.shape
    Cout = w.shape[-1]
    res = None if residual is None else residual.reshape(N * H * W, Cout)
    out, head = fused_matmul(x.reshape(N * H * W, C), w, relu=relu,
                             residual=res, head_w=head_w, out_dtype=out_dtype)
    out = out.reshape(N, H, W, Cout)
    if head_w is None:
        return out
    return out, head.reshape(N, H, W, head_w.shape[1])


def avgpool2x2(x):
    N, H, W, C = x.shape
    return x.reshape(N, H // 2, 2, W // 2, 2, C).mean(axis=(2, 4))


def upsample2x(x):
    return jnp.repeat(jnp.repeat(x, 2, axis=1), 2, axis=2)


# ----------------------------------------------------------------------------
# Network pieces (Res2Net-style encoder, skip decoder, cross-feature decoder).
# ----------------------------------------------------------------------------
def encoder_res2net(p, x):
    # stem: 3 -> C
    f = conv3x3(x, p["enc_stem"], relu=True)
    # Res2Net block: scale=4 hierarchical 3x3 convs on channel splits
    xs = jnp.split(f, 4, axis=-1)
    y0 = xs[0]
    y1 = conv3x3(xs[1], p["enc_r1"], relu=True)
    y2 = conv3x3(xs[2] + y1, p["enc_r2"], relu=True)
    y3 = conv3x3(xs[3] + y2, p["enc_r3"], relu=True)
    ycat = jnp.concatenate([y0, y1, y2, y3], axis=-1)
    f1 = conv1x1(ycat, p["enc_fuse"], relu=True, residual=f)  # fused 1x1 + skip
    # downsample stage: C -> 2C at half resolution
    f2 = conv3x3(avgpool2x2(f1), p["enc_down"], relu=True)
    return f1, f2


def decoder_res2net(pd, fea):
    f1, f2 = fea
    up = upsample2x(f2)
    # dec_conv (3x3, +skip, ReLU) with the num_classes dec_out 1x1 fused into
    # its epilogue -> one pallas_call instead of two.
    df, logits = conv3x3(up, pd["dec_conv"], relu=True, residual=f1,
                         head_w=pd["dec_out"])
    return logits, df


def ca_decoder(pm, df1, df2):
    cat = jnp.concatenate([df1, df2], axis=-1)
    return conv1x1(cat, pm["ca_out"], out_dtype=jnp.float32)


def net_forward(params, x1_nchw, x2_nchw, *, SC=True, DCF=True, in_chns=4):
    """Mirrors Net.forward (SC / DCF branches).  I/O is NCHW like PyTorch."""
    x1 = jnp.transpose(x1_nchw, (0, 2, 3, 1)).astype(jnp.bfloat16)  # NCHW->NHWC
    x2 = jnp.transpose(x2_nchw, (0, 2, 3, 1)).astype(jnp.bfloat16)
    if SC:
        N = x1.shape[0]
        # x1/x2 share conv0 + encoder weights -> batch them through one pass.
        xb = jnp.concatenate([x1, x2], axis=0)
        if in_chns != 3:
            xb = conv3x3(xb, params["conv0"])     # conv0: in_chns -> 3, no bias
        f1b, f2b = encoder_res2net(params, xb)
        fea1 = (f1b[:N], f2b[:N])
        fea2 = (f1b[N:], f2b[N:])
        out1, df1 = decoder_res2net(params["dec0"], fea1)
        out2, df2 = decoder_res2net(params["dec1"], fea2)
        out3 = ca_decoder(params["main"], df1, df2) if DCF else None
        to_nchw = lambda t: jnp.transpose(t, (0, 3, 1, 2))
        return to_nchw(out1), to_nchw(out2), (to_nchw(out3) if out3 is not None else None)
    else:
        # Matches the reference: conv0 is NOT applied on this branch.  The single
        # decoder maps to the "dec0" parameter set (fixes the old "dec" KeyError).
        out, _ = decoder_res2net(params["dec0"], encoder_res2net(params, x1))
        return jnp.transpose(out, (0, 3, 1, 2)), None, None


# ----------------------------------------------------------------------------
# Deterministic parameter construction.
# ----------------------------------------------------------------------------
def make_params(key, in_chns=4, num_classes=2, C=16):
    keys = jax.random.split(key, 16)
    n = lambda k, shp: (0.1 * jax.random.normal(k, shp, dtype=jnp.float32))
    w4 = C // 4
    params = {
        "conv0": n(keys[0], (3, 3, in_chns, 3)),
        "enc_stem": n(keys[1], (3, 3, 3, C)),
        "enc_r1": n(keys[2], (3, 3, w4, w4)),
        "enc_r2": n(keys[3], (3, 3, w4, w4)),
        "enc_r3": n(keys[4], (3, 3, w4, w4)),
        "enc_fuse": n(keys[5], (C, C)),
        "enc_down": n(keys[6], (3, 3, C, 2 * C)),
        "dec0": {
            "dec_conv": n(keys[7], (3, 3, 2 * C, C)),
            "dec_out": n(keys[8], (C, num_classes)),
        },
        "dec1": {
            "dec_conv": n(keys[9], (3, 3, 2 * C, C)),
            "dec_out": n(keys[10], (C, num_classes)),
        },
        "main": {
            "ca_out": n(keys[11], (2 * C, num_classes)),
        },
    }
    return params


# ----------------------------------------------------------------------------
# Entry point.
# ----------------------------------------------------------------------------
if __name__ == "__main__":
    key = jax.random.PRNGKey(0)
    k_x1, k_x2, k_p = jax.random.split(key, 3)

    batch, in_chns, H, W = 2, 4, 16, 16
    num_classes = 2

    x1 = jax.random.normal(k_x1, (batch, in_chns, H, W), dtype=jnp.float32)
    x2 = jax.random.normal(k_x2, (batch, in_chns, H, W), dtype=jnp.float32)
    params = make_params(k_p, in_chns=in_chns, num_classes=num_classes, C=16)

    fwd = jax.jit(functools.partial(net_forward, SC=True, DCF=True, in_chns=in_chns))
    out1, out2, out3 = fwd(params, x1, x2)
    jax.block_until_ready((out1, out2, out3))

    assert out1.shape == (batch, num_classes, H, W), out1.shape
    assert out2.shape == (batch, num_classes, H, W), out2.shape
    assert out3.shape == (batch, num_classes, H, W), out3.shape
    assert bool(jnp.all(jnp.isfinite(out1.astype(jnp.float32))))
    assert bool(jnp.all(jnp.isfinite(out2.astype(jnp.float32))))
    assert bool(jnp.all(jnp.isfinite(out3.astype(jnp.float32))))

    print("KERNEL_OK")
</pallas_src>

<mosaic_0001>
module attributes {stable_mosaic.version = 11 : i64} {
  func.func @_fused_mm_kernel(%arg0: i32, %arg1: i32, %arg2: memref<512x36xbf16, #tpu.memory_space<vmem>>, %arg3: memref<36x128xbf16, #tpu.memory_space<vmem>>, %arg4: memref<512x128xbf16, #tpu.memory_space<vmem>>, %arg5: memref<512x128xf32, #tpu.memory_space<vmem>>) attributes {dimension_semantics = [#tpu.dimension_semantics<parallel>, #tpu.dimension_semantics<arbitrary>], iteration_bounds = array<i64: 2, 1>, scalar_prefetch = 0 : i64, scratch_operands = 1 : i64, tpu.core_type = #tpu.core_type<tc>, window_params = [{transform_indices = @transform_0, window_bounds = array<i64: 512, 36>}, {transform_indices = @transform_1, window_bounds = array<i64: 36, 128>}, {transform_indices = @transform_2, window_bounds = array<i64: 512, 128>}]} {
    %c0_i32 = arith.constant 0 : i32
    %0 = arith.cmpi eq, %arg1, %c0_i32 : i32
    %1 = arith.extui %0 : i1 to i32
    %c0_i32_0 = arith.constant 0 : i32
    %2 = arith.cmpi ne, %1, %c0_i32_0 : i32
    scf.if %2 {
      %cst_10 = arith.constant 0.000000e+00 : f32
      %12 = vector.broadcast %cst_10 : f32 to vector<512x128xf32>
      %c0_11 = arith.constant 0 : index
      %c0_12 = arith.constant 0 : index
      %13 = vector.load %arg5[%c0_11, %c0_12] : memref<512x128xf32, #tpu.memory_space<vmem>>, vector<512x128xf32>
      tpu.vector_store %arg5[%c0_11, %c0_12], %12 {strides = array<i32>} : memref<512x128xf32, #tpu.memory_space<vmem>>, vector<512x128xf32>,
    } else {
    }
    %c0 = arith.constant 0 : index
    %c0_1 = arith.constant 0 : index
    %3 = vector.load %arg5[%c0, %c0_1] : memref<512x128xf32, #tpu.memory_space<vmem>>, vector<512x128xf32>
    %c0_2 = arith.constant 0 : index
    %c0_3 = arith.constant 0 : index
    %4 = vector.load %arg2[%c0_2, %c0_3] : memref<512x36xbf16, #tpu.memory_space<vmem>>, vector<512x36xbf16>
    %c0_4 = arith.constant 0 : index
    %c0_5 = arith.constant 0 : index
    %5 = vector.load %arg3[%c0_4, %c0_5] : memref<36x128xbf16, #tpu.memory_space<vmem>>, vector<36x128xbf16>
    %cst = arith.constant dense<0.000000e+00> : vector<512x128xf32>
    %6 = tpu.matmul %4, %5, %cst {dimension_numbers = #tpu.dot_dimension_numbers<[1], [0], [0], [1], [0, 0, 1, 1], [], []>} : vector<512x36xbf16>, vector<36x128xbf16>, vector<512x128xf32> -> vector<512x128xf32>
    %7 = arith.addf %3, %6 : vector<512x128xf32>
    %c0_6 = arith.constant 0 : index
    %c0_7 = arith.constant 0 : index
    %8 = vector.load %arg5[%c0_6, %c0_7] : memref<512x128xf32, #tpu.memory_space<vmem>>, vector<512x128xf32>
    tpu.vector_store %arg5[%c0_6, %c0_7], %7 {strides = array<i32>} : memref<512x128xf32, #tpu.memory_space<vmem>>, vector<512x128xf32>,
    %c0_i32_8 = arith.constant 0 : i32
    %9 = arith.cmpi eq, %arg1, %c0_i32_8 : i32
    %10 = arith.extui %9 : i1 to i32
    %c0_i32_9 = arith.constant 0 : i32
    %11 = arith.cmpi ne, %10, %c0_i32_9 : i32
    scf.if %11 {
      %c0_10 = arith.constant 0 : index
      %c0_11 = arith.constant 0 : index
      %12 = vector.load %arg5[%c0_10, %c0_11] : memref<512x128xf32, #tpu.memory_space<vmem>>, vector<512x128xf32>
      %13 = arith.truncf %12 : vector<512x128xf32> to vector<512x128xbf16>
      %c0_12 = arith.constant 0 : index
      %c0_13 = arith.constant 0 : index
      %14 = vector.load %arg4[%c0_12, %c0_13] : memref<512x128xbf16, #tpu.memory_space<vmem>>, vector<512x128xbf16>
      tpu.vector_store %arg4[%c0_12, %c0_13], %13 {strides = array<i32>} : memref<512x128xbf16, #tpu.memory_space<vmem>>, vector<512x128xbf16>,
    } else {
    }
    return
  }
  func.func @transform_0(%arg0: i32, %arg1: i32) -> (i32, i32) {
    %c0_i32 = arith.constant 0 : i32
    return %arg0, %arg1 : i32, i32
  }
  func.func @transform_1(%arg0: i32, %arg1: i32) -> (i32, i32) {
    %c0_i32 = arith.constant 0 : i32
    %c0_i32_0 = arith.constant 0 : i32
    return %arg1, %c0_i32 : i32, i32
  }
  func.func @transform_2(%arg0: i32, %arg1: i32) -> (i32, i32) {
    %c0_i32 = arith.constant 0 : i32
    %c0_i32_0 = arith.constant 0 : i32
    return %arg0, %c0_i32 : i32, i32
  }
}

module attributes {stable_mosaic.version = 11 : i64} {
  func.func @_fused_mm_kernel(%arg0: i32, %arg1: i32, %arg2: memref<512x27xbf16, #tpu.memory_space<vmem>>, %arg3: memref<27x128xbf16, #tpu.memory_space<vmem>>, %arg4: memref<512x128xbf16, #tpu.memory_space<vmem>>, %arg5: memref<512x128xf32, #tpu.memory_space<vmem>>) attributes {dimension_semantics = [#tpu.dimension_semantics<parallel>, #tpu.dimension_semantics<arbitrary>], iteration_bounds = array<i64: 2, 1>, scalar_prefetch = 0 : i64, scratch_operands = 1 : i64, tpu.core_type = #tpu.core_type<tc>, window_params = [{transform_indices = @transform_0, window_bounds = array<i64: 512, 27>}, {transform_indices = @transform_1, window_bounds = array<i64: 27, 128>}, {transform_indices = @transform_2, window_bounds = array<i64: 512, 128>}]} {
    %c0_i32 = arith.constant 0 : i32
    %0 = arith.cmpi eq, %arg1, %c0_i32 : i32
    %1 = arith.extui %0 : i1 to i32
    %c0_i32_0 = arith.constant 0 : i32
    %2 = arith.cmpi ne, %1, %c0_i32_0 : i32
    scf.if %2 {
      %cst_10 = arith.constant 0.000000e+00 : f32
      %12 = vector.broadcast %cst_10 : f32 to vector<512x128xf32>
      %c0_11 = arith.constant 0 : index
      %c0_12 = arith.constant 0 : index
      %13 = vector.load %arg5[%c0_11, %c0_12] : memref<512x128xf32, #tpu.memory_space<vmem>>, vector<512x128xf32>
      tpu.vector_store %arg5[%c0_11, %c0_12], %12 {strides = array<i32>} : memref<512x128xf32, #tpu.memory_space<vmem>>, vector<512x128xf32>,
    } else {
    }
    %c0 = arith.constant 0 : index
    %c0_1 = arith.constant 0 : index
    %3 = vector.load %arg5[%c0, %c0_1] : memref<512x128xf32, #tpu.memory_space<vmem>>, vector<512x128xf32>
    %c0_2 = arith.constant 0 : index
    %c0_3 = arith.constant 0 : index
    %4 = vector.load %arg2[%c0_2, %c0_3] : memref<512x27xbf16, #tpu.memory_space<vmem>>, vector<512x27xbf16>
    %c0_4 = arith.constant 0 : index
    %c0_5 = arith.constant 0 : index
    %5 = vector.load %arg3[%c0_4, %c0_5] : memref<27x128xbf16, #tpu.memory_space<vmem>>, vector<27x128xbf16>
    %cst = arith.constant dense<0.000000e+00> : vector<512x128xf32>
    %6 = tpu.matmul %4, %5, %cst {dimension_numbers = #tpu.dot_dimension_numbers<[1], [0], [0], [1], [0, 0, 1, 1], [], []>} : vector<512x27xbf16>, vector<27x128xbf16>, vector<512x128xf32> -> vector<512x128xf32>
    %7 = arith.addf %3, %6 : vector<512x128xf32>
    %c0_6 = arith.constant 0 : index
    %c0_7 = arith.constant 0 : index
    %8 = vector.load %arg5[%c0_6, %c0_7] : memref<512x128xf32, #tpu.memory_space<vmem>>, vector<512x128xf32>
    tpu.vector_store %arg5[%c0_6, %c0_7], %7 {strides = array<i32>} : memref<512x128xf32, #tpu.memory_space<vmem>>, vector<512x128xf32>,
    %c0_i32_8 = arith.constant 0 : i32
    %9 = arith.cmpi eq, %arg1, %c0_i32_8 : i32
    %10 = arith.extui %9 : i1 to i32
    %c0_i32_9 = arith.constant 0 : i32
    %11 = arith.cmpi ne, %10, %c0_i32_9 : i32
    scf.if %11 {
      %c0_10 = arith.constant 0 : index
      %c0_11 = arith.constant 0 : index
      %12 = vector.load %arg5[%c0_10, %c0_11] : memref<512x128xf32, #tpu.memory_space<vmem>>, vector<512x128xf32>
      %cst_12 = arith.constant 0.000000e+00 : f32
      %13 = vector.broadcast %cst_12 : f32 to vector<512x128xf32>
      %14 = arith.maximumf %12, %13 : vector<512x128xf32>
      %15 = arith.truncf %14 : vector<512x128xf32> to vector<512x128xbf16>
      %c0_13 = arith.constant 0 : index
      %c0_14 = arith.constant 0 : index
      %16 = vector.load %arg4[%c0_13, %c0_14] : memref<512x128xbf16, #tpu.memory_space<vmem>>, vector<512x128xbf16>
      tpu.vector_store %arg4[%c0_13, %c0_14], %15 {strides = array<i32>} : memref<512x128xbf16, #tpu.memory_space<vmem>>, vector<512x128xbf16>,
    } else {
    }
    return
  }
  func.func @transform_0(%arg0: i32, %arg1: i32) -> (i32, i32) {
    %c0_i32 = arith.constant 0 : i32
    return %arg0, %arg1 : i32, i32
  }
  func.func @transform_1(%arg0: i32, %arg1: i32) -> (i32, i32) {
    %c0_i32 = arith.constant 0 : i32
    %c0_i32_0 = arith.constant 0 : i32
    return %arg1, %c0_i32 : i32, i32
  }
  func.func @transform_2(%arg0: i32, %arg1: i32) -> (i32, i32) {
    %c0_i32 = arith.constant 0 : i32
    %c0_i32_0 = arith.constant 0 : i32
    return %arg0, %c0_i32 : i32, i32
  }
}

module attributes {stable_mosaic.version = 11 : i64} {
  func.func @_fused_mm_kernel(%arg0: i32, %arg1: i32, %arg2: memref<512x36xbf16, #tpu.memory_space<vmem>>, %arg3: memref<36x128xbf16, #tpu.memory_space<vmem>>, %arg4: memref<512x128xbf16, #tpu.memory_space<vmem>>, %arg5: memref<512x128xf32, #tpu.memory_space<vmem>>) attributes {dimension_semantics = [#tpu.dimension_semantics<parallel>, #tpu.dimension_semantics<arbitrary>], iteration_bounds = array<i64: 2, 1>, scalar_prefetch = 0 : i64, scratch_operands = 1 : i64, tpu.core_type = #tpu.core_type<tc>, window_params = [{transform_indices = @transform_0, window_bounds = array<i64: 512, 36>}, {transform_indices = @transform_1, window_bounds = array<i64: 36, 128>}, {transform_indices = @transform_2, window_bounds = array<i64: 512, 128>}]} {
    %c0_i32 = arith.constant 0 : i32
    %0 = arith.cmpi eq, %arg1, %c0_i32 : i32
    %1 = arith.extui %0 : i1 to i32
    %c0_i32_0 = arith.constant 0 : i32
    %2 = arith.cmpi ne, %1, %c0_i32_0 : i32
    scf.if %2 {
      %cst_10 = arith.constant 0.000000e+00 : f32
      %12 = vector.broadcast %cst_10 : f32 to vector<512x128xf32>
      %c0_11 = arith.constant 0 : index
      %c0_12 = arith.constant 0 : index
      %13 = vector.load %arg5[%c0_11, %c0_12] : memref<512x128xf32, #tpu.memory_space<vmem>>, vector<512x128xf32>
      tpu.vector_store %arg5[%c0_11, %c0_12], %12 {strides = array<i32>} : memref<512x128xf32, #tpu.memory_space<vmem>>, vector<512x128xf32>,
    } else {
    }
    %c0 = arith.constant 0 : index
    %c0_1 = arith.constant 0 : index
    %3 = vector.load %arg5[%c0, %c0_1] : memref<512x128xf32, #tpu.memory_space<vmem>>, vector<512x128xf32>
    %c0_2 = arith.constant 0 : index
    %c0_3 = arith.constant 0 : index
    %4 = vector.load %arg2[%c0_2, %c0_3] : memref<512x36xbf16, #tpu.memory_space<vmem>>, vector<512x36xbf16>
    %c0_4 = arith.constant 0 : index
    %c0_5 = arith.constant 0 : index
    %5 = vector.load %arg3[%c0_4, %c0_5] : memref<36x128xbf16, #tpu.memory_space<vmem>>, vector<36x128xbf16>
    %cst = arith.constant dense<0.000000e+00> : vector<512x128xf32>
    %6 = tpu.matmul %4, %5, %cst {dimension_numbers = #tpu.dot_dimension_numbers<[1], [0], [0], [1], [0, 0, 1, 1], [], []>} : vector<512x36xbf16>, vector<36x128xbf16>, vector<512x128xf32> -> vector<512x128xf32>
    %7 = arith.addf %3, %6 : vector<512x128xf32>
    %c0_6 = arith.constant 0 : index
    %c0_7 = arith.constant 0 : index
    %8 = vector.load %arg5[%c0_6, %c0_7] : memref<512x128xf32, #tpu.memory_space<vmem>>, vector<512x128xf32>
    tpu.vector_store %arg5[%c0_6, %c0_7], %7 {strides = array<i32>} : memref<512x128xf32, #tpu.memory_space<vmem>>, vector<512x128xf32>,
    %c0_i32_8 = arith.constant 0 : i32
    %9 = arith.cmpi eq, %arg1, %c0_i32_8 : i32
    %10 = arith.extui %9 : i1 to i32
    %c0_i32_9 = arith.constant 0 : i32
    %11 = arith.cmpi ne, %10, %c0_i32_9 : i32
    scf.if %11 {
      %c0_10 = arith.constant 0 : index
      %c0_11 = arith.constant 0 : index
      %12 = vector.load %arg5[%c0_10, %c0_11] : memref<512x128xf32, #tpu.memory_space<vmem>>, vector<512x128xf32>
      %cst_12 = arith.constant 0.000000e+00 : f32
      %13 = vector.broadcast %cst_12 : f32 to vector<512x128xf32>
      %14 = arith.maximumf %12, %13 : vector<512x128xf32>
      %15 = arith.truncf %14 : vector<512x128xf32> to vector<512x128xbf16>
      %c0_13 = arith.constant 0 : index
      %c0_14 = arith.constant 0 : index
      %16 = vector.load %arg4[%c0_13, %c0_14] : memref<512x128xbf16, #tpu.memory_space<vmem>>, vector<512x128xbf16>
      tpu.vector_store %arg4[%c0_13, %c0_14], %15 {strides = array<i32>} : memref<512x128xbf16, #tpu.memory_space<vmem>>, vector<512x128xbf16>,
    } else {
    }
    return
  }
  func.func @transform_0(%arg0: i32, %arg1: i32) -> (i32, i32) {
    %c0_i32 = arith.constant 0 : i32
    return %arg0, %arg1 : i32, i32
  }
  func.func @transform_1(%arg0: i32, %arg1: i32) -> (i32, i32) {
    %c0_i32 = arith.constant 0 : i32
    %c0_i32_0 = arith.constant 0 : i32
    return %arg1, %c0_i32 : i32, i32
  }
  func.func @transform_2(%arg0: i32, %arg1: i32) -> (i32, i32) {
    %c0_i32 = arith.constant 0 : i32
    %c0_i32_0 = arith.constant 0 : i32
    return %arg0, %c0_i32 : i32, i32
  }
}

module attributes {stable_mosaic.version = 11 : i64} {
  func.func @_fused_mm_kernel(%arg0: i32, %arg1: i32, %arg2: memref<512x16xbf16, #tpu.memory_space<vmem>>, %arg3: memref<16x128xbf16, #tpu.memory_space<vmem>>, %arg4: memref<512x128xbf16, #tpu.memory_space<vmem>>, %arg5: memref<512x128xbf16, #tpu.memory_space<vmem>>, %arg6: memref<512x128xf32, #tpu.memory_space<vmem>>) attributes {dimension_semantics = [#tpu.dimension_semantics<parallel>, #tpu.dimension_semantics<arbitrary>], iteration_bounds = array<i64: 2, 1>, scalar_prefetch = 0 : i64, scratch_operands = 1 : i64, tpu.core_type = #tpu.core_type<tc>, window_params = [{transform_indices = @transform_0, window_bounds = array<i64: 512, 16>}, {transform_indices = @transform_1, window_bounds = array<i64: 16, 128>}, {transform_indices = @transform_2, window_bounds = array<i64: 512, 128>}, {transform_indices = @transform_3, window_bounds = array<i64: 512, 128>}]} {
    %c0_i32 = arith.constant 0 : i32
    %0 = arith.cmpi eq, %arg1, %c0_i32 : i32
    %1 = arith.extui %0 : i1 to i32
    %c0_i32_0 = arith.constant 0 : i32
    %2 = arith.cmpi ne, %1, %c0_i32_0 : i32
    scf.if %2 {
      %cst_10 = arith.constant 0.000000e+00 : f32
      %12 = vector.broadcast %cst_10 : f32 to vector<512x128xf32>
      %c0_11 = arith.constant 0 : index
      %c0_12 = arith.constant 0 : index
      %13 = vector.load %arg6[%c0_11, %c0_12] : memref<512x128xf32, #tpu.memory_space<vmem>>, vector<512x128xf32>
      tpu.vector_store %arg6[%c0_11, %c0_12], %12 {strides = array<i32>} : memref<512x128xf32, #tpu.memory_space<vmem>>, vector<512x128xf32>,
    } else {
    }
    %c0 = arith.constant 0 : index
    %c0_1 = arith.constant 0 : index
    %3 = vector.load %arg6[%c0, %c0_1] : memref<512x128xf32, #tpu.memory_space<vmem>>, vector<512x128xf32>
    %c0_2 = arith.constant 0 : index
    %c0_3 = arith.constant 0 : index
    %4 = vector.load %arg2[%c0_2, %c0_3] : memref<512x16xbf16, #tpu.memory_space<vmem>>, vector<512x16xbf16>
    %c0_4 = arith.constant 0 : index
    %c0_5 = arith.constant 0 : index
    %5 = vector.load %arg3[%c0_4, %c0_5] : memref<16x128xbf16, #tpu.memory_space<vmem>>, vector<16x128xbf16>
    %cst = arith.constant dense<0.000000e+00> : vector<512x128xf32>
    %6 = tpu.matmul %4, %5, %cst {dimension_numbers = #tpu.dot_dimension_numbers<[1], [0], [0], [1], [0, 0, 1, 1], [], []>} : vector<512x16xbf16>, vector<16x128xbf16>, vector<512x128xf32> -> vector<512x128xf32>
    %7 = arith.addf %3, %6 : vector<512x128xf32>
    %c0_6 = arith.constant 0 : index
    %c0_7 = arith.constant 0 : index
    %8 = vector.load %arg6[%c0_6, %c0_7] : memref<512x128xf32, #tpu.memory_space<vmem>>, vector<512x128xf32>
    tpu.vector_store %arg6[%c0_6, %c0_7], %7 {strides = array<i32>} : memref<512x128xf32, #tpu.memory_space<vmem>>, vector<512x128xf32>,
    %c0_i32_8 = arith.constant 0 : i32
    %9 = arith.cmpi eq, %arg1, %c0_i32_8 : i32
    %10 = arith.extui %9 : i1 to i32
    %c0_i32_9 = arith.constant 0 : i32
    %11 = arith.cmpi ne, %10, %c0_i32_9 : i32
    scf.if %11 {
      %c0_10 = arith.constant 0 : index
      %c0_11 = arith.constant 0 : index
      %12 = vector.load %arg6[%c0_10, %c0_11] : memref<512x128xf32, #tpu.memory_space<vmem>>, vector<512x128xf32>
      %c0_12 = arith.constant 0 : index
      %c0_13 = arith.constant 0 : index
      %13 = vector.load %arg4[%c0_12, %c0_13] : memref<512x128xbf16, #tpu.memory_space<vmem>>, vector<512x128xbf16>
      %14 = arith.extf %13 : vector<512x128xbf16> to vector<512x128xf32>
      %15 = arith.addf %12, %14 : vector<512x128xf32>
      %cst_14 = arith.constant 0.000000e+00 : f32
      %16 = vector.broadcast %cst_14 : f32 to vector<512x128xf32>
      %17 = arith.maximumf %15, %16 : vector<512x128xf32>
      %18 = arith.truncf %17 : vector<512x128xf32> to vector<512x128xbf16>
      %c0_15 = arith.constant 0 : index
      %c0_16 = arith.constant 0 : index
      %19 = vector.load %arg5[%c0_15, %c0_16] : memref<512x128xbf16, #tpu.memory_space<vmem>>, vector<512x128xbf16>
      tpu.vector_store %arg5[%c0_15, %c0_16], %18 {strides = array<i32>} : memref<512x128xbf16, #tpu.memory_space<vmem>>, vector<512x128xbf16>,
    } else {
    }
    return
  }
  func.func @transform_0(%arg0: i32, %arg1: i32) -> (i32, i32) {
    %c0_i32 = arith.constant 0 : i32
    return %arg0, %arg1 : i32, i32
  }
  func.func @transform_1(%arg0: i32, %arg1: i32) -> (i32, i32) {
    %c0_i32 = arith.constant 0 : i32
    %c0_i32_0 = arith.constant 0 : i32
    return %arg1, %c0_i32 : i32, i32
  }
  func.func @transform_2(%arg0: i32, %arg1: i32) -> (i32, i32) {
    %c0_i32 = arith.constant 0 : i32
    %c0_i32_0 = arith.constant 0 : i32
    return %arg0, %c0_i32 : i32, i32
  }
  func.func @transform_3(%arg0: i32, %arg1: i32) -> (i32, i32) {
    %c0_i32 = arith.constant 0 : i32
    %c0_i32_0 = arith.constant 0 : i32
    return %arg0, %c0_i32 : i32, i32
  }
}

module attributes {stable_mosaic.version = 11 : i64} {
  func.func @_fused_mm_kernel(%arg0: i32, %arg1: i32, %arg2: memref<256x144xbf16, #tpu.memory_space<vmem>>, %arg3: memref<144x128xbf16, #tpu.memory_space<vmem>>, %arg4: memref<256x128xbf16, #tpu.memory_space<vmem>>, %arg5: memref<256x128xf32, #tpu.memory_space<vmem>>) attributes {dimension_semantics = [#tpu.dimension_semantics<parallel>, #tpu.dimension_semantics<arbitrary>], iteration_bounds = array<i64: 1, 1>, scalar_prefetch = 0 : i64, scratch_operands = 1 : i64, tpu.core_type = #tpu.core_type<tc>, window_params = [{transform_indices = @transform_0, window_bounds = array<i64: 256, 144>}, {transform_indices = @transform_1, window_bounds = array<i64: 144, 128>}, {transform_indices = @transform_2, window_bounds = array<i64: 256, 128>}]} {
    %c0_i32 = arith.constant 0 : i32
    %0 = arith.cmpi eq, %arg1, %c0_i32 : i32
    %1 = arith.extui %0 : i1 to i32
    %c0_i32_0 = arith.constant 0 : i32
    %2 = arith.cmpi ne, %1, %c0_i32_0 : i32
    scf.if %2 {
      %cst_10 = arith.constant 0.000000e+00 : f32
      %12 = vector.broadcast %cst_10 : f32 to vector<256x128xf32>
      %c0_11 = arith.constant 0 : index
      %c0_12 = arith.constant 0 : index
      %13 = vector.load %arg5[%c0_11, %c0_12] : memref<256x128xf32, #tpu.memory_space<vmem>>, vector<256x128xf32>
      tpu.vector_store %arg5[%c0_11, %c0_12], %12 {strides = array<i32>} : memref<256x128xf32, #tpu.memory_space<vmem>>, vector<256x128xf32>,
    } else {
    }
    %c0 = arith.constant 0 : index
    %c0_1 = arith.constant 0 : index
    %3 = vector.load %arg5[%c0, %c0_1] : memref<256x128xf32, #tpu.memory_space<vmem>>, vector<256x128xf32>
    %c0_2 = arith.constant 0 : index
    %c0_3 = arith.constant 0 : index
    %4 = vector.load %arg2[%c0_2, %c0_3] : memref<256x144xbf16, #tpu.memory_space<vmem>>, vector<256x144xbf16>
    %c0_4 = arith.constant 0 : index
    %c0_5 = arith.constant 0 : index
    %5 = vector.load %arg3[%c0_4, %c0_5] : memref<144x128xbf16, #tpu.memory_space<vmem>>, vector<144x128xbf16>
    %cst = arith.constant dense<0.000000e+00> : vector<256x128xf32>
    %6 = tpu.matmul %4, %5, %cst {dimension_numbers = #tpu.dot_dimension_numbers<[1], [0], [0], [1], [0, 0, 1, 1], [], []>} : vector<256x144xbf16>, vector<144x128xbf16>, vector<256x128xf32> -> vector<256x128xf32>
    %7 = arith.addf %3, %6 : vector<256x128xf32>
    %c0_6 = arith.constant 0 : index
    %c0_7 = arith.constant 0 : index
    %8 = vector.load %arg5[%c0_6, %c0_7] : memref<256x128xf32, #tpu.memory_space<vmem>>, vector<256x128xf32>
    tpu.vector_store %arg5[%c0_6, %c0_7], %7 {strides = array<i32>} : memref<256x128xf32, #tpu.memory_space<vmem>>, vector<256x128xf32>,
    %c0_i32_8 = arith.constant 0 : i32
    %9 = arith.cmpi eq, %arg1, %c0_i32_8 : i32
    %10 = arith.extui %9 : i1 to i32
    %c0_i32_9 = arith.constant 0 : i32
    %11 = arith.cmpi ne, %10, %c0_i32_9 : i32
    scf.if %11 {
      %c0_10 = arith.constant 0 : index
      %c0_11 = arith.constant 0 : index
      %12 = vector.load %arg5[%c0_10, %c0_11] : memref<256x128xf32, #tpu.memory_space<vmem>>, vector<256x128xf32>
      %cst_12 = arith.constant 0.000000e+00 : f32
      %13 = vector.broadcast %cst_12 : f32 to vector<256x128xf32>
      %14 = arith.maximumf %12, %13 : vector<256x128xf32>
      %15 = arith.truncf %14 : vector<256x128xf32> to vector<256x128xbf16>
      %c0_13 = arith.constant 0 : index
      %c0_14 = arith.constant 0 : index
      %16 = vector.load %arg4[%c0_13, %c0_14] : memref<256x128xbf16, #tpu.memory_space<vmem>>, vector<256x128xbf16>
      tpu.vector_store %arg4[%c0_13, %c0_14], %15 {strides = array<i32>} : memref<256x128xbf16, #tpu.memory_space<vmem>>, vector<256x128xbf16>,
    } else {
    }
    return
  }
  func.func @transform_0(%arg0: i32, %arg1: i32) -> (i32, i32) {
    %c0_i32 = arith.constant 0 : i32
    return %arg0, %arg1 : i32, i32
  }
  func.func @transform_1(%arg0: i32, %arg1: i32) -> (i32, i32) {
    %c0_i32 = arith.constant 0 : i32
    %c0_i32_0 = arith.constant 0 : i32
    return %arg1, %c0_i32 : i32, i32
  }
  func.func @transform_2(%arg0: i32, %arg1: i32) -> (i32, i32) {
    %c0_i32 = arith.constant 0 : i32
    %c0_i32_0 = arith.constant 0 : i32
    return %arg0, %c0_i32 : i32, i32
  }
}

module attributes {stable_mosaic.version = 11 : i64} {
  func.func @_fused_mm_kernel(%arg0: i32, %arg1: i32, %arg2: memref<512x288xbf16, #tpu.memory_space<vmem>>, %arg3: memref<288x128xbf16, #tpu.memory_space<vmem>>, %arg4: memref<512x128xbf16, #tpu.memory_space<vmem>>, %arg5: memref<128x128xbf16, #tpu.memory_space<vmem>>, %arg6: memref<512x128xbf16, #tpu.memory_space<vmem>>, %arg7: memref<512x128xf32, #tpu.memory_space<vmem>>, %arg8: memref<512x128xf32, #tpu.memory_space<vmem>>) attributes {dimension_semantics = [#tpu.dimension_semantics<parallel>, #tpu.dimension_semantics<arbitrary>], iteration_bounds = array<i64: 1, 1>, scalar_prefetch = 0 : i64, scratch_operands = 1 : i64, tpu.core_type = #tpu.core_type<tc>, window_params = [{transform_indices = @transform_0, window_bounds = array<i64: 512, 288>}, {transform_indices = @transform_1, window_bounds = array<i64: 288, 128>}, {transform_indices = @transform_2, window_bounds = array<i64: 512, 128>}, {pipeline_mode = #tpu.pipeline_mode<synchronous>, transform_indices = @transform_3, window_bounds = array<i64: 128, 128>}, {transform_indices = @transform_4, window_bounds = array<i64: 512, 128>}, {transform_indices = @transform_5, window_bounds = array<i64: 512, 128>}]} {
    %c0_i32 = arith.constant 0 : i32
    %0 = arith.cmpi eq, %arg1, %c0_i32 : i32
    %1 = arith.extui %0 : i1 to i32
    %c0_i32_0 = arith.constant 0 : i32
    %2 = arith.cmpi ne, %1, %c0_i32_0 : i32
    scf.if %2 {
      %cst_10 = arith.constant 0.000000e+00 : f32
      %12 = vector.broadcast %cst_10 : f32 to vector<512x128xf32>
      %c0_11 = arith.constant 0 : index
      %c0_12 = arith.constant 0 : index
      %13 = vector.load %arg8[%c0_11, %c0_12] : memref<512x128xf32, #tpu.memory_space<vmem>>, vector<512x128xf32>
      tpu.vector_store %arg8[%c0_11, %c0_12], %12 {strides = array<i32>} : memref<512x128xf32, #tpu.memory_space<vmem>>, vector<512x128xf32>,
    } else {
    }
    %c0 = arith.constant 0 : index
    %c0_1 = arith.constant 0 : index
    %3 = vector.load %arg8[%c0, %c0_1] : memref<512x128xf32, #tpu.memory_space<vmem>>, vector<512x128xf32>
    %c0_2 = arith.constant 0 : index
    %c0_3 = arith.constant 0 : index
    %4 = vector.load %arg2[%c0_2, %c0_3] : memref<512x288xbf16, #tpu.memory_space<vmem>>, vector<512x288xbf16>
    %c0_4 = arith.constant 0 : index
    %c0_5 = arith.constant 0 : index
    %5 = vector.load %arg3[%c0_4, %c0_5] : memref<288x128xbf16, #tpu.memory_space<vmem>>, vector<288x128xbf16>
    %cst = arith.constant dense<0.000000e+00> : vector<512x128xf32>
    %6 = tpu.matmul %4, %5, %cst {dimension_numbers = #tpu.dot_dimension_numbers<[1], [0], [0], [1], [0, 0, 1, 1], [], []>} : vector<512x288xbf16>, vector<288x128xbf16>, vector<512x128xf32> -> vector<512x128xf32>
    %7 = arith.addf %3, %6 : vector<512x128xf32>
    %c0_6 = arith.constant 0 : index
    %c0_7 = arith.constant 0 : index
    %8 = vector.load %arg8[%c0_6, %c0_7] : memref<512x128xf32, #tpu.memory_space<vmem>>, vector<512x128xf32>
    tpu.vector_store %arg8[%c0_6, %c0_7], %7 {strides = array<i32>} : memref<512x128xf32, #tpu.memory_space<vmem>>, vector<512x128xf32>,
    %c0_i32_8 = arith.constant 0 : i32
    %9 = arith.cmpi eq, %arg1, %c0_i32_8 : i32
    %10 = arith.extui %9 : i1 to i32
    %c0_i32_9 = arith.constant 0 : i32
    %11 = arith.cmpi ne, %10, %c0_i32_9 : i32
    scf.if %11 {
      %c0_10 = arith.constant 0 : index
      %c0_11 = arith.constant 0 : index
      %12 = vector.load %arg8[%c0_10, %c0_11] : memref<512x128xf32, #tpu.memory_space<vmem>>, vector<512x128xf32>
      %c0_12 = arith.constant 0 : index
      %c0_13 = arith.constant 0 : index
      %13 = vector.load %arg4[%c0_12, %c0_13] : memref<512x128xbf16, #tpu.memory_space<vmem>>, vector<512x128xbf16>
      %14 = arith.extf %13 : vector<512x128xbf16> to vector<512x128xf32>
      %15 = arith.addf %12, %14 : vector<512x128xf32>
      %cst_14 = arith.constant 0.000000e+00 : f32
      %16 = vector.broadcast %cst_14 : f32 to vector<512x128xf32>
      %17 = arith.maximumf %15, %16 : vector<512x128xf32>
      %18 = arith.truncf %17 : vector<512x128xf32> to vector<512x128xbf16>
      %c0_15 = arith.constant 0 : index
      %c0_16 = arith.constant 0 : index
      %19 = vector.load %arg6[%c0_15, %c0_16] : memref<512x128xbf16, #tpu.memory_space<vmem>>, vector<512x128xbf16>
      tpu.vector_store %arg6[%c0_15, %c0_16], %18 {strides = array<i32>} : memref<512x128xbf16, #tpu.memory_space<vmem>>, vector<512x128xbf16>,
      %20 = arith.truncf %17 : vector<512x128xf32> to vector<512x128xbf16>
      %c0_17 = arith.constant 0 : index
      %c0_18 = arith.constant 0 : index
      %21 = vector.load %arg5[%c0_17, %c0_18] : memref<128x128xbf16, #tpu.memory_space<vmem>>, vector<128x128xbf16>
      %cst_19 = arith.constant dense<0.000000e+00> : vector<512x128xf32>
      %22 = tpu.matmul %20, %21, %cst_19 {dimension_numbers = #tpu.dot_dimension_numbers<[1], [0], [0], [1], [0, 0, 1, 1], [], []>} : vector<512x128xbf16>, vector<128x128xbf16>, vector<512x128xf32> -> vector<512x128xf32>
      %c0_20 = arith.constant 0 : index
      %c0_21 = arith.constant 0 : index
      %23 = vector.load %arg7[%c0_20, %c0_21] : memref<512x128xf32, #tpu.memory_space<vmem>>, vector<512x128xf32>
      tpu.vector_store %arg7[%c0_20, %c0_21], %22 {strides = array<i32>} : memref<512x128xf32, #tpu.memory_space<vmem>>, vector<512x128xf32>,
    } else {
    }
    return
  }
  func.func @transform_0(%arg0: i32, %arg1: i32) -> (i32, i32) {
    %c0_i32 = arith.constant 0 : i32
    return %arg0, %arg1 : i32, i32
  }
  func.func @transform_1(%arg0: i32, %arg1: i32) -> (i32, i32) {
    %c0_i32 = arith.constant 0 : i32
    %c0_i32_0 = arith.constant 0 : i32
    return %arg1, %c0_i32 : i32, i32
  }
  func.func @transform_2(%arg0: i32, %arg1: i32) -> (i32, i32) {
    %c0_i32 = arith.constant 0 : i32
    %c0_i32_0 = arith.constant 0 : i32
    return %arg0, %c0_i32 : i32, i32
  }
  func.func @transform_3(%arg0: i32, %arg1: i32) -> (i32, i32) {
    %c0_i32 = arith.constant 0 : i32
    %c0_i32_0 = arith.constant 0 : i32
    %c0_i32_1 = arith.constant 0 : i32
    return %c0_i32, %c0_i32_0 : i32, i32
  }
  func.func @transform_4(%arg0: i32, %arg1: i32) -> (i32, i32) {
    %c0_i32 = arith.constant 0 : i32
    %c0_i32_0 = arith.constant 0 : i32
    return %arg0, %c0_i32 : i32, i32
  }
  func.func @transform_5(%arg0: i32, %arg1: i32) -> (i32, i32) {
    %c0_i32 = arith.constant 0 : i32
    %c0_i32_0 = arith.constant 0 : i32
    return %arg0, %c0_i32 : i32, i32
  }
}

module attributes {stable_mosaic.version = 11 : i64} {
  func.func @_fused_mm_kernel(%arg0: i32, %arg1: i32, %arg2: memref<512x32xbf16, #tpu.memory_space<vmem>>, %arg3: memref<32x128xbf16, #tpu.memory_space<vmem>>, %arg4: memref<512x128xf32, #tpu.memory_space<vmem>>, %arg5: memref<512x128xf32, #tpu.memory_space<vmem>>) attributes {dimension_semantics = [#tpu.dimension_semantics<parallel>, #tpu.dimension_semantics<arbitrary>], iteration_bounds = array<i64: 1, 1>, scalar_prefetch = 0 : i64, scratch_operands = 1 : i64, tpu.core_type = #tpu.core_type<tc>, window_params = [{transform_indices = @transform_0, window_bounds = array<i64: 512, 32>}, {transform_indices = @transform_1, window_bounds = array<i64: 32, 128>}, {transform_indices = @transform_2, window_bounds = array<i64: 512, 128>}]} {
    %c0_i32 = arith.constant 0 : i32
    %0 = arith.cmpi eq, %arg1, %c0_i32 : i32
    %1 = arith.extui %0 : i1 to i32
    %c0_i32_0 = arith.constant 0 : i32
    %2 = arith.cmpi ne, %1, %c0_i32_0 : i32
    scf.if %2 {
      %cst_10 = arith.constant 0.000000e+00 : f32
      %12 = vector.broadcast %cst_10 : f32 to vector<512x128xf32>
      %c0_11 = arith.constant 0 : index
      %c0_12 = arith.constant 0 : index
      %13 = vector.load %arg5[%c0_11, %c0_12] : memref<512x128xf32, #tpu.memory_space<vmem>>, vector<512x128xf32>
      tpu.vector_store %arg5[%c0_11, %c0_12], %12 {strides = array<i32>} : memref<512x128xf32, #tpu.memory_space<vmem>>, vector<512x128xf32>,
    } else {
    }
    %c0 = arith.constant 0 : index
    %c0_1 = arith.constant 0 : index
    %3 = vector.load %arg5[%c0, %c0_1] : memref<512x128xf32, #tpu.memory_space<vmem>>, vector<512x128xf32>
    %c0_2 = arith.constant 0 : index
    %c0_3 = arith.constant 0 : index
    %4 = vector.load %arg2[%c0_2, %c0_3] : memref<512x32xbf16, #tpu.memory_space<vmem>>, vector<512x32xbf16>
    %c0_4 = arith.constant 0 : index
    %c0_5 = arith.constant 0 : index
    %5 = vector.load %arg3[%c0_4, %c0_5] : memref<32x128xbf16, #tpu.memory_space<vmem>>, vector<32x128xbf16>
    %cst = arith.constant dense<0.000000e+00> : vector<512x128xf32>
    %6 = tpu.matmul %4, %5, %cst {dimension_numbers = #tpu.dot_dimension_numbers<[1], [0], [0], [1], [0, 0, 1, 1], [], []>} : vector<512x32xbf16>, vector<32x128xbf16>, vector<512x128xf32> -> vector<512x128xf32>
    %7 = arith.addf %3, %6 : vector<512x128xf32>
    %c0_6 = arith.constant 0 : index
    %c0_7 = arith.constant 0 : index
    %8 = vector.load %arg5[%c0_6, %c0_7] : memref<512x128xf32, #tpu.memory_space<vmem>>, vector<512x128xf32>
    tpu.vector_store %arg5[%c0_6, %c0_7], %7 {strides = array<i32>} : memref<512x128xf32, #tpu.memory_space<vmem>>, vector<512x128xf32>,
    %c0_i32_8 = arith.constant 0 : i32
    %9 = arith.cmpi eq, %arg1, %c0_i32_8 : i32
    %10 = arith.extui %9 : i1 to i32
    %c0_i32_9 = arith.constant 0 : i32
    %11 = arith.cmpi ne, %10, %c0_i32_9 : i32
    scf.if %11 {
      %c0_10 = arith.constant 0 : index
      %c0_11 = arith.constant 0 : index
      %12 = vector.load %arg5[%c0_10, %c0_11] : memref<512x128xf32, #tpu.memory_space<vmem>>, vector<512x128xf32>
      %c0_12 = arith.constant 0 : index
      %c0_13 = arith.constant 0 : index
      %13 = vector.load %arg4[%c0_12, %c0_13] : memref<512x128xf32, #tpu.memory_space<vmem>>, vector<512x128xf32>
      tpu.vector_store %arg4[%c0_12, %c0_13], %12 {strides = array<i32>} : memref<512x128xf32, #tpu.memory_space<vmem>>, vector<512x128xf32>,
    } else {
    }
    return
  }
  func.func @transform_0(%arg0: i32, %arg1: i32) -> (i32, i32) {
    %c0_i32 = arith.constant 0 : i32
    return %arg0, %arg1 : i32, i32
  }
  func.func @transform_1(%arg0: i32, %arg1: i32) -> (i32, i32) {
    %c0_i32 = arith.constant 0 : i32
    %c0_i32_0 = arith.constant 0 : i32
    return %arg1, %c0_i32 : i32, i32
  }
  func.func @transform_2(%arg0: i32, %arg1: i32) -> (i32, i32) {
    %c0_i32 = arith.constant 0 : i32
    %c0_i32_0 = arith.constant 0 : i32
    return %arg0, %c0_i32 : i32, i32
  }
}

</mosaic_0001>

<bundles_post_ra>
// kernel: net_forward.10
= control target key start
LH: loop header
LB: loop body
LE: loop exit
PB: predicated region body
PF: predicated region fallthrough
CT: control target
= control target key end

     0   :  { %s2166_s9 = smov 0   ;;  %s2168_s10 = smov 0   ;;  %s2315_s0 = inlined_call_operand.vmem [shape: bf16[1024,36], index: 0, kind: input, shape index: {}]   ;;  %s2316_s1 = inlined_call_operand.vmem [shape: bf16[36,128], index: 1, kind: input, shape index: {}]   ;;  %s2317_s2 = inlined_call_operand.vmem [shape: bf16[1024,128], index: 2, kind: output, shape index: {}]  }
   0x1   :  { %s2170_s11 = smov 0  }
   0x2 LB: > { %s24_s12 = sadd.s32 1, %s2145_s10  ;;  %p1562_p0 = scmp.ge.s32.totalorder %s2149_s11, 1  ;;  %s2149_s11 = sphi %s2170_s11, %s12_s11   ;;  %s2145_s10 = sphi %s2168_s10, %s2319_s10   ;;  %s2141_s9 = sphi %s2166_s9, %s2318_s9  }
   0x3   : > { %p26_p1 = scmp.ge.s32.totalorder %s24_s12, 2  ;;  %p141_p2 = scmp.lt.s32.totalorder %s2149_s11, 3 }
   0x5   : > { %s2321_s12 = smov (%p26_p1, %s24_s12), 0  ;;  %p142_p3 = pnand %p1562_p0, %p141_p2 }
   0x6   : > { %v2092_v0 = vld [vmem:[%s2316_s1] sm:$0xff] (!%p142_p3)   ;;  %v2093_v1 = vld [vmem:[%s2316_s1 + $0x8] sm:$0xff] (!%p142_p3)   ;;  %s1563_s17 = sshll.u32 (!%p142_p3), %s2141_s9, 6  ;;  %v2094_v2 = vld [vmem:[%s2316_s1 + $0x10] ss:$0 sps:$4 sm:$0x33] (!%p142_p3)  }
   0x7   : > { %145 = sbr.rel (%p142_p3) target bundleno = 294 (0x126), region = 28  ;;  %1990 = vmatprep.subr.bf16.mxu0 (!%p142_p3), %v2092_v0  ;;  %2060 = vmatprep.subr.bf16.mxu1 (!%p142_p3), %v2092_v0  ;;  %p172_p4 = scmp.lt.s32.totalorder (!%p142_p3), %s1563_s17, 127  ;;  %vm666_vm0 = vcmask (!%p142_p3), 1041408   ;;  %vm569_vm1 = vcmask (!%p142_p3), 293888  }
   0x8   : > { %1991 = vmatpush3.bf16.msra.mxu0 (!%p142_p3), %v2092_v0  ;;  %2063 = vmatpush3.bf16.msra.mxu1 (!%p142_p3), %v2092_v0  ;;  %v668_v3 = vsel (!%p142_p3), %vm666_vm0, %v2094_v2, 0 }
   0x9   : > { %1992 = vmatprep.subr.bf16.mxu0 (!%p142_p3), %v2093_v1  ;;  %2061 = vmatprep.subr.bf16.mxu1 (!%p142_p3), %v2093_v1 }
   0xc   : > { %1993 = vmatpush3.bf16.msra.mxu0 (!%p142_p3), %v2093_v1  ;;  %2064 = vmatpush3.bf16.msra.mxu1 (!%p142_p3), %v2093_v1 }
   0xd   : > { %2066 = vmatprep.subr.msk.bf16.mxu0 (!%p142_p3), %vm666_vm0, %v2094_v2  ;;  %2067 = vmatprep.subr.msk.bf16.mxu1 (!%p142_p3), %vm666_vm0, %v2094_v2 }
   0xe   : > { %s2323_s17 = smov (!%p172_p4, %s1563_s17), 127 }
   0xf   : > { %s1564_s20 = sshll.u32 %s2323_s17, 2 }
  0x10   : > { %s2201_s23 = scalar_lea.vmem %s2315_s0, %s1564_s20  ;;  %1995 = vmatpush3.bf16.msra.mxu0 %v668_v3  ;;  %2065 = vmatpush3.bf16.msra.mxu1 %v668_v3  ;;  %s2272_s26 = scalar_lea.vmem %s2317_s2, %s1564_s20 }
  0x11   : > { %v2095_v4 = vld [vmem:[%s2201_s23] sm:$0xff]   ;;  %v2097_v6 = vld [vmem:[%s2201_s23 + $0x8] sm:$0xff]   ;;  %v2099_v8 = vld [vmem:[%s2201_s23 + $0x10] sm:$0xff]  }
  0x12   : > { %v2096_v5 = vld [vmem:[%s2201_s23 + $0x80] sm:$0xff]   ;;  %1996 = vmatprep.mubr.msk.bf16.mxu0 %vm569_vm1, %v2095_v4  ;;  %v2098_v7 = vld [vmem:[%s2201_s23 + $0x88] sm:$0xff]   ;;  %v2100_v9 = vld [vmem:[%s2201_s23 + $0x90] sm:$0xff]  }
  0x13   : > { %2028 = vmatprep.mubr.msk.bf16.mxu1 %vm569_vm1, %v2096_v5  ;;  %1997 = vmatmul.mubr.msk.bf16.vlgmr.msra.gmra.mrb[0].mxu0 %vm569_vm1, %v2097_v6  ;;  %v2101_v10 = vld [vmem:[%s2201_s23 + $0x18] sm:$0xff]   ;;  %v2103_v12 = vld [vmem:[%s2201_s23 + $0x20] sm:$0xff]   ;;  %v2105_v14 = vld [vmem:[%s2201_s23 + $0x28] sm:$0xff]  }
  0x14   : > { %2029 = vmatmul.mubr.msk.bf16.vlgmr.msra.gmra.mrb[0].mxu1 %vm569_vm1, %v2098_v7  ;;  %2000 = vmatprep.mubr.msk.bf16.mxu0 %vm569_vm1, %v2099_v8  ;;  %v2102_v11 = vld [vmem:[%s2201_s23 + $0x98] sm:$0xff]   ;;  %v2104_v13 = vld [vmem:[%s2201_s23 + $0xa0] sm:$0xff]   ;;  %v2106_v15 = vld [vmem:[%s2201_s23 + $0xa8] sm:$0xff]  }
  0x15   : > { %2032 = vmatprep.mubr.msk.bf16.mxu1 %vm569_vm1, %v2100_v9  ;;  %v2107_v16 = vld [vmem:[%s2201_s23 + $0x30] sm:$0xff]   ;;  %v2109_v18 = vld [vmem:[%s2201_s23 + $0x38] sm:$0xff]   ;;  %v2111_v20 = vld [vmem:[%s2201_s23 + $0x40] sm:$0xff]  }
  0x16   : > { %v2108_v17 = vld [vmem:[%s2201_s23 + $0xb0] sm:$0xff]   ;;  %v2110_v19 = vld [vmem:[%s2201_s23 + $0xb8] sm:$0xff]   ;;  %v2112_v21 = vld [vmem:[%s2201_s23 + $0xc0] sm:$0xff]  }
  0x17   : > { %v2113_v22 = vld [vmem:[%s2201_s23 + $0x48] sm:$0xff]   ;;  %v2115_v24 = vld [vmem:[%s2201_s23 + $0x50] sm:$0xff]   ;;  %v2117_v26 = vld [vmem:[%s2201_s23 + $0x58] sm:$0xff]  }
  0x18   : > { %v2114_v23 = vld [vmem:[%s2201_s23 + $0xc8] sm:$0xff]   ;;  %v2116_v25 = vld [vmem:[%s2201_s23 + $0xd0] sm:$0xff]   ;;  %v2118_v27 = vld [vmem:[%s2201_s23 + $0xd8] sm:$0xff]  }
  0x19   : > { %v2119_v28 = vld [vmem:[%s2201_s23 + $0x60] sm:$0xff]   ;;  %v2121_v30 = vld [vmem:[%s2201_s23 + $0x68] sm:$0xff]   ;;  %v2123_v32 = vld [vmem:[%s2201_s23 + $0x70] sm:$0xff]  }
  0x1a   : > { %v2120_v29 = vld [vmem:[%s2201_s23 + $0xe0] sm:$0xff]   ;;  %v2122_v31 = vld [vmem:[%s2201_s23 + $0xe8] sm:$0xff]   ;;  %v2124_v33 = vld [vmem:[%s2201_s23 + $0xf0] sm:$0xff]  }
  0x1b   : > { %2001 = vmatmul.mubr.msk.bf16.gmra.mrb[4].mxu0 %vm569_vm1, %v2101_v10  ;;  %v2125_v34 = vld [vmem:[%s2201_s23 + $0x78] sm:$0xff]  }
  0x1c   : > { %2033 = vmatmul.mubr.msk.bf16.gmra.mrb[4].mxu1 %vm569_vm1, %v2102_v11  ;;  %2004 = vmatprep.mubr.msk.bf16.mxu0 %vm569_vm1, %v2103_v12  ;;  %v2126_v35 = vld [vmem:[%s2201_s23 + $0xf8] sm:$0xff]  }
  0x1d   : > { %2036 = vmatprep.mubr.msk.bf16.mxu1 %vm569_vm1, %v2104_v13 }
  0x23   : > { %2005 = vmatmul.mubr.msk.bf16.gmra.mrb[8].mxu0 %vm569_vm1, %v2105_v14 }
  0x24   : > { %2037 = vmatmul.mubr.msk.bf16.gmra.mrb[8].mxu1 %vm569_vm1, %v2106_v15  ;;  %2008 = vmatprep.mubr.msk.bf16.mxu0 %vm569_vm1, %v2107_v16 }
  0x25   : > { %2040 = vmatprep.mubr.msk.bf16.mxu1 %vm569_vm1, %v2108_v17 }
  0x2b   : > { %2009 = vmatmul.mubr.msk.bf16.gmra.mrb[12].mxu0 %vm569_vm1, %v2109_v18 }
  0x2c   : > { %2041 = vmatmul.mubr.msk.bf16.gmra.mrb[12].mxu1 %vm569_vm1, %v2110_v19  ;;  %2012 = vmatprep.mubr.msk.bf16.mxu0 %vm569_vm1, %v2111_v20 }
  0x2d   : > { %2044 = vmatprep.mubr.msk.bf16.mxu1 %vm569_vm1, %v2112_v21 }
  0x33   : > { %2013 = vmatmul.mubr.msk.bf16.gmra.mrb[16].mxu0 %vm569_vm1, %v2113_v22 }
  0x34   : > { %2045 = vmatmul.mubr.msk.bf16.gmra.mrb[16].mxu1 %vm569_vm1, %v2114_v23  ;;  %2016 = vmatprep.mubr.msk.bf16.mxu0 %vm569_vm1, %v2115_v24 }
  0x35   : > { %2048 = vmatprep.mubr.msk.bf16.mxu1 %vm569_vm1, %v2116_v25 }
  0x3b   : > { %2017 = vmatmul.mubr.msk.bf16.gmra.mrb[20].mxu0 %vm569_vm1, %v2117_v26 }
  0x3c   : > { %2049 = vmatmul.mubr.msk.bf16.gmra.mrb[20].mxu1 %vm569_vm1, %v2118_v27  ;;  %2020 = vmatprep.mubr.msk.bf16.mxu0 %vm569_vm1, %v2119_v28 }
  0x3d   : > { %2052 = vmatprep.mubr.msk.bf16.mxu1 %vm569_vm1, %v2120_v29 }
  0x43   : > { %2021 = vmatmul.mubr.msk.bf16.gmra.mrb[24].mxu0 %vm569_vm1, %v2121_v30 }
  0x44   : > { %2053 = vmatmul.mubr.msk.bf16.gmra.mrb[24].mxu1 %vm569_vm1, %v2122_v31  ;;  %2024 = vmatprep.mubr.msk.bf16.mxu0 %vm569_vm1, %v2123_v32 }
  0x45   : > { %2056 = vmatprep.mubr.msk.bf16.mxu1 %vm569_vm1, %v2124_v33 }
  0x4b   : > { %2025 = vmatmul.mubr.msk.bf16.gmra.mrb[28].mxu0 %vm569_vm1, %v2125_v34 }
  0x4c   : > { %2057 = vmatmul.mubr.msk.bf16.gmra.mrb[28].mxu1 %vm569_vm1, %v2126_v35 }
  0xe6   : > { %v1998_v36 = vpop.f32.mrb[0].mxu0 }
  0xe7   : > { %v2030_v37 = vpop.f32.mrb[0].mxu1  ;;  %v704_v38 = vpop.f32.mrb[1].mxu0 }
  0xe8   : > { %v832_v39 = vpop.f32.mrb[1].mxu1  ;;  %v1999_v40 = vpop.f32.mrb[2].mxu0 }
  0xe9   : > { %v2031_v41 = vpop.f32.mrb[2].mxu1  ;;  %v1772_v42 = vpack.c.bf16 %v1999_v40, %v1998_v36  ;;  %v707_v44 = vpop.f32.mrb[3].mxu0 }
  0xea   : > { %v1852_v43 = vpack.c.bf16 %v2031_v41, %v2030_v37  ;;  %v835_v45 = vpop.f32.mrb[3].mxu1  ;;  %v1767_v46 = vpack.c.bf16 %v707_v44, %v704_v38 }
  0xeb   : > { %v1847_v47 = vpack.c.bf16 %v835_v45, %v832_v39  ;;  %1924 = vst [vmem:[%s2272_s26 + $0x8] sm:$0xff] %v1772_v42  }
  0xec   : > { %1940 = vst [vmem:[%s2272_s26 + $0x88] sm:$0xff] %v1852_v43   ;;  %1768 = vst [vmem:[%s2272_s26] sm:$0xff] %v1767_v46  }
  0xed   : > { %1939 = vst [vmem:[%s2272_s26 + $0x80] sm:$0xff] %v1847_v47  }
  0xee   : > { %v2002_v48 = vpop.f32.mrb[4].mxu0 }
  0xef   : > { %v2034_v49 = vpop.f32.mrb[4].mxu1  ;;  %v720_v50 = vpop.f32.mrb[5].mxu0 }
  0xf0   : > { %v848_v51 = vpop.f32.mrb[5].mxu1  ;;  %v2003_v52 = vpop.f32.mrb[6].mxu0 }
  0xf1   : > { %v2035_v53 = vpop.f32.mrb[6].mxu1  ;;  %v1782_v54 = vpack.c.bf16 %v2003_v52, %v2002_v48  ;;  %v723_v56 = vpop.f32.mrb[7].mxu0 }
  0xf2   : > { %v1862_v55 = vpack.c.bf16 %v2035_v53, %v2034_v49  ;;  %v851_v57 = vpop.f32.mrb[7].mxu1  ;;  %v1777_v58 = vpack.c.bf16 %v723_v56, %v720_v50 }
  0xf3   : > { %v1857_v59 = vpack.c.bf16 %v851_v57, %v848_v51  ;;  %1926 = vst [vmem:[%s2272_s26 + $0x18] sm:$0xff] %v1782_v54  }
  0xf4   : > { %1942 = vst [vmem:[%s2272_s26 + $0x98] sm:$0xff] %v1862_v55   ;;  %1925 = vst [vmem:[%s2272_s26 + $0x10] sm:$0xff] %v1777_v58  }
  0xf5   : > { %1941 = vst [vmem:[%s2272_s26 + $0x90] sm:$0xff] %v1857_v59  }
  0xf6   : > { %v2006_v60 = vpop.f32.mrb[8].mxu0 }
  0xf7   : > { %v2038_v61 = vpop.f32.mrb[8].mxu1  ;;  %v736_v62 = vpop.f32.mrb[9].mxu0 }
  0xf8   : > { %v864_v63 = vpop.f32.mrb[9].mxu1  ;;  %v2007_v0 = vpop.f32.mrb[10].mxu0 }
  0xf9   : > { %v2039_v1 = vpop.f32.mrb[10].mxu1  ;;  %v1792_v2 = vpack.c.bf16 %v2007_v0, %v2006_v60  ;;  %v739_v4 = vpop.f32.mrb[11].mxu0 }
  0xfa   : > { %v1872_v3 = vpack.c.bf16 %v2039_v1, %v2038_v61  ;;  %v867_v5 = vpop.f32.mrb[11].mxu1  ;;  %v1787_v6 = vpack.c.bf16 %v739_v4, %v736_v62 }
  0xfb   : > { %v1867_v7 = vpack.c.bf16 %v867_v5, %v864_v63  ;;  %1928 = vst [vmem:[%s2272_s26 + $0x28] sm:$0xff] %v1792_v2  }
  0xfc   : > { %1944 = vst [vmem:[%s2272_s26 + $0xa8] sm:$0xff] %v1872_v3   ;;  %1927 = vst [vmem:[%s2272_s26 + $0x20] sm:$0xff] %v1787_v6  }
  0xfd   : > { %1943 = vst [vmem:[%s2272_s26 + $0xa0] sm:$0xff] %v1867_v7  }
  0xfe   : > { %v2010_v8 = vpop.f32.mrb[12].mxu0 }
  0xff   : > { %v2042_v9 = vpop.f32.mrb[12].mxu1  ;;  %v752_v10 = vpop.f32.mrb[13].mxu0 }
 0x100   : > { %v880_v11 = vpop.f32.mrb[13].mxu1  ;;  %v2011_v12 = vpop.f32.mrb[14].mxu0 }
 0x101   : > { %v2043_v13 = vpop.f32.mrb[14].mxu1  ;;  %v1802_v14 = vpack.c.bf16 %v2011_v12, %v2010_v8  ;;  %v755_v16 = vpop.f32.mrb[15].mxu0 }
 0x102   : > { %v1882_v15 = vpack.c.bf16 %v2043_v13, %v2042_v9  ;;  %v883_v17 = vpop.f32.mrb[15].mxu1  ;;  %v1797_v18 = vpack.c.bf16 %v755_v16, %v752_v10 }
 0x103   : > { %v1877_v19 = vpack.c.bf16 %v883_v17, %v880_v11  ;;  %1930 = vst [vmem:[%s2272_s26 + $0x38] sm:$0xff] %v1802_v14  }
 0x104   : > { %1946 = vst [vmem:[%s2272_s26 + $0xb8] sm:$0xff] %v1882_v15   ;;  %1929 = vst [vmem:[%s2272_s26 + $0x30] sm:$0xff] %v1797_v18  }
 0x105   : > { %1945 = vst [vmem:[%s2272_s26 + $0xb0] sm:$0xff] %v1877_v19  }
 0x106   : > { %v2014_v20 = vpop.f32.mrb[16].mxu0 }
 0x107   : > { %v2046_v21 = vpop.f32.mrb[16].mxu1  ;;  %v768_v22 = vpop.f32.mrb[17].mxu0 }
 0x108   : > { %v896_v23 = vpop.f32.mrb[17].mxu1  ;;  %v2015_v24 = vpop.f32.mrb[18].mxu0 }
 0x109   : > { %v2047_v25 = vpop.f32.mrb[18].mxu1  ;;  %v1812_v26 = vpack.c.bf16 %v2015_v24, %v2014_v20  ;;  %v771_v28 = vpop.f32.mrb[19].mxu0 }
 0x10a   : > { %v1892_v27 = vpack.c.bf16 %v2047_v25, %v2046_v21  ;;  %v899_v29 = vpop.f32.mrb[19].mxu1  ;;  %v1807_v30 = vpack.c.bf16 %v771_v28, %v768_v22 }
 0x10b   : > { %v1887_v31 = vpack.c.bf16 %v899_v29, %v896_v23  ;;  %1932 = vst [vmem:[%s2272_s26 + $0x48] sm:$0xff] %v1812_v26  }
 0x10c   : > { %1948 = vst [vmem:[%s2272_s26 + $0xc8] sm:$0xff] %v1892_v27   ;;  %1931 = vst [vmem:[%s2272_s26 + $0x40] sm:$0xff] %v1807_v30  }
 0x10d   : > { %1947 = vst [vmem:[%s2272_s26 + $0xc0] sm:$0xff] %v1887_v31  }
 0x10e   : > { %v2018_v32 = vpop.f32.mrb[20].mxu0 }
 0x10f   : > { %v2050_v33 = vpop.f32.mrb[20].mxu1  ;;  %v784_v34 = vpop.f32.mrb[21].mxu0 }
 0x110   : > { %v912_v35 = vpop.f32.mrb[21].mxu1  ;;  %v2019_v36 = vpop.f32.mrb[22].mxu0 }
 0x111   : > { %v2051_v37 = vpop.f32.mrb[22].mxu1  ;;  %v1822_v38 = vpack.c.bf16 %v2019_v36, %v2018_v32  ;;  %v787_v40 = vpop.f32.mrb[23].mxu0 }
 0x112   : > { %v1902_v39 = vpack.c.bf16 %v2051_v37, %v2050_v33  ;;  %v915_v41 = vpop.f32.mrb[23].mxu1  ;;  %v1817_v42 = vpack.c.bf16 %v787_v40, %v784_v34 }
 0x113   : > { %v1897_v43 = vpack.c.bf16 %v915_v41, %v912_v35  ;;  %1934 = vst [vmem:[%s2272_s26 + $0x58] sm:$0xff] %v1822_v38  }
 0x114   : > { %1950 = vst [vmem:[%s2272_s26 + $0xd8] sm:$0xff] %v1902_v39   ;;  %1933 = vst [vmem:[%s2272_s26 + $0x50] sm:$0xff] %v1817_v42  }
 0x115   : > { %1949 = vst [vmem:[%s2272_s26 + $0xd0] sm:$0xff] %v1897_v43  }
 0x116   : > { %v2022_v44 = vpop.f32.mrb[24].mxu0 }
 0x117   : > { %v2054_v45 = vpop.f32.mrb[24].mxu1  ;;  %v800_v46 = vpop.f32.mrb[25].mxu0 }
 0x118   : > { %v928_v47 = vpop.f32.mrb[25].mxu1  ;;  %v2023_v48 = vpop.f32.mrb[26].mxu0 }
 0x119   : > { %v2055_v49 = vpop.f32.mrb[26].mxu1  ;;  %v1832_v50 = vpack.c.bf16 %v2023_v48, %v2022_v44  ;;  %v803_v52 = vpop.f32.mrb[27].mxu0 }
 0x11a   : > { %v1912_v51 = vpack.c.bf16 %v2055_v49, %v2054_v45  ;;  %v931_v53 = vpop.f32.mrb[27].mxu1  ;;  %v1827_v54 = vpack.c.bf16 %v803_v52, %v800_v46 }
 0x11b   : > { %v1907_v55 = vpack.c.bf16 %v931_v53, %v928_v47  ;;  %1936 = vst [vmem:[%s2272_s26 + $0x68] sm:$0xff] %v1832_v50  }
 0x11c   : > { %1952 = vst [vmem:[%s2272_s26 + $0xe8] sm:$0xff] %v1912_v51   ;;  %1935 = vst [vmem:[%s2272_s26 + $0x60] sm:$0xff] %v1827_v54  }
 0x11d   : > { %1951 = vst [vmem:[%s2272_s26 + $0xe0] sm:$0xff] %v1907_v55  }
 0x11e   : > { %v2026_v56 = vpop.f32.mrb[28].mxu0 }
 0x11f   : > { %v2058_v57 = vpop.f32.mrb[28].mxu1  ;;  %v816_v58 = vpop.f32.mrb[29].mxu0 }
 0x120   : > { %v944_v59 = vpop.f32.mrb[29].mxu1  ;;  %v2027_v60 = vpop.f32.mrb[30].mxu0 }
 0x121   : > { %v2059_v61 = vpop.f32.mrb[30].mxu1  ;;  %v1842_v62 = vpack.c.bf16 %v2027_v60, %v2026_v56  ;;  %v819_v0 = vpop.f32.mrb[31].mxu0 }
 0x122   : > { %v1922_v63 = vpack.c.bf16 %v2059_v61, %v2058_v57  ;;  %v947_v1 = vpop.f32.mrb[31].mxu1  ;;  %v1837_v2 = vpack.c.bf16 %v819_v0, %v816_v58 }
 0x123   : > { %v1917_v3 = vpack.c.bf16 %v947_v1, %v944_v59  ;;  %1938 = vst [vmem:[%s2272_s26 + $0x78] sm:$0xff] %v1842_v62  }
 0x124   : > { %1954 = vst [vmem:[%s2272_s26 + $0xf8] sm:$0xff] %v1922_v63   ;;  %1937 = vst [vmem:[%s2272_s26 + $0x70] sm:$0xff] %v1837_v2  }
 0x125   : > { %1953 = vst [vmem:[%s2272_s26 + $0xf0] sm:$0xff] %v1917_v3  }
 0x126 PF: > { %s12_s11 = sadd.s32 1, %s2149_s11   ;;  %s2318_s9 = smov %s2145_s10 }
 0x127   : > { %p9_p5 = scmp.ge.s32.totalorder %s12_s11, 4   ;;  %s2319_s10 = smov %s2321_s12 }
 0x129   :  { %11 = sbr.rel (!%p9_p5) target bundleno = 2 (0x2), region = 69 }

// kernel: net_forward.11
= control target key start
LH: loop header
LB: loop body
LE: loop exit
PB: predicated region body
PF: predicated region fallthrough
CT: control target
= control target key end

     0   :  { %s2221_s9 = smov 0   ;;  %s2223_s10 = smov 0   ;;  %s2367_s0 = inlined_call_operand.vmem [shape: bf16[1024,27], index: 0, kind: input, shape index: {}]   ;;  %s2368_s1 = inlined_call_operand.vmem [shape: bf16[27,128], index: 1, kind: input, shape index: {}]   ;;  %s2369_s2 = inlined_call_operand.vmem [shape: bf16[1024,128], index: 2, kind: output, shape index: {}]  }
   0x1   :  { %s2225_s11 = smov 0  }
   0x2 LB: > { %s24_s12 = sadd.s32 1, %s2199_s10  ;;  %p1624_p0 = scmp.ge.s32.totalorder %s2203_s11, 1  ;;  %s2203_s11 = sphi %s2225_s11, %s12_s11   ;;  %s2199_s10 = sphi %s2223_s10, %s2371_s10   ;;  %s2195_s9 = sphi %s2221_s9, %s2370_s9  }
   0x3   : > { %p26_p1 = scmp.ge.s32.totalorder %s24_s12, 2  ;;  %p141_p2 = scmp.lt.s32.totalorder %s2203_s11, 3 }
   0x5   : > { %s2373_s12 = smov (%p26_p1, %s24_s12), 0  ;;  %p142_p3 = pnand %p1624_p0, %p141_p2 }
   0x6   : > { %v2147_v0 = vld [vmem:[%s2368_s1] sm:$0xff] (!%p142_p3)   ;;  %vm661_vm0 = vcmask (!%p142_p3), 1044480   ;;  %v2148_v1 = vld [vmem:[%s2368_s1 + $0x8] sm:$0x3f] (!%p142_p3)   ;;  %vm662_vm1 = vcmask (!%p142_p3), 1045504   ;;  %s1625_s17 = sshll.u32 (!%p142_p3), %s2195_s9, 6 }
   0x7   : > { %145 = sbr.rel (%p142_p3) target bundleno = 296 (0x128), region = 28  ;;  %2050 = vmatprep.subr.bf16.mxu0 (!%p142_p3), %v2147_v0  ;;  %2118 = vmatprep.subr.bf16.mxu1 (!%p142_p3), %v2147_v0  ;;  %v2205_v2 = vmov (!%p142_p3), 65535   ;;  %p172_p4 = scmp.lt.s32.totalorder (!%p142_p3), %s1625_s17, 127  ;;  %vm564_vm2 = vcmask (!%p142_p3), 220160  }
   0x8   : > { %2051 = vmatpush3.bf16.msra.mxu0 (!%p142_p3), %v2147_v0  ;;  %2120 = vmatpush3.bf16.msra.mxu1 (!%p142_p3), %v2147_v0  ;;  %v663_v3 = vsel (!%p142_p3), %vm661_vm0, 4294967295, %v2205_v2 }
   0x9   : > { %v664_v4 = vsel (!%p142_p3), %vm662_vm1, %v663_v3, 0 }
   0xa   : > { %v666_v5 = vand.u32 (!%p142_p3), %v2148_v1, %v664_v4 }
   0xc   : > { %2052 = vmatprep.subr.bf16.mxu0 (!%p142_p3), %v666_v5  ;;  %2119 = vmatprep.subr.bf16.mxu1 (!%p142_p3), %v666_v5 }
   0xd   : > { %2053 = vmatpush3.bf16.msra.mxu0 (!%p142_p3), %v666_v5  ;;  %2121 = vmatpush3.bf16.msra.mxu1 (!%p142_p3), %v666_v5 }
   0xe   : > { %s2375_s17 = smov (!%p172_p4, %s1625_s17), 127 }
   0xf   : > { %s1626_s18 = sshll.u32 %s2375_s17, 2 }
  0x10   : > { %s2253_s21 = scalar_lea.vmem %s2367_s0, %s1626_s18  ;;  %s2324_s24 = scalar_lea.vmem %s2369_s2, %s1626_s18 }
  0x11   : > { %v2149_v6 = vld [vmem:[%s2253_s21] sm:$0xff]   ;;  %v2151_v8 = vld [vmem:[%s2253_s21 + $0x8] sm:$0xff]   ;;  %v2153_v10 = vld [vmem:[%s2253_s21 + $0x10] sm:$0xff]  }
  0x12   : > { %v2150_v7 = vld [vmem:[%s2253_s21 + $0x80] sm:$0xff]   ;;  %2054 = vmatprep.mubr.msk.bf16.mxu0 %vm564_vm2, %v2149_v6  ;;  %v2152_v9 = vld [vmem:[%s2253_s21 + $0x88] sm:$0xff]   ;;  %v2154_v11 = vld [vmem:[%s2253_s21 + $0x90] sm:$0xff]  }
  0x13   : > { %2086 = vmatprep.mubr.msk.bf16.mxu1 %vm564_vm2, %v2150_v7  ;;  %2055 = vmatmul.mubr.msk.bf16.vlgmr.msra.gmra.mrb[0].mxu0 %vm564_vm2, %v2151_v8  ;;  %v2155_v12 = vld [vmem:[%s2253_s21 + $0x18] sm:$0xff]   ;;  %v2157_v14 = vld [vmem:[%s2253_s21 + $0x20] sm:$0xff]   ;;  %v2159_v16 = vld [vmem:[%s2253_s21 + $0x28] sm:$0xff]  }
  0x14   : > { %2087 = vmatmul.mubr.msk.bf16.vlgmr.msra.gmra.mrb[0].mxu1 %vm564_vm2, %v2152_v9  ;;  %2058 = vmatprep.mubr.msk.bf16.mxu0 %vm564_vm2, %v2153_v10  ;;  %v2156_v13 = vld [vmem:[%s2253_s21 + $0x98] sm:$0xff]   ;;  %v2158_v15 = vld [vmem:[%s2253_s21 + $0xa0] sm:$0xff]   ;;  %v2160_v17 = vld [vmem:[%s2253_s21 + $0xa8] sm:$0xff]  }
  0x15   : > { %2090 = vmatprep.mubr.msk.bf16.mxu1 %vm564_vm2, %v2154_v11  ;;  %v2161_v18 = vld [vmem:[%s2253_s21 + $0x30] sm:$0xff]   ;;  %v2163_v20 = vld [vmem:[%s2253_s21 + $0x38] sm:$0xff]   ;;  %v2165_v22 = vld [vmem:[%s2253_s21 + $0x40] sm:$0xff]  }
  0x16   : > { %v2162_v19 = vld [vmem:[%s2253_s21 + $0xb0] sm:$0xff]   ;;  %v2164_v21 = vld [vmem:[%s2253_s21 + $0xb8] sm:$0xff]   ;;  %v2166_v23 = vld [vmem:[%s2253_s21 + $0xc0] sm:$0xff]  }
  0x17   : > { %v2167_v24 = vld [vmem:[%s2253_s21 + $0x48] sm:$0xff]   ;;  %v2169_v26 = vld [vmem:[%s2253_s21 + $0x50] sm:$0xff]   ;;  %v2171_v28 = vld [vmem:[%s2253_s21 + $0x58] sm:$0xff]  }
  0x18   : > { %v2168_v25 = vld [vmem:[%s2253_s21 + $0xc8] sm:$0xff]   ;;  %v2170_v27 = vld [vmem:[%s2253_s21 + $0xd0] sm:$0xff]   ;;  %v2172_v29 = vld [vmem:[%s2253_s21 + $0xd8] sm:$0xff]  }
  0x19   : > { %v2173_v30 = vld [vmem:[%s2253_s21 + $0x60] sm:$0xff]   ;;  %v2175_v32 = vld [vmem:[%s2253_s21 + $0x68] sm:$0xff]   ;;  %v2177_v34 = vld [vmem:[%s2253_s21 + $0x70] sm:$0xff]  }
  0x1a   : > { %v2174_v31 = vld [vmem:[%s2253_s21 + $0xe0] sm:$0xff]   ;;  %v2176_v33 = vld [vmem:[%s2253_s21 + $0xe8] sm:$0xff]   ;;  %v2178_v35 = vld [vmem:[%s2253_s21 + $0xf0] sm:$0xff]  }
  0x1b   : > { %2059 = vmatmul.mubr.msk.bf16.gmra.mrb[4].mxu0 %vm564_vm2, %v2155_v12  ;;  %v2179_v36 = vld [vmem:[%s2253_s21 + $0x78] sm:$0xff]  }
  0x1c   : > { %2091 = vmatmul.mubr.msk.bf16.gmra.mrb[4].mxu1 %vm564_vm2, %v2156_v13  ;;  %2062 = vmatprep.mubr.msk.bf16.mxu0 %vm564_vm2, %v2157_v14  ;;  %v2180_v37 = vld [vmem:[%s2253_s21 + $0xf8] sm:$0xff]  }
  0x1d   : > { %2094 = vmatprep.mubr.msk.bf16.mxu1 %vm564_vm2, %v2158_v15 }
  0x23   : > { %2063 = vmatmul.mubr.msk.bf16.gmra.mrb[8].mxu0 %vm564_vm2, %v2159_v16 }
  0x24   : > { %2095 = vmatmul.mubr.msk.bf16.gmra.mrb[8].mxu1 %vm564_vm2, %v2160_v17  ;;  %2066 = vmatprep.mubr.msk.bf16.mxu0 %vm564_vm2, %v2161_v18 }
  0x25   : > { %2098 = vmatprep.mubr.msk.bf16.mxu1 %vm564_vm2, %v2162_v19 }
  0x2b   : > { %2067 = vmatmul.mubr.msk.bf16.gmra.mrb[12].mxu0 %vm564_vm2, %v2163_v20 }
  0x2c   : > { %2099 = vmatmul.mubr.msk.bf16.gmra.mrb[12].mxu1 %vm564_vm2, %v2164_v21  ;;  %2070 = vmatprep.mubr.msk.bf16.mxu0 %vm564_vm2, %v2165_v22 }
  0x2d   : > { %2102 = vmatprep.mubr.msk.bf16.mxu1 %vm564_vm2, %v2166_v23 }
  0x33   : > { %2071 = vmatmul.mubr.msk.bf16.gmra.mrb[16].mxu0 %vm564_vm2, %v2167_v24 }
  0x34   : > { %2103 = vmatmul.mubr.msk.bf16.gmra.mrb[16].mxu1 %vm564_vm2, %v2168_v25  ;;  %2074 = vmatprep.mubr.msk.bf16.mxu0 %vm564_vm2, %v2169_v26 }
  0x35   : > { %2106 = vmatprep.mubr.msk.bf16.mxu1 %vm564_vm2, %v2170_v27 }
  0x3b   : > { %2075 = vmatmul.mubr.msk.bf16.gmra.mrb[20].mxu0 %vm564_vm2, %v2171_v28 }
  0x3c   : > { %2107 = vmatmul.mubr.msk.bf16.gmra.mrb[20].mxu1 %vm564_vm2, %v2172_v29  ;;  %2078 = vmatprep.mubr.msk.bf16.mxu0 %vm564_vm2, %v2173_v30 }
  0x3d   : > { %2110 = vmatprep.mubr.msk.bf16.mxu1 %vm564_vm2, %v2174_v31 }
  0x43   : > { %2079 = vmatmul.mubr.msk.bf16.gmra.mrb[24].mxu0 %vm564_vm2, %v2175_v32 }
  0x44   : > { %2111 = vmatmul.mubr.msk.bf16.gmra.mrb[24].mxu1 %vm564_vm2, %v2176_v33  ;;  %2082 = vmatprep.mubr.msk.bf16.mxu0 %vm564_vm2, %v2177_v34 }
  0x45   : > { %2114 = vmatprep.mubr.msk.bf16.mxu1 %vm564_vm2, %v2178_v35 }
  0x4b   : > { %2083 = vmatmul.mubr.msk.bf16.gmra.mrb[28].mxu0 %vm564_vm2, %v2179_v36 }
  0x4c   : > { %2115 = vmatmul.mubr.msk.bf16.gmra.mrb[28].mxu1 %vm564_vm2, %v2180_v37 }
  0xe6   : > { %v2056_v38 = vpop.f32.mrb[0].mxu0 }
  0xe7   : > { %v2088_v39 = vpop.f32.mrb[0].mxu1  ;;  %v702_v40 = vpop.f32.mrb[1].mxu0  ;;  %v1154_v43 = vmax.f32 %v2056_v38, 0.0 }
  0xe8   : > { %v830_v41 = vpop.f32.mrb[1].mxu1  ;;  %v2057_v42 = vpop.f32.mrb[2].mxu0  ;;  %v1186_v47 = vmax.f32 %v2088_v39, 0.0  ;;  %v1152_v48 = vmax.f32 %v702_v40, 0.0 }
  0xe9   : > { %v1155_v44 = vmax.f32 %v2057_v42, 0.0  ;;  %v2089_v45 = vpop.f32.mrb[2].mxu1  ;;  %v705_v46 = vpop.f32.mrb[3].mxu0  ;;  %v1184_v52 = vmax.f32 %v830_v41, 0.0 }
  0xea   : > { %v1187_v49 = vmax.f32 %v2089_v45, 0.0  ;;  %v1153_v50 = vmax.f32 %v705_v46, 0.0  ;;  %v833_v51 = vpop.f32.mrb[3].mxu1 }
  0xeb   : > { %v1833_v53 = vpack.c.bf16 %v1155_v44, %v1154_v43  ;;  %v1185_v54 = vmax.f32 %v833_v51, 0.0 }
  0xec   : > { %v1913_v55 = vpack.c.bf16 %v1187_v49, %v1186_v47  ;;  %v1828_v56 = vpack.c.bf16 %v1153_v50, %v1152_v48 }
  0xed   : > { %1985 = vst [vmem:[%s2324_s24 + $0x8] sm:$0xff] %v1833_v53   ;;  %v1908_v57 = vpack.c.bf16 %v1185_v54, %v1184_v52 }
  0xee   : > { %2001 = vst [vmem:[%s2324_s24 + $0x88] sm:$0xff] %v1913_v55   ;;  %1829 = vst [vmem:[%s2324_s24] sm:$0xff] %v1828_v56   ;;  %v2060_v58 = vpop.f32.mrb[4].mxu0 }
  0xef   : > { %2000 = vst [vmem:[%s2324_s24 + $0x80] sm:$0xff] %v1908_v57   ;;  %v2092_v59 = vpop.f32.mrb[4].mxu1  ;;  %v718_v60 = vpop.f32.mrb[5].mxu0  ;;  %v1158_v63 = vmax.f32 %v2060_v58, 0.0 }
  0xf0   : > { %v846_v61 = vpop.f32.mrb[5].mxu1  ;;  %v2061_v62 = vpop.f32.mrb[6].mxu0  ;;  %v1190_v3 = vmax.f32 %v2092_v59, 0.0  ;;  %v1156_v4 = vmax.f32 %v718_v60, 0.0 }
  0xf1   : > { %v1159_v0 = vmax.f32 %v2061_v62, 0.0  ;;  %v2093_v1 = vpop.f32.mrb[6].mxu1  ;;  %v721_v2 = vpop.f32.mrb[7].mxu0  ;;  %v1188_v8 = vmax.f32 %v846_v61, 0.0 }
  0xf2   : > { %v1191_v5 = vmax.f32 %v2093_v1, 0.0  ;;  %v1157_v6 = vmax.f32 %v721_v2, 0.0  ;;  %v849_v7 = vpop.f32.mrb[7].mxu1 }
  0xf3   : > { %v1843_v9 = vpack.c.bf16 %v1159_v0, %v1158_v63  ;;  %v1189_v10 = vmax.f32 %v849_v7, 0.0 }
  0xf4   : > { %v1923_v11 = vpack.c.bf16 %v1191_v5, %v1190_v3  ;;  %v1838_v12 = vpack.c.bf16 %v1157_v6, %v1156_v4 }
  0xf5   : > { %1987 = vst [vmem:[%s2324_s24 + $0x18] sm:$0xff] %v1843_v9   ;;  %v1918_v13 = vpack.c.bf16 %v1189_v10, %v1188_v8 }
  0xf6   : > { %2003 = vst [vmem:[%s2324_s24 + $0x98] sm:$0xff] %v1923_v11   ;;  %1986 = vst [vmem:[%s2324_s24 + $0x10] sm:$0xff] %v1838_v12   ;;  %v2064_v14 = vpop.f32.mrb[8].mxu0 }
  0xf7   : > { %2002 = vst [vmem:[%s2324_s24 + $0x90] sm:$0xff] %v1918_v13   ;;  %v2096_v15 = vpop.f32.mrb[8].mxu1  ;;  %v734_v16 = vpop.f32.mrb[9].mxu0  ;;  %v1162_v19 = vmax.f32 %v2064_v14, 0.0 }
  0xf8   : > { %v862_v17 = vpop.f32.mrb[9].mxu1  ;;  %v2065_v18 = vpop.f32.mrb[10].mxu0  ;;  %v1194_v23 = vmax.f32 %v2096_v15, 0.0  ;;  %v1160_v24 = vmax.f32 %v734_v16, 0.0 }
  0xf9   : > { %v1163_v20 = vmax.f32 %v2065_v18, 0.0  ;;  %v2097_v21 = vpop.f32.mrb[10].mxu1  ;;  %v737_v22 = vpop.f32.mrb[11].mxu0  ;;  %v1192_v28 = vmax.f32 %v862_v17, 0.0 }
  0xfa   : > { %v1195_v25 = vmax.f32 %v2097_v21, 0.0  ;;  %v1161_v26 = vmax.f32 %v737_v22, 0.0  ;;  %v865_v27 = vpop.f32.mrb[11].mxu1 }
  0xfb   : > { %v1853_v29 = vpack.c.bf16 %v1163_v20, %v1162_v19  ;;  %v1193_v30 = vmax.f32 %v865_v27, 0.0 }
  0xfc   : > { %v1933_v31 = vpack.c.bf16 %v1195_v25, %v1194_v23  ;;  %v1848_v32 = vpack.c.bf16 %v1161_v26, %v1160_v24 }
  0xfd   : > { %1989 = vst [vmem:[%s2324_s24 + $0x28] sm:$0xff] %v1853_v29   ;;  %v1928_v33 = vpack.c.bf16 %v1193_v30, %v1192_v28 }
  0xfe   : > { %2005 = vst [vmem:[%s2324_s24 + $0xa8] sm:$0xff] %v1933_v31   ;;  %1988 = vst [vmem:[%s2324_s24 + $0x20] sm:$0xff] %v1848_v32   ;;  %v2068_v34 = vpop.f32.mrb[12].mxu0 }
  0xff   : > { %2004 = vst [vmem:[%s2324_s24 + $0xa0] sm:$0xff] %v1928_v33   ;;  %v2100_v35 = vpop.f32.mrb[12].mxu1  ;;  %v750_v36 = vpop.f32.mrb[13].mxu0  ;;  %v1166_v39 = vmax.f32 %v2068_v34, 0.0 }
 0x100   : > { %v878_v37 = vpop.f32.mrb[13].mxu1  ;;  %v2069_v38 = vpop.f32.mrb[14].mxu0  ;;  %v1198_v43 = vmax.f32 %v2100_v35, 0.0  ;;  %v1164_v44 = vmax.f32 %v750_v36, 0.0 }
 0x101   : > { %v1167_v40 = vmax.f32 %v2069_v38, 0.0  ;;  %v2101_v41 = vpop.f32.mrb[14].mxu1  ;;  %v753_v42 = vpop.f32.mrb[15].mxu0  ;;  %v1196_v48 = vmax.f32 %v878_v37, 0.0 }
 0x102   : > { %v1199_v45 = vmax.f32 %v2101_v41, 0.0  ;;  %v1165_v46 = vmax.f32 %v753_v42, 0.0  ;;  %v881_v47 = vpop.f32.mrb[15].mxu1 }
 0x103   : > { %v1863_v49 = vpack.c.bf16 %v1167_v40, %v1166_v39  ;;  %v1197_v50 = vmax.f32 %v881_v47, 0.0 }
 0x104   : > { %v1943_v51 = vpack.c.bf16 %v1199_v45, %v1198_v43  ;;  %v1858_v52 = vpack.c.bf16 %v1165_v46, %v1164_v44 }
 0x105   : > { %1991 = vst [vmem:[%s2324_s24 + $0x38] sm:$0xff] %v1863_v49   ;;  %v1938_v53 = vpack.c.bf16 %v1197_v50, %v1196_v48 }
 0x106   : > { %2007 = vst [vmem:[%s2324_s24 + $0xb8] sm:$0xff] %v1943_v51   ;;  %1990 = vst [vmem:[%s2324_s24 + $0x30] sm:$0xff] %v1858_v52   ;;  %v2072_v54 = vpop.f32.mrb[16].mxu0 }
 0x107   : > { %2006 = vst [vmem:[%s2324_s24 + $0xb0] sm:$0xff] %v1938_v53   ;;  %v2104_v55 = vpop.f32.mrb[16].mxu1  ;;  %v766_v56 = vpop.f32.mrb[17].mxu0  ;;  %v1170_v59 = vmax.f32 %v2072_v54, 0.0 }
 0x108   : > { %v894_v57 = vpop.f32.mrb[17].mxu1  ;;  %v2073_v58 = vpop.f32.mrb[18].mxu0  ;;  %v1202_v63 = vmax.f32 %v2104_v55, 0.0  ;;  %v1168_v0 = vmax.f32 %v766_v56, 0.0 }
 0x109   : > { %v1171_v60 = vmax.f32 %v2073_v58, 0.0  ;;  %v2105_v61 = vpop.f32.mrb[18].mxu1  ;;  %v769_v62 = vpop.f32.mrb[19].mxu0  ;;  %v1200_v4 = vmax.f32 %v894_v57, 0.0 }
 0x10a   : > { %v1203_v1 = vmax.f32 %v2105_v61, 0.0  ;;  %v1169_v2 = vmax.f32 %v769_v62, 0.0  ;;  %v897_v3 = vpop.f32.mrb[19].mxu1 }
 0x10b   : > { %v1873_v5 = vpack.c.bf16 %v1171_v60, %v1170_v59  ;;  %v1201_v6 = vmax.f32 %v897_v3, 0.0 }
 0x10c   : > { %v1953_v7 = vpack.c.bf16 %v1203_v1, %v1202_v63  ;;  %v1868_v8 = vpack.c.bf16 %v1169_v2, %v1168_v0 }
 0x10d   : > { %1993 = vst [vmem:[%s2324_s24 + $0x48] sm:$0xff] %v1873_v5   ;;  %v1948_v9 = vpack.c.bf16 %v1201_v6, %v1200_v4 }
 0x10e   : > { %2009 = vst [vmem:[%s2324_s24 + $0xc8] sm:$0xff] %v1953_v7   ;;  %1992 = vst [vmem:[%s2324_s24 + $0x40] sm:$0xff] %v1868_v8   ;;  %v2076_v10 = vpop.f32.mrb[20].mxu0 }
 0x10f   : > { %2008 = vst [vmem:[%s2324_s24 + $0xc0] sm:$0xff] %v1948_v9   ;;  %v2108_v11 = vpop.f32.mrb[20].mxu1  ;;  %v782_v12 = vpop.f32.mrb[21].mxu0  ;;  %v1174_v15 = vmax.f32 %v2076_v10, 0.0 }
 0x110   : > { %v910_v13 = vpop.f32.mrb[21].mxu1  ;;  %v2077_v14 = vpop.f32.mrb[22].mxu0  ;;  %v1206_v19 = vmax.f32 %v2108_v11, 0.0  ;;  %v1172_v20 = vmax.f32 %v782_v12, 0.0 }
 0x111   : > { %v1175_v16 = vmax.f32 %v2077_v14, 0.0  ;;  %v2109_v17 = vpop.f32.mrb[22].mxu1  ;;  %v785_v18 = vpop.f32.mrb[23].mxu0  ;;  %v1204_v24 = vmax.f32 %v910_v13, 0.0 }
 0x112   : > { %v1207_v21 = vmax.f32 %v2109_v17, 0.0  ;;  %v1173_v22 = vmax.f32 %v785_v18, 0.0  ;;  %v913_v23 = vpop.f32.mrb[23].mxu1 }
 0x113   : > { %v1883_v25 = vpack.c.bf16 %v1175_v16, %v1174_v15  ;;  %v1205_v26 = vmax.f32 %v913_v23, 0.0 }
 0x114   : > { %v1963_v27 = vpack.c.bf16 %v1207_v21, %v1206_v19  ;;  %v1878_v28 = vpack.c.bf16 %v1173_v22, %v1172_v20 }
 0x115   : > { %1995 = vst [vmem:[%s2324_s24 + $0x58] sm:$0xff] %v1883_v25   ;;  %v1958_v29 = vpack.c.bf16 %v1205_v26, %v1204_v24 }
 0x116   : > { %2011 = vst [vmem:[%s2324_s24 + $0xd8] sm:$0xff] %v1963_v27   ;;  %1994 = vst [vmem:[%s2324_s24 + $0x50] sm:$0xff] %v1878_v28   ;;  %v2080_v30 = vpop.f32.mrb[24].mxu0 }
 0x117   : > { %2010 = vst [vmem:[%s2324_s24 + $0xd0] sm:$0xff] %v1958_v29   ;;  %v2112_v31 = vpop.f32.mrb[24].mxu1  ;;  %v798_v32 = vpop.f32.mrb[25].mxu0  ;;  %v1178_v35 = vmax.f32 %v2080_v30, 0.0 }
 0x118   : > { %v926_v33 = vpop.f32.mrb[25].mxu1  ;;  %v2081_v34 = vpop.f32.mrb[26].mxu0  ;;  %v1210_v39 = vmax.f32 %v2112_v31, 0.0  ;;  %v1176_v40 = vmax.f32 %v798_v32, 0.0 }
 0x119   : > { %v1179_v36 = vmax.f32 %v2081_v34, 0.0  ;;  %v2113_v37 = vpop.f32.mrb[26].mxu1  ;;  %v801_v38 = vpop.f32.mrb[27].mxu0  ;;  %v1208_v44 = vmax.f32 %v926_v33, 0.0 }
 0x11a   : > { %v1211_v41 = vmax.f32 %v2113_v37, 0.0  ;;  %v1177_v42 = vmax.f32 %v801_v38, 0.0  ;;  %v929_v43 = vpop.f32.mrb[27].mxu1 }
 0x11b   : > { %v1893_v45 = vpack.c.bf16 %v1179_v36, %v1178_v35  ;;  %v1209_v46 = vmax.f32 %v929_v43, 0.0 }
 0x11c   : > { %v1973_v47 = vpack.c.bf16 %v1211_v41, %v1210_v39  ;;  %v1888_v48 = vpack.c.bf16 %v1177_v42, %v1176_v40 }
 0x11d   : > { %1997 = vst [vmem:[%s2324_s24 + $0x68] sm:$0xff] %v1893_v45   ;;  %v1968_v49 = vpack.c.bf16 %v1209_v46, %v1208_v44 }
 0x11e   : > { %2013 = vst [vmem:[%s2324_s24 + $0xe8] sm:$0xff] %v1973_v47   ;;  %1996 = vst [vmem:[%s2324_s24 + $0x60] sm:$0xff] %v1888_v48   ;;  %v2084_v50 = vpop.f32.mrb[28].mxu0 }
 0x11f   : > { %2012 = vst [vmem:[%s2324_s24 + $0xe0] sm:$0xff] %v1968_v49   ;;  %v2116_v51 = vpop.f32.mrb[28].mxu1  ;;  %v814_v52 = vpop.f32.mrb[29].mxu0  ;;  %v1182_v55 = vmax.f32 %v2084_v50, 0.0 }
 0x120   : > { %v942_v53 = vpop.f32.mrb[29].mxu1  ;;  %v2085_v54 = vpop.f32.mrb[30].mxu0  ;;  %v1214_v59 = vmax.f32 %v2116_v51, 0.0  ;;  %v1180_v60 = vmax.f32 %v814_v52, 0.0 }
 0x121   : > { %v1183_v56 = vmax.f32 %v2085_v54, 0.0  ;;  %v2117_v57 = vpop.f32.mrb[30].mxu1  ;;  %v817_v58 = vpop.f32.mrb[31].mxu0  ;;  %v1212_v0 = vmax.f32 %v942_v53, 0.0 }
 0x122   : > { %v1215_v61 = vmax.f32 %v2117_v57, 0.0  ;;  %v1181_v62 = vmax.f32 %v817_v58, 0.0  ;;  %v945_v63 = vpop.f32.mrb[31].mxu1 }
 0x123   : > { %v1903_v1 = vpack.c.bf16 %v1183_v56, %v1182_v55  ;;  %v1213_v2 = vmax.f32 %v945_v63, 0.0 }
 0x124   : > { %v1983_v3 = vpack.c.bf16 %v1215_v61, %v1214_v59  ;;  %v1898_v4 = vpack.c.bf16 %v1181_v62, %v1180_v60 }
 0x125   : > { %1999 = vst [vmem:[%s2324_s24 + $0x78] sm:$0xff] %v1903_v1   ;;  %v1978_v5 = vpack.c.bf16 %v1213_v2, %v1212_v0 }
 0x126   : > { %2015 = vst [vmem:[%s2324_s24 + $0xf8] sm:$0xff] %v1983_v3   ;;  %1998 = vst [vmem:[%s2324_s24 + $0x70] sm:$0xff] %v1898_v4  }
 0x127   : > { %2014 = vst [vmem:[%s2324_s24 + $0xf0] sm:$0xff] %v1978_v5  }
 0x128 PF: > { %s12_s11 = sadd.s32 1, %s2203_s11   ;;  %s2370_s9 = smov %s2199_s10 }
 0x129   : > { %p9_p5 = scmp.ge.s32.totalorder %s12_s11, 4   ;;  %s2371_s10 = smov %s2373_s12 }
 0x12b   :  { %11 = sbr.rel (!%p9_p5) target bundleno = 2 (0x2), region = 69 }

// kernel: net_forward.12
= control target key start
LH: loop header
LB: loop body
LE: loop exit
PB: predicated region body
PF: predicated region fallthrough
CT: control target
= control target key end

     0   :  { %s2230_s9 = smov 0   ;;  %s2232_s10 = smov 0   ;;  %s2379_s0 = inlined_call_operand.vmem [shape: bf16[1024,36], index: 0, kind: input, shape index: {}]   ;;  %s2380_s1 = inlined_call_operand.vmem [shape: bf16[36,128], index: 1, kind: input, shape index: {}]   ;;  %s2381_s2 = inlined_call_operand.vmem [shape: bf16[1024,128], index: 2, kind: output, shape index: {}]  }
   0x1   :  { %s2234_s11 = smov 0  }
   0x2 LB: > { %s24_s12 = sadd.s32 1, %s2209_s10  ;;  %p1626_p0 = scmp.ge.s32.totalorder %s2213_s11, 1  ;;  %s2213_s11 = sphi %s2234_s11, %s12_s11   ;;  %s2209_s10 = sphi %s2232_s10, %s2383_s10   ;;  %s2205_s9 = sphi %s2230_s9, %s2382_s9  }
   0x3   : > { %p26_p1 = scmp.ge.s32.totalorder %s24_s12, 2  ;;  %p141_p2 = scmp.lt.s32.totalorder %s2213_s11, 3 }
   0x5   : > { %s2385_s12 = smov (%p26_p1, %s24_s12), 0  ;;  %p142_p3 = pnand %p1626_p0, %p141_p2 }
   0x6   : > { %v2156_v0 = vld [vmem:[%s2380_s1] sm:$0xff] (!%p142_p3)   ;;  %v2157_v1 = vld [vmem:[%s2380_s1 + $0x8] sm:$0xff] (!%p142_p3)   ;;  %s1627_s17 = sshll.u32 (!%p142_p3), %s2205_s9, 6  ;;  %v2158_v2 = vld [vmem:[%s2380_s1 + $0x10] ss:$0 sps:$4 sm:$0x33] (!%p142_p3)  }
   0x7   : > { %145 = sbr.rel (%p142_p3) target bundleno = 296 (0x128), region = 28  ;;  %2054 = vmatprep.subr.bf16.mxu0 (!%p142_p3), %v2156_v0  ;;  %2124 = vmatprep.subr.bf16.mxu1 (!%p142_p3), %v2156_v0  ;;  %p172_p4 = scmp.lt.s32.totalorder (!%p142_p3), %s1627_s17, 127  ;;  %vm666_vm0 = vcmask (!%p142_p3), 1041408   ;;  %vm569_vm1 = vcmask (!%p142_p3), 293888  }
   0x8   : > { %2055 = vmatpush3.bf16.msra.mxu0 (!%p142_p3), %v2156_v0  ;;  %2127 = vmatpush3.bf16.msra.mxu1 (!%p142_p3), %v2156_v0  ;;  %v668_v3 = vsel (!%p142_p3), %vm666_vm0, %v2158_v2, 0 }
   0x9   : > { %2056 = vmatprep.subr.bf16.mxu0 (!%p142_p3), %v2157_v1  ;;  %2125 = vmatprep.subr.bf16.mxu1 (!%p142_p3), %v2157_v1 }
   0xc   : > { %2057 = vmatpush3.bf16.msra.mxu0 (!%p142_p3), %v2157_v1  ;;  %2128 = vmatpush3.bf16.msra.mxu1 (!%p142_p3), %v2157_v1 }
   0xd   : > { %2130 = vmatprep.subr.msk.bf16.mxu0 (!%p142_p3), %vm666_vm0, %v2158_v2  ;;  %2131 = vmatprep.subr.msk.bf16.mxu1 (!%p142_p3), %vm666_vm0, %v2158_v2 }
   0xe   : > { %s2387_s17 = smov (!%p172_p4, %s1627_s17), 127 }
   0xf   : > { %s1628_s20 = sshll.u32 %s2387_s17, 2 }
  0x10   : > { %s2265_s23 = scalar_lea.vmem %s2379_s0, %s1628_s20  ;;  %2059 = vmatpush3.bf16.msra.mxu0 %v668_v3  ;;  %2129 = vmatpush3.bf16.msra.mxu1 %v668_v3  ;;  %s2336_s26 = scalar_lea.vmem %s2381_s2, %s1628_s20 }
  0x11   : > { %v2159_v4 = vld [vmem:[%s2265_s23] sm:$0xff]   ;;  %v2161_v6 = vld [vmem:[%s2265_s23 + $0x8] sm:$0xff]   ;;  %v2163_v8 = vld [vmem:[%s2265_s23 + $0x10] sm:$0xff]  }
  0x12   : > { %v2160_v5 = vld [vmem:[%s2265_s23 + $0x80] sm:$0xff]   ;;  %2060 = vmatprep.mubr.msk.bf16.mxu0 %vm569_vm1, %v2159_v4  ;;  %v2162_v7 = vld [vmem:[%s2265_s23 + $0x88] sm:$0xff]   ;;  %v2164_v9 = vld [vmem:[%s2265_s23 + $0x90] sm:$0xff]  }
  0x13   : > { %2092 = vmatprep.mubr.msk.bf16.mxu1 %vm569_vm1, %v2160_v5  ;;  %2061 = vmatmul.mubr.msk.bf16.vlgmr.msra.gmra.mrb[0].mxu0 %vm569_vm1, %v2161_v6  ;;  %v2165_v10 = vld [vmem:[%s2265_s23 + $0x18] sm:$0xff]   ;;  %v2167_v12 = vld [vmem:[%s2265_s23 + $0x20] sm:$0xff]   ;;  %v2169_v14 = vld [vmem:[%s2265_s23 + $0x28] sm:$0xff]  }
  0x14   : > { %2093 = vmatmul.mubr.msk.bf16.vlgmr.msra.gmra.mrb[0].mxu1 %vm569_vm1, %v2162_v7  ;;  %2064 = vmatprep.mubr.msk.bf16.mxu0 %vm569_vm1, %v2163_v8  ;;  %v2166_v11 = vld [vmem:[%s2265_s23 + $0x98] sm:$0xff]   ;;  %v2168_v13 = vld [vmem:[%s2265_s23 + $0xa0] sm:$0xff]   ;;  %v2170_v15 = vld [vmem:[%s2265_s23 + $0xa8] sm:$0xff]  }
  0x15   : > { %2096 = vmatprep.mubr.msk.bf16.mxu1 %vm569_vm1, %v2164_v9  ;;  %v2171_v16 = vld [vmem:[%s2265_s23 + $0x30] sm:$0xff]   ;;  %v2173_v18 = vld [vmem:[%s2265_s23 + $0x38] sm:$0xff]   ;;  %v2175_v20 = vld [vmem:[%s2265_s23 + $0x40] sm:$0xff]  }
  0x16   : > { %v2172_v17 = vld [vmem:[%s2265_s23 + $0xb0] sm:$0xff]   ;;  %v2174_v19 = vld [vmem:[%s2265_s23 + $0xb8] sm:$0xff]   ;;  %v2176_v21 = vld [vmem:[%s2265_s23 + $0xc0] sm:$0xff]  }
  0x17   : > { %v2177_v22 = vld [vmem:[%s2265_s23 + $0x48] sm:$0xff]   ;;  %v2179_v24 = vld [vmem:[%s2265_s23 + $0x50] sm:$0xff]   ;;  %v2181_v26 = vld [vmem:[%s2265_s23 + $0x58] sm:$0xff]  }
  0x18   : > { %v2178_v23 = vld [vmem:[%s2265_s23 + $0xc8] sm:$0xff]   ;;  %v2180_v25 = vld [vmem:[%s2265_s23 + $0xd0] sm:$0xff]   ;;  %v2182_v27 = vld [vmem:[%s2265_s23 + $0xd8] sm:$0xff]  }
  0x19   : > { %v2183_v28 = vld [vmem:[%s2265_s23 + $0x60] sm:$0xff]   ;;  %v2185_v30 = vld [vmem:[%s2265_s23 + $0x68] sm:$0xff]   ;;  %v2187_v32 = vld [vmem:[%s2265_s23 + $0x70] sm:$0xff]  }
  0x1a   : > { %v2184_v29 = vld [vmem:[%s2265_s23 + $0xe0] sm:$0xff]   ;;  %v2186_v31 = vld [vmem:[%s2265_s23 + $0xe8] sm:$0xff]   ;;  %v2188_v33 = vld [vmem:[%s2265_s23 + $0xf0] sm:$0xff]  }
  0x1b   : > { %2065 = vmatmul.mubr.msk.bf16.gmra.mrb[4].mxu0 %vm569_vm1, %v2165_v10  ;;  %v2189_v34 = vld [vmem:[%s2265_s23 + $0x78] sm:$0xff]  }
  0x1c   : > { %2097 = vmatmul.mubr.msk.bf16.gmra.mrb[4].mxu1 %vm569_vm1, %v2166_v11  ;;  %2068 = vmatprep.mubr.msk.bf16.mxu0 %vm569_vm1, %v2167_v12  ;;  %v2190_v35 = vld [vmem:[%s2265_s23 + $0xf8] sm:$0xff]  }
  0x1d   : > { %2100 = vmatprep.mubr.msk.bf16.mxu1 %vm569_vm1, %v2168_v13 }
  0x23   : > { %2069 = vmatmul.mubr.msk.bf16.gmra.mrb[8].mxu0 %vm569_vm1, %v2169_v14 }
  0x24   : > { %2101 = vmatmul.mubr.msk.bf16.gmra.mrb[8].mxu1 %vm569_vm1, %v2170_v15  ;;  %2072 = vmatprep.mubr.msk.bf16.mxu0 %vm569_vm1, %v2171_v16 }
  0x25   : > { %2104 = vmatprep.mubr.msk.bf16.mxu1 %vm569_vm1, %v2172_v17 }
  0x2b   : > { %2073 = vmatmul.mubr.msk.bf16.gmra.mrb[12].mxu0 %vm569_vm1, %v2173_v18 }
  0x2c   : > { %2105 = vmatmul.mubr.msk.bf16.gmra.mrb[12].mxu1 %vm569_vm1, %v2174_v19  ;;  %2076 = vmatprep.mubr.msk.bf16.mxu0 %vm569_vm1, %v2175_v20 }
  0x2d   : > { %2108 = vmatprep.mubr.msk.bf16.mxu1 %vm569_vm1, %v2176_v21 }
  0x33   : > { %2077 = vmatmul.mubr.msk.bf16.gmra.mrb[16].mxu0 %vm569_vm1, %v2177_v22 }
  0x34   : > { %2109 = vmatmul.mubr.msk.bf16.gmra.mrb[16].mxu1 %vm569_vm1, %v2178_v23  ;;  %2080 = vmatprep.mubr.msk.bf16.mxu0 %vm569_vm1, %v2179_v24 }
  0x35   : > { %2112 = vmatprep.mubr.msk.bf16.mxu1 %vm569_vm1, %v2180_v25 }
  0x3b   : > { %2081 = vmatmul.mubr.msk.bf16.gmra.mrb[20].mxu0 %vm569_vm1, %v2181_v26 }
  0x3c   : > { %2113 = vmatmul.mubr.msk.bf16.gmra.mrb[20].mxu1 %vm569_vm1, %v2182_v27  ;;  %2084 = vmatprep.mubr.msk.bf16.mxu0 %vm569_vm1, %v2183_v28 }
  0x3d   : > { %2116 = vmatprep.mubr.msk.bf16.mxu1 %vm569_vm1, %v2184_v29 }
  0x43   : > { %2085 = vmatmul.mubr.msk.bf16.gmra.mrb[24].mxu0 %vm569_vm1, %v2185_v30 }
  0x44   : > { %2117 = vmatmul.mubr.msk.bf16.gmra.mrb[24].mxu1 %vm569_vm1, %v2186_v31  ;;  %2088 = vmatprep.mubr.msk.bf16.mxu0 %vm569_vm1, %v2187_v32 }
  0x45   : > { %2120 = vmatprep.mubr.msk.bf16.mxu1 %vm569_vm1, %v2188_v33 }
  0x4b   : > { %2089 = vmatmul.mubr.msk.bf16.gmra.mrb[28].mxu0 %vm569_vm1, %v2189_v34 }
  0x4c   : > { %2121 = vmatmul.mubr.msk.bf16.gmra.mrb[28].mxu1 %vm569_vm1, %v2190_v35 }
  0xe6   : > { %v2062_v36 = vpop.f32.mrb[0].mxu0 }
  0xe7   : > { %v2094_v37 = vpop.f32.mrb[0].mxu1  ;;  %v704_v38 = vpop.f32.mrb[1].mxu0  ;;  %v1156_v42 = vmax.f32 %v2062_v36, 0.0 }
  0xe8   : > { %v832_v39 = vpop.f32.mrb[1].mxu1  ;;  %v2063_v40 = vpop.f32.mrb[2].mxu0  ;;  %v1188_v43 = vmax.f32 %v2094_v37, 0.0  ;;  %v1154_v48 = vmax.f32 %v704_v38, 0.0 }
  0xe9   : > { %v2095_v41 = vpop.f32.mrb[2].mxu1  ;;  %v1157_v44 = vmax.f32 %v2063_v40, 0.0  ;;  %v707_v46 = vpop.f32.mrb[3].mxu0  ;;  %v1186_v49 = vmax.f32 %v832_v39, 0.0 }
  0xea   : > { %v1189_v45 = vmax.f32 %v2095_v41, 0.0  ;;  %v835_v47 = vpop.f32.mrb[3].mxu1  ;;  %v1155_v50 = vmax.f32 %v707_v46, 0.0 }
  0xeb   : > { %v1187_v51 = vmax.f32 %v835_v47, 0.0  ;;  %v1836_v52 = vpack.c.bf16 %v1157_v44, %v1156_v42 }
  0xec   : > { %v1916_v53 = vpack.c.bf16 %v1189_v45, %v1188_v43  ;;  %v1831_v54 = vpack.c.bf16 %v1155_v50, %v1154_v48 }
  0xed   : > { %v1911_v55 = vpack.c.bf16 %v1187_v51, %v1186_v49  ;;  %1988 = vst [vmem:[%s2336_s26 + $0x8] sm:$0xff] %v1836_v52  }
  0xee   : > { %2004 = vst [vmem:[%s2336_s26 + $0x88] sm:$0xff] %v1916_v53   ;;  %1832 = vst [vmem:[%s2336_s26] sm:$0xff] %v1831_v54   ;;  %v2066_v56 = vpop.f32.mrb[4].mxu0 }
  0xef   : > { %2003 = vst [vmem:[%s2336_s26 + $0x80] sm:$0xff] %v1911_v55   ;;  %v2098_v57 = vpop.f32.mrb[4].mxu1  ;;  %v720_v58 = vpop.f32.mrb[5].mxu0  ;;  %v1160_v62 = vmax.f32 %v2066_v56, 0.0 }
  0xf0   : > { %v848_v59 = vpop.f32.mrb[5].mxu1  ;;  %v2067_v60 = vpop.f32.mrb[6].mxu0  ;;  %v1192_v63 = vmax.f32 %v2098_v57, 0.0  ;;  %v1158_v4 = vmax.f32 %v720_v58, 0.0 }
  0xf1   : > { %v2099_v61 = vpop.f32.mrb[6].mxu1  ;;  %v1161_v0 = vmax.f32 %v2067_v60, 0.0  ;;  %v723_v2 = vpop.f32.mrb[7].mxu0  ;;  %v1190_v5 = vmax.f32 %v848_v59, 0.0 }
  0xf2   : > { %v1193_v1 = vmax.f32 %v2099_v61, 0.0  ;;  %v851_v3 = vpop.f32.mrb[7].mxu1  ;;  %v1159_v6 = vmax.f32 %v723_v2, 0.0 }
  0xf3   : > { %v1191_v7 = vmax.f32 %v851_v3, 0.0  ;;  %v1846_v8 = vpack.c.bf16 %v1161_v0, %v1160_v62 }
  0xf4   : > { %v1926_v9 = vpack.c.bf16 %v1193_v1, %v1192_v63  ;;  %v1841_v10 = vpack.c.bf16 %v1159_v6, %v1158_v4 }
  0xf5   : > { %v1921_v11 = vpack.c.bf16 %v1191_v7, %v1190_v5  ;;  %1990 = vst [vmem:[%s2336_s26 + $0x18] sm:$0xff] %v1846_v8  }
  0xf6   : > { %2006 = vst [vmem:[%s2336_s26 + $0x98] sm:$0xff] %v1926_v9   ;;  %1989 = vst [vmem:[%s2336_s26 + $0x10] sm:$0xff] %v1841_v10   ;;  %v2070_v12 = vpop.f32.mrb[8].mxu0 }
  0xf7   : > { %2005 = vst [vmem:[%s2336_s26 + $0x90] sm:$0xff] %v1921_v11   ;;  %v2102_v13 = vpop.f32.mrb[8].mxu1  ;;  %v736_v14 = vpop.f32.mrb[9].mxu0  ;;  %v1164_v18 = vmax.f32 %v2070_v12, 0.0 }
  0xf8   : > { %v864_v15 = vpop.f32.mrb[9].mxu1  ;;  %v2071_v16 = vpop.f32.mrb[10].mxu0  ;;  %v1196_v19 = vmax.f32 %v2102_v13, 0.0  ;;  %v1162_v24 = vmax.f32 %v736_v14, 0.0 }
  0xf9   : > { %v2103_v17 = vpop.f32.mrb[10].mxu1  ;;  %v1165_v20 = vmax.f32 %v2071_v16, 0.0  ;;  %v739_v22 = vpop.f32.mrb[11].mxu0  ;;  %v1194_v25 = vmax.f32 %v864_v15, 0.0 }
  0xfa   : > { %v1197_v21 = vmax.f32 %v2103_v17, 0.0  ;;  %v867_v23 = vpop.f32.mrb[11].mxu1  ;;  %v1163_v26 = vmax.f32 %v739_v22, 0.0 }
  0xfb   : > { %v1195_v27 = vmax.f32 %v867_v23, 0.0  ;;  %v1856_v28 = vpack.c.bf16 %v1165_v20, %v1164_v18 }
  0xfc   : > { %v1936_v29 = vpack.c.bf16 %v1197_v21, %v1196_v19  ;;  %v1851_v30 = vpack.c.bf16 %v1163_v26, %v1162_v24 }
  0xfd   : > { %v1931_v31 = vpack.c.bf16 %v1195_v27, %v1194_v25  ;;  %1992 = vst [vmem:[%s2336_s26 + $0x28] sm:$0xff] %v1856_v28  }
  0xfe   : > { %2008 = vst [vmem:[%s2336_s26 + $0xa8] sm:$0xff] %v1936_v29   ;;  %1991 = vst [vmem:[%s2336_s26 + $0x20] sm:$0xff] %v1851_v30   ;;  %v2074_v32 = vpop.f32.mrb[12].mxu0 }
  0xff   : > { %2007 = vst [vmem:[%s2336_s26 + $0xa0] sm:$0xff] %v1931_v31   ;;  %v2106_v33 = vpop.f32.mrb[12].mxu1  ;;  %v752_v34 = vpop.f32.mrb[13].mxu0  ;;  %v1168_v38 = vmax.f32 %v2074_v32, 0.0 }
 0x100   : > { %v880_v35 = vpop.f32.mrb[13].mxu1  ;;  %v2075_v36 = vpop.f32.mrb[14].mxu0  ;;  %v1200_v39 = vmax.f32 %v2106_v33, 0.0  ;;  %v1166_v44 = vmax.f32 %v752_v34, 0.0 }
 0x101   : > { %v2107_v37 = vpop.f32.mrb[14].mxu1  ;;  %v1169_v40 = vmax.f32 %v2075_v36, 0.0  ;;  %v755_v42 = vpop.f32.mrb[15].mxu0  ;;  %v1198_v45 = vmax.f32 %v880_v35, 0.0 }
 0x102   : > { %v1201_v41 = vmax.f32 %v2107_v37, 0.0  ;;  %v883_v43 = vpop.f32.mrb[15].mxu1  ;;  %v1167_v46 = vmax.f32 %v755_v42, 0.0 }
 0x103   : > { %v1199_v47 = vmax.f32 %v883_v43, 0.0  ;;  %v1866_v48 = vpack.c.bf16 %v1169_v40, %v1168_v38 }
 0x104   : > { %v1946_v49 = vpack.c.bf16 %v1201_v41, %v1200_v39  ;;  %v1861_v50 = vpack.c.bf16 %v1167_v46, %v1166_v44 }
 0x105   : > { %v1941_v51 = vpack.c.bf16 %v1199_v47, %v1198_v45  ;;  %1994 = vst [vmem:[%s2336_s26 + $0x38] sm:$0xff] %v1866_v48  }
 0x106   : > { %2010 = vst [vmem:[%s2336_s26 + $0xb8] sm:$0xff] %v1946_v49   ;;  %1993 = vst [vmem:[%s2336_s26 + $0x30] sm:$0xff] %v1861_v50   ;;  %v2078_v52 = vpop.f32.mrb[16].mxu0 }
 0x107   : > { %2009 = vst [vmem:[%s2336_s26 + $0xb0] sm:$0xff] %v1941_v51   ;;  %v2110_v53 = vpop.f32.mrb[16].mxu1  ;;  %v768_v54 = vpop.f32.mrb[17].mxu0  ;;  %v1172_v58 = vmax.f32 %v2078_v52, 0.0 }
 0x108   : > { %v896_v55 = vpop.f32.mrb[17].mxu1  ;;  %v2079_v56 = vpop.f32.mrb[18].mxu0  ;;  %v1204_v59 = vmax.f32 %v2110_v53, 0.0  ;;  %v1170_v0 = vmax.f32 %v768_v54, 0.0 }
 0x109   : > { %v2111_v57 = vpop.f32.mrb[18].mxu1  ;;  %v1173_v60 = vmax.f32 %v2079_v56, 0.0  ;;  %v771_v62 = vpop.f32.mrb[19].mxu0  ;;  %v1202_v1 = vmax.f32 %v896_v55, 0.0 }
 0x10a   : > { %v1205_v61 = vmax.f32 %v2111_v57, 0.0  ;;  %v899_v63 = vpop.f32.mrb[19].mxu1  ;;  %v1171_v2 = vmax.f32 %v771_v62, 0.0 }
 0x10b   : > { %v1203_v3 = vmax.f32 %v899_v63, 0.0  ;;  %v1876_v4 = vpack.c.bf16 %v1173_v60, %v1172_v58 }
 0x10c   : > { %v1956_v5 = vpack.c.bf16 %v1205_v61, %v1204_v59  ;;  %v1871_v6 = vpack.c.bf16 %v1171_v2, %v1170_v0 }
 0x10d   : > { %v1951_v7 = vpack.c.bf16 %v1203_v3, %v1202_v1  ;;  %1996 = vst [vmem:[%s2336_s26 + $0x48] sm:$0xff] %v1876_v4  }
 0x10e   : > { %2012 = vst [vmem:[%s2336_s26 + $0xc8] sm:$0xff] %v1956_v5   ;;  %1995 = vst [vmem:[%s2336_s26 + $0x40] sm:$0xff] %v1871_v6   ;;  %v2082_v8 = vpop.f32.mrb[20].mxu0 }
 0x10f   : > { %2011 = vst [vmem:[%s2336_s26 + $0xc0] sm:$0xff] %v1951_v7   ;;  %v2114_v9 = vpop.f32.mrb[20].mxu1  ;;  %v784_v10 = vpop.f32.mrb[21].mxu0  ;;  %v1176_v14 = vmax.f32 %v2082_v8, 0.0 }
 0x110   : > { %v912_v11 = vpop.f32.mrb[21].mxu1  ;;  %v2083_v12 = vpop.f32.mrb[22].mxu0  ;;  %v1208_v15 = vmax.f32 %v2114_v9, 0.0  ;;  %v1174_v20 = vmax.f32 %v784_v10, 0.0 }
 0x111   : > { %v2115_v13 = vpop.f32.mrb[22].mxu1  ;;  %v1177_v16 = vmax.f32 %v2083_v12, 0.0  ;;  %v787_v18 = vpop.f32.mrb[23].mxu0  ;;  %v1206_v21 = vmax.f32 %v912_v11, 0.0 }
 0x112   : > { %v1209_v17 = vmax.f32 %v2115_v13, 0.0  ;;  %v915_v19 = vpop.f32.mrb[23].mxu1  ;;  %v1175_v22 = vmax.f32 %v787_v18, 0.0 }
 0x113   : > { %v1207_v23 = vmax.f32 %v915_v19, 0.0  ;;  %v1886_v24 = vpack.c.bf16 %v1177_v16, %v1176_v14 }
 0x114   : > { %v1966_v25 = vpack.c.bf16 %v1209_v17, %v1208_v15  ;;  %v1881_v26 = vpack.c.bf16 %v1175_v22, %v1174_v20 }
 0x115   : > { %v1961_v27 = vpack.c.bf16 %v1207_v23, %v1206_v21  ;;  %1998 = vst [vmem:[%s2336_s26 + $0x58] sm:$0xff] %v1886_v24  }
 0x116   : > { %2014 = vst [vmem:[%s2336_s26 + $0xd8] sm:$0xff] %v1966_v25   ;;  %1997 = vst [vmem:[%s2336_s26 + $0x50] sm:$0xff] %v1881_v26   ;;  %v2086_v28 = vpop.f32.mrb[24].mxu0 }
 0x117   : > { %2013 = vst [vmem:[%s2336_s26 + $0xd0] sm:$0xff] %v1961_v27   ;;  %v2118_v29 = vpop.f32.mrb[24].mxu1  ;;  %v800_v30 = vpop.f32.mrb[25].mxu0  ;;  %v1180_v34 = vmax.f32 %v2086_v28, 0.0 }
 0x118   : > { %v928_v31 = vpop.f32.mrb[25].mxu1  ;;  %v2087_v32 = vpop.f32.mrb[26].mxu0  ;;  %v1212_v35 = vmax.f32 %v2118_v29, 0.0  ;;  %v1178_v40 = vmax.f32 %v800_v30, 0.0 }
 0x119   : > { %v2119_v33 = vpop.f32.mrb[26].mxu1  ;;  %v1181_v36 = vmax.f32 %v2087_v32, 0.0  ;;  %v803_v38 = vpop.f32.mrb[27].mxu0  ;;  %v1210_v41 = vmax.f32 %v928_v31, 0.0 }
 0x11a   : > { %v1213_v37 = vmax.f32 %v2119_v33, 0.0  ;;  %v931_v39 = vpop.f32.mrb[27].mxu1  ;;  %v1179_v42 = vmax.f32 %v803_v38, 0.0 }
 0x11b   : > { %v1211_v43 = vmax.f32 %v931_v39, 0.0  ;;  %v1896_v44 = vpack.c.bf16 %v1181_v36, %v1180_v34 }
 0x11c   : > { %v1976_v45 = vpack.c.bf16 %v1213_v37, %v1212_v35  ;;  %v1891_v46 = vpack.c.bf16 %v1179_v42, %v1178_v40 }
 0x11d   : > { %v1971_v47 = vpack.c.bf16 %v1211_v43, %v1210_v41  ;;  %2000 = vst [vmem:[%s2336_s26 + $0x68] sm:$0xff] %v1896_v44  }
 0x11e   : > { %2016 = vst [vmem:[%s2336_s26 + $0xe8] sm:$0xff] %v1976_v45   ;;  %1999 = vst [vmem:[%s2336_s26 + $0x60] sm:$0xff] %v1891_v46   ;;  %v2090_v48 = vpop.f32.mrb[28].mxu0 }
 0x11f   : > { %2015 = vst [vmem:[%s2336_s26 + $0xe0] sm:$0xff] %v1971_v47   ;;  %v2122_v49 = vpop.f32.mrb[28].mxu1  ;;  %v816_v50 = vpop.f32.mrb[29].mxu0  ;;  %v1184_v54 = vmax.f32 %v2090_v48, 0.0 }
 0x120   : > { %v944_v51 = vpop.f32.mrb[29].mxu1  ;;  %v2091_v52 = vpop.f32.mrb[30].mxu0  ;;  %v1216_v55 = vmax.f32 %v2122_v49, 0.0  ;;  %v1182_v60 = vmax.f32 %v816_v50, 0.0 }
 0x121   : > { %v2123_v53 = vpop.f32.mrb[30].mxu1  ;;  %v1185_v56 = vmax.f32 %v2091_v52, 0.0  ;;  %v819_v58 = vpop.f32.mrb[31].mxu0  ;;  %v1214_v61 = vmax.f32 %v944_v51, 0.0 }
 0x122   : > { %v1217_v57 = vmax.f32 %v2123_v53, 0.0  ;;  %v947_v59 = vpop.f32.mrb[31].mxu1  ;;  %v1183_v62 = vmax.f32 %v819_v58, 0.0 }
 0x123   : > { %v1215_v63 = vmax.f32 %v947_v59, 0.0  ;;  %v1906_v0 = vpack.c.bf16 %v1185_v56, %v1184_v54 }
 0x124   : > { %v1986_v1 = vpack.c.bf16 %v1217_v57, %v1216_v55  ;;  %v1901_v2 = vpack.c.bf16 %v1183_v62, %v1182_v60 }
 0x125   : > { %v1981_v3 = vpack.c.bf16 %v1215_v63, %v1214_v61  ;;  %2002 = vst [vmem:[%s2336_s26 + $0x78] sm:$0xff] %v1906_v0  }
 0x126   : > { %2018 = vst [vmem:[%s2336_s26 + $0xf8] sm:$0xff] %v1986_v1   ;;  %2001 = vst [vmem:[%s2336_s26 + $0x70] sm:$0xff] %v1901_v2  }
 0x127   : > { %2017 = vst [vmem:[%s2336_s26 + $0xf0] sm:$0xff] %v1981_v3  }
 0x128 PF: > { %s12_s11 = sadd.s32 1, %s2213_s11   ;;  %s2382_s9 = smov %s2209_s10 }
 0x129   : > { %p9_p5 = scmp.ge.s32.totalorder %s12_s11, 4   ;;  %s2383_s10 = smov %s2385_s12 }
 0x12b   :  { %11 = sbr.rel (!%p9_p5) target bundleno = 2 (0x2), region = 69 }

// kernel: net_forward.15
= control target key start
LH: loop header
LB: loop body
LE: loop exit
PB: predicated region body
PF: predicated region fallthrough
CT: control target
= control target key end

     0   :  { %s2617_s12 = smov 0   ;;  %s2619_s13 = smov 0   ;;  %s2815_s0 = inlined_call_operand.vmem [shape: bf16[1024,16], index: 0, kind: input, shape index: {}]   ;;  %s2816_s1 = inlined_call_operand.vmem [shape: bf16[16,128], index: 1, kind: input, shape index: {}]   ;;  %s2817_s2 = inlined_call_operand.vmem [shape: bf16[1024,128], index: 2, kind: input, shape index: {}]   ;;  %s2818_s3 = inlined_call_operand.vmem [shape: bf16[1024,128], index: 3, kind: output, shape index: {}]  }
   0x1   :  { %s2621_s14 = smov 0  }
   0x2 LB: > { %s25_s15 = sadd.s32 1, %s2591_s13  ;;  %p1863_p0 = scmp.ge.s32.totalorder %s2595_s14, 1  ;;  %s2595_s14 = sphi %s2621_s14, %s13_s14   ;;  %s2591_s13 = sphi %s2619_s13, %s2820_s13   ;;  %s2587_s12 = sphi %s2617_s12, %s2819_s12  }
   0x3   : > { %p27_p1 = scmp.ge.s32.totalorder %s25_s15, 2  ;;  %p177_p2 = scmp.lt.s32.totalorder %s2595_s14, 3 }
   0x5   : > { %s2822_s15 = smov (%p27_p1, %s25_s15), 0  ;;  %p178_p3 = pnand %p1863_p0, %p177_p2 }
   0x6   : > { %v2540_v0 = vld [vmem:[%s2816_s1] sm:$0xff] (!%p178_p3)   ;;  %s1864_s18 = sshll.u32 (!%p178_p3), %s2587_s12, 6  ;;  %vm606_vm0 = vcmask (!%p178_p3), 130048  }
   0x7   : > { %181 = sbr.rel (%p178_p3) target bundleno = 298 (0x12a), region = 32  ;;  %p215_p4 = scmp.lt.s32.totalorder (!%p178_p3), %s1864_s18, 127  ;;  %2448 = vmatprep.subr.bf16.mxu0 (!%p178_p3), %v2540_v0  ;;  %2514 = vmatprep.subr.bf16.mxu1 (!%p178_p3), %v2540_v0 }
   0x8   : > { %2449 = vmatpush3.bf16.msra.mxu0 (!%p178_p3), %v2540_v0  ;;  %2515 = vmatpush3.bf16.msra.mxu1 (!%p178_p3), %v2540_v0 }
   0xe   : > { %s2824_s18 = smov (!%p215_p4, %s1864_s18), 127 }
   0xf   : > { %s2638_s19 = sshll.u32 %s2824_s18, 2 }
  0x10   : > { %s2644_s22 = scalar_lea.vmem %s2815_s0, %s2638_s19  ;;  %s2714_s25 = scalar_lea.vmem %s2817_s2, %s2638_s19 }
  0x11   : > { %v2541_v1 = vld [vmem:[%s2644_s22] sm:$0xff]   ;;  %v2543_v3 = vld [vmem:[%s2644_s22 + $0x8] sm:$0xff]   ;;  %v2545_v5 = vld [vmem:[%s2644_s22 + $0x10] sm:$0xff]   ;;  %s2728_s28 = scalar_lea.vmem %s2818_s3, %s2638_s19 }
  0x12   : > { %v2542_v2 = vld [vmem:[%s2644_s22 + $0x80] sm:$0xff]   ;;  %2450 = vmatprep.mubr.msk.bf16.mxu0 %vm606_vm0, %v2541_v1  ;;  %v2544_v4 = vld [vmem:[%s2644_s22 + $0x88] sm:$0xff]   ;;  %v2546_v6 = vld [vmem:[%s2644_s22 + $0x90] sm:$0xff]  }
  0x13   : > { %2482 = vmatprep.mubr.msk.bf16.mxu1 %vm606_vm0, %v2542_v2  ;;  %2451 = vmatmul.mubr.msk.bf16.vlgmr.msra.gmra.mrb[0].mxu0 %vm606_vm0, %v2543_v3  ;;  %v2547_v7 = vld [vmem:[%s2644_s22 + $0x18] sm:$0xff]   ;;  %v2549_v9 = vld [vmem:[%s2644_s22 + $0x20] sm:$0xff]   ;;  %v2551_v11 = vld [vmem:[%s2644_s22 + $0x28] sm:$0xff]  }
  0x14   : > { %2483 = vmatmul.mubr.msk.bf16.vlgmr.msra.gmra.mrb[0].mxu1 %vm606_vm0, %v2544_v4  ;;  %2454 = vmatprep.mubr.msk.bf16.mxu0 %vm606_vm0, %v2545_v5  ;;  %v2548_v8 = vld [vmem:[%s2644_s22 + $0x98] sm:$0xff]   ;;  %v2550_v10 = vld [vmem:[%s2644_s22 + $0xa0] sm:$0xff]   ;;  %v2552_v12 = vld [vmem:[%s2644_s22 + $0xa8] sm:$0xff]  }
  0x15   : > { %2486 = vmatprep.mubr.msk.bf16.mxu1 %vm606_vm0, %v2546_v6  ;;  %v2553_v13 = vld [vmem:[%s2644_s22 + $0x30] sm:$0xff]   ;;  %v2555_v15 = vld [vmem:[%s2644_s22 + $0x38] sm:$0xff]   ;;  %v2557_v17 = vld [vmem:[%s2644_s22 + $0x40] sm:$0xff]  }
  0x16   : > { %v2554_v14 = vld [vmem:[%s2644_s22 + $0xb0] sm:$0xff]   ;;  %v2556_v16 = vld [vmem:[%s2644_s22 + $0xb8] sm:$0xff]   ;;  %v2558_v18 = vld [vmem:[%s2644_s22 + $0xc0] sm:$0xff]  }
  0x17   : > { %v2559_v19 = vld [vmem:[%s2644_s22 + $0x48] sm:$0xff]   ;;  %v2561_v21 = vld [vmem:[%s2644_s22 + $0x50] sm:$0xff]   ;;  %v2563_v23 = vld [vmem:[%s2644_s22 + $0x58] sm:$0xff]  }
  0x18   : > { %v2560_v20 = vld [vmem:[%s2644_s22 + $0xc8] sm:$0xff]   ;;  %v2562_v22 = vld [vmem:[%s2644_s22 + $0xd0] sm:$0xff]   ;;  %v2564_v24 = vld [vmem:[%s2644_s22 + $0xd8] sm:$0xff]  }
  0x19   : > { %v2565_v25 = vld [vmem:[%s2644_s22 + $0x60] sm:$0xff]   ;;  %v2567_v27 = vld [vmem:[%s2644_s22 + $0x68] sm:$0xff]   ;;  %v2569_v29 = vld [vmem:[%s2644_s22 + $0x70] sm:$0xff]  }
  0x1a   : > { %v2566_v26 = vld [vmem:[%s2644_s22 + $0xe0] sm:$0xff]   ;;  %v2568_v28 = vld [vmem:[%s2644_s22 + $0xe8] sm:$0xff]   ;;  %v2570_v30 = vld [vmem:[%s2644_s22 + $0xf0] sm:$0xff]  }
  0x1b   : > { %2455 = vmatmul.mubr.msk.bf16.gmra.mrb[4].mxu0 %vm606_vm0, %v2547_v7  ;;  %v2571_v31 = vld [vmem:[%s2644_s22 + $0x78] sm:$0xff]   ;;  %v2353_v33 = vld [vmem:[%s2714_s25 + $0x8] sm:$0xff]   ;;  %v2066_v35 = vld [vmem:[%s2714_s25] sm:$0xff]  }
  0x1c   : > { %2487 = vmatmul.mubr.msk.bf16.gmra.mrb[4].mxu1 %vm606_vm0, %v2548_v8  ;;  %2458 = vmatprep.mubr.msk.bf16.mxu0 %vm606_vm0, %v2549_v9  ;;  %v2572_v32 = vld [vmem:[%s2644_s22 + $0xf8] sm:$0xff]   ;;  %v2369_v34 = vld [vmem:[%s2714_s25 + $0x88] sm:$0xff]   ;;  %v2368_v36 = vld [vmem:[%s2714_s25 + $0x80] sm:$0xff]   ;;  %v2071_v37 = vunpack.c.l.bf16 %v2353_v33  ;;  %v2067_v39 = vunpack.c.l.bf16 %v2066_v35  ;;  %v2072_v41 = vunpack.c.h.bf16 %v2353_v33  ;;  %v2068_v44 = vunpack.c.h.bf16 %v2066_v35 }
  0x1d   : > { %2490 = vmatprep.mubr.msk.bf16.mxu1 %vm606_vm0, %v2550_v10  ;;  %v2135_v38 = vunpack.c.l.bf16 %v2369_v34  ;;  %v2131_v40 = vunpack.c.l.bf16 %v2368_v36  ;;  %v2136_v43 = vunpack.c.h.bf16 %v2369_v34  ;;  %v2355_v45 = vld [vmem:[%s2714_s25 + $0x18] sm:$0xff]   ;;  %v2132_v49 = vunpack.c.h.bf16 %v2368_v36  ;;  %v2354_v51 = vld [vmem:[%s2714_s25 + $0x10] sm:$0xff]  }
  0x1e   : > { %v2371_v50 = vld [vmem:[%s2714_s25 + $0x98] sm:$0xff]   ;;  %v2370_v56 = vld [vmem:[%s2714_s25 + $0x90] sm:$0xff]   ;;  %v2079_v61 = vunpack.c.l.bf16 %v2355_v45  ;;  %v2075_v2 = vunpack.c.l.bf16 %v2354_v51 }
  0x1f   : > { %v2143_v1 = vunpack.c.l.bf16 %v2371_v50  ;;  %v2139_v6 = vunpack.c.l.bf16 %v2370_v56 }
  0x23   : > { %2459 = vmatmul.mubr.msk.bf16.gmra.mrb[8].mxu0 %vm606_vm0, %v2551_v11 }
  0x24   : > { %2491 = vmatmul.mubr.msk.bf16.gmra.mrb[8].mxu1 %vm606_vm0, %v2552_v12  ;;  %2462 = vmatprep.mubr.msk.bf16.mxu0 %vm606_vm0, %v2553_v13 }
  0x25   : > { %2494 = vmatprep.mubr.msk.bf16.mxu1 %vm606_vm0, %v2554_v14  ;;  %v2080_v14 = vunpack.c.h.bf16 %v2355_v45 }
  0x2b   : > { %2463 = vmatmul.mubr.msk.bf16.gmra.mrb[12].mxu0 %vm606_vm0, %v2555_v15 }
  0x2c   : > { %2495 = vmatmul.mubr.msk.bf16.gmra.mrb[12].mxu1 %vm606_vm0, %v2556_v16  ;;  %2466 = vmatprep.mubr.msk.bf16.mxu0 %vm606_vm0, %v2557_v17 }
  0x2d   : > { %2498 = vmatprep.mubr.msk.bf16.mxu1 %vm606_vm0, %v2558_v18  ;;  %v2144_v18 = vunpack.c.h.bf16 %v2371_v50 }
  0x33   : > { %2467 = vmatmul.mubr.msk.bf16.gmra.mrb[16].mxu0 %vm606_vm0, %v2559_v19  ;;  %v2076_v19 = vunpack.c.h.bf16 %v2354_v51 }
  0x34   : > { %2499 = vmatmul.mubr.msk.bf16.gmra.mrb[16].mxu1 %vm606_vm0, %v2560_v20  ;;  %2470 = vmatprep.mubr.msk.bf16.mxu0 %vm606_vm0, %v2561_v21  ;;  %v2731_v20 = vld [vmem:[%s2714_s25 + $0x28] sm:$0xff]  }
  0x35   : > { %2502 = vmatprep.mubr.msk.bf16.mxu1 %vm606_vm0, %v2562_v22 }
  0x3b   : > { %2471 = vmatmul.mubr.msk.bf16.gmra.mrb[20].mxu0 %vm606_vm0, %v2563_v23 }
  0x3c   : > { %2503 = vmatmul.mubr.msk.bf16.gmra.mrb[20].mxu1 %vm606_vm0, %v2564_v24  ;;  %2474 = vmatprep.mubr.msk.bf16.mxu0 %vm606_vm0, %v2565_v25  ;;  %v2140_v25 = vunpack.c.h.bf16 %v2370_v56 }
  0x3d   : > { %2506 = vmatprep.mubr.msk.bf16.mxu1 %vm606_vm0, %v2566_v26  ;;  %v2373_v26 = vld [vmem:[%s2714_s25 + $0xa8] sm:$0xff]  }
  0x43   : > { %2475 = vmatmul.mubr.msk.bf16.gmra.mrb[24].mxu0 %vm606_vm0, %v2567_v27  ;;  %v2356_v27 = vld [vmem:[%s2714_s25 + $0x20] sm:$0xff]  }
  0x44   : > { %2507 = vmatmul.mubr.msk.bf16.gmra.mrb[24].mxu1 %vm606_vm0, %v2568_v28  ;;  %2478 = vmatprep.mubr.msk.bf16.mxu0 %vm606_vm0, %v2569_v29 }
  0x45   : > { %2510 = vmatprep.mubr.msk.bf16.mxu1 %vm606_vm0, %v2570_v30 }
  0x4b   : > { %2479 = vmatmul.mubr.msk.bf16.gmra.mrb[28].mxu0 %vm606_vm0, %v2571_v31 }
  0x4c   : > { %2511 = vmatmul.mubr.msk.bf16.gmra.mrb[28].mxu1 %vm606_vm0, %v2572_v32  ;;  %v2372_v32 = vld [vmem:[%s2714_s25 + $0xa0] sm:$0xff]  }
  0xe6   : > { %v2452_v42 = vpop.f32.mrb[0].mxu0 }
  0xe7   : > { %v1317_v46 = vadd.f32 %v2452_v42, %v2071_v37  ;;  %v2484_v47 = vpop.f32.mrb[0].mxu1  ;;  %v737_v48 = vpop.f32.mrb[1].mxu0  ;;  %v2087_v37 = vunpack.c.l.bf16 %v2731_v20  ;;  %v2083_v42 = vunpack.c.l.bf16 %v2356_v27 }
  0xe8   : > { %v1349_v52 = vadd.f32 %v2484_v47, %v2135_v38  ;;  %v1315_v53 = vadd.f32 %v2067_v39, %v737_v48  ;;  %v865_v54 = vpop.f32.mrb[1].mxu1  ;;  %v2453_v55 = vpop.f32.mrb[2].mxu0 }
  0xe9   : > { %v1347_v57 = vadd.f32 %v2131_v40, %v865_v54  ;;  %v1318_v58 = vadd.f32 %v2453_v55, %v2072_v41  ;;  %v2485_v59 = vpop.f32.mrb[2].mxu1  ;;  %v740_v60 = vpop.f32.mrb[3].mxu0  ;;  %v1381_v3 = vmax.f32 %v1317_v46, 0.0  ;;  %v2151_v41 = vunpack.c.l.bf16 %v2373_v26 }
  0xea   : > { %v1350_v62 = vadd.f32 %v2485_v59, %v2136_v43  ;;  %v1316_v63 = vadd.f32 %v2068_v44, %v740_v60  ;;  %v868_v0 = vpop.f32.mrb[3].mxu1  ;;  %v1413_v7 = vmax.f32 %v1349_v52, 0.0  ;;  %v1379_v8 = vmax.f32 %v1315_v53, 0.0  ;;  %v2743_v60 = vld [vmem:[%s2714_s25 + $0x38] sm:$0xff]  }
  0xeb   : > { %v1382_v4 = vmax.f32 %v1318_v58, 0.0  ;;  %v1348_v5 = vadd.f32 %v2132_v49, %v868_v0  ;;  %v1411_v11 = vmax.f32 %v1347_v57, 0.0  ;;  %v2147_v46 = vunpack.c.l.bf16 %v2372_v32 }
  0xec   : > { %v1414_v9 = vmax.f32 %v1350_v62, 0.0  ;;  %v1380_v10 = vmax.f32 %v1316_v63, 0.0  ;;  %v2088_v54 = vunpack.c.h.bf16 %v2731_v20  ;;  %v2152_v58 = vunpack.c.h.bf16 %v2373_v26 }
  0xed   : > { %v2201_v12 = vpack.c.bf16 %v1382_v4, %v1381_v3  ;;  %v1412_v13 = vmax.f32 %v1348_v5, 0.0  ;;  %v2084_v59 = vunpack.c.h.bf16 %v2356_v27  ;;  %v2358_v3 = vld [vmem:[%s2714_s25 + $0x30] sm:$0xff]  }
  0xee   : > { %v2281_v15 = vpack.c.bf16 %v1414_v9, %v1413_v7  ;;  %v2196_v16 = vpack.c.bf16 %v1380_v10, %v1379_v8  ;;  %v2456_v17 = vpop.f32.mrb[4].mxu0  ;;  %v2374_v8 = vld [vmem:[%s2714_s25 + $0xb0] sm:$0xff]  }
  0xef   : > { %2384 = vst [vmem:[%s2728_s28 + $0x8] sm:$0xff] %v2201_v12   ;;  %v2276_v21 = vpack.c.bf16 %v1412_v13, %v1411_v11  ;;  %v1321_v22 = vadd.f32 %v2456_v17, %v2079_v61  ;;  %v2488_v23 = vpop.f32.mrb[4].mxu1  ;;  %v753_v24 = vpop.f32.mrb[5].mxu0  ;;  %v2095_v13 = vunpack.c.l.bf16 %v2743_v60 }
  0xf0   : > { %2400 = vst [vmem:[%s2728_s28 + $0x88] sm:$0xff] %v2281_v15   ;;  %2197 = vst [vmem:[%s2728_s28] sm:$0xff] %v2196_v16   ;;  %v1353_v28 = vadd.f32 %v2488_v23, %v2143_v1  ;;  %v1319_v29 = vadd.f32 %v2075_v2, %v753_v24  ;;  %v881_v30 = vpop.f32.mrb[5].mxu1  ;;  %v2457_v31 = vpop.f32.mrb[6].mxu0  ;;  %v2148_v1 = vunpack.c.h.bf16 %v2372_v32  ;;  %v2375_v2 = vld [vmem:[%s2714_s25 + $0xb8] sm:$0xff]  }
  0xf1   : > { %2399 = vst [vmem:[%s2728_s28 + $0x80] sm:$0xff] %v2276_v21   ;;  %v1351_v33 = vadd.f32 %v2139_v6, %v881_v30  ;;  %v1322_v34 = vadd.f32 %v2457_v31, %v2080_v14  ;;  %v2489_v35 = vpop.f32.mrb[6].mxu1  ;;  %v756_v36 = vpop.f32.mrb[7].mxu0  ;;  %v1385_v43 = vmax.f32 %v1321_v22, 0.0  ;;  %v2159_v17 = vunpack.c.l.bf16 %v2375_v2 }
  0xf2   : > { %v1354_v38 = vadd.f32 %v2489_v35, %v2144_v18  ;;  %v1320_v39 = vadd.f32 %v2076_v19, %v756_v36  ;;  %v884_v40 = vpop.f32.mrb[7].mxu1  ;;  %v1417_v47 = vmax.f32 %v1353_v28, 0.0  ;;  %v1383_v48 = vmax.f32 %v1319_v29, 0.0  ;;  %v2755_v36 = vld [vmem:[%s2714_s25 + $0x48] sm:$0xff]  }
  0xf3   : > { %v1386_v44 = vmax.f32 %v1322_v34, 0.0  ;;  %v1352_v45 = vadd.f32 %v2140_v25, %v884_v40  ;;  %v1415_v51 = vmax.f32 %v1351_v33, 0.0  ;;  %v2091_v18 = vunpack.c.l.bf16 %v2358_v3 }
  0xf4   : > { %v1418_v49 = vmax.f32 %v1354_v38, 0.0  ;;  %v1384_v50 = vmax.f32 %v1320_v39, 0.0  ;;  %v2155_v22 = vunpack.c.l.bf16 %v2374_v8  ;;  %v2096_v30 = vunpack.c.h.bf16 %v2743_v60 }
  0xf5   : > { %v2211_v52 = vpack.c.bf16 %v1386_v44, %v1385_v43  ;;  %v1416_v53 = vmax.f32 %v1352_v45, 0.0  ;;  %v2160_v34 = vunpack.c.h.bf16 %v2375_v2  ;;  %v2092_v35 = vunpack.c.h.bf16 %v2358_v3  ;;  %v2360_v43 = vld [vmem:[%s2714_s25 + $0x40] sm:$0xff]  }
  0xf6   : > { %v2291_v55 = vpack.c.bf16 %v1418_v49, %v1417_v47  ;;  %v2206_v56 = vpack.c.bf16 %v1384_v50, %v1383_v48  ;;  %v2460_v57 = vpop.f32.mrb[8].mxu0  ;;  %v2376_v48 = vld [vmem:[%s2714_s25 + $0xc0] sm:$0xff]  }
  0xf7   : > { %2386 = vst [vmem:[%s2728_s28 + $0x18] sm:$0xff] %v2211_v52   ;;  %v2286_v61 = vpack.c.bf16 %v1416_v53, %v1415_v51  ;;  %v1325_v62 = vadd.f32 %v2460_v57, %v2087_v37  ;;  %v2492_v63 = vpop.f32.mrb[8].mxu1  ;;  %v769_v0 = vpop.f32.mrb[9].mxu0  ;;  %v2103_v53 = vunpack.c.l.bf16 %v2755_v36 }
  0xf8   : > { %2402 = vst [vmem:[%s2728_s28 + $0x98] sm:$0xff] %v2291_v55   ;;  %2385 = vst [vmem:[%s2728_s28 + $0x10] sm:$0xff] %v2206_v56   ;;  %v1357_v4 = vadd.f32 %v2492_v63, %v2151_v41  ;;  %v1323_v5 = vadd.f32 %v2083_v42, %v769_v0  ;;  %v897_v6 = vpop.f32.mrb[9].mxu1  ;;  %v2461_v7 = vpop.f32.mrb[10].mxu0  ;;  %v2156_v41 = vunpack.c.h.bf16 %v2374_v8  ;;  %v2377_v42 = vld [vmem:[%s2714_s25 + $0xc8] sm:$0xff]  }
  0xf9   : > { %2401 = vst [vmem:[%s2728_s28 + $0x90] sm:$0xff] %v2286_v61   ;;  %v1355_v9 = vadd.f32 %v2147_v46, %v897_v6  ;;  %v1326_v10 = vadd.f32 %v2461_v7, %v2088_v54  ;;  %v2493_v11 = vpop.f32.mrb[10].mxu1  ;;  %v772_v12 = vpop.f32.mrb[11].mxu0  ;;  %v1389_v19 = vmax.f32 %v1325_v62, 0.0  ;;  %v2167_v57 = vunpack.c.l.bf16 %v2377_v42 }
  0xfa   : > { %v1358_v14 = vadd.f32 %v2493_v11, %v2152_v58  ;;  %v1324_v15 = vadd.f32 %v2084_v59, %v772_v12  ;;  %v900_v16 = vpop.f32.mrb[11].mxu1  ;;  %v1421_v23 = vmax.f32 %v1357_v4, 0.0  ;;  %v1387_v24 = vmax.f32 %v1323_v5, 0.0  ;;  %v2767_v12 = vld [vmem:[%s2714_s25 + $0x58] sm:$0xff]  }
  0xfb   : > { %v1390_v20 = vmax.f32 %v1326_v10, 0.0  ;;  %v1356_v21 = vadd.f32 %v2148_v1, %v900_v16  ;;  %v1419_v27 = vmax.f32 %v1355_v9, 0.0  ;;  %v2099_v58 = vunpack.c.l.bf16 %v2360_v43 }
  0xfc   : > { %v1422_v25 = vmax.f32 %v1358_v14, 0.0  ;;  %v1388_v26 = vmax.f32 %v1324_v15, 0.0  ;;  %v2163_v62 = vunpack.c.l.bf16 %v2376_v48  ;;  %v2104_v6 = vunpack.c.h.bf16 %v2755_v36 }
  0xfd   : > { %v2221_v28 = vpack.c.bf16 %v1390_v20, %v1389_v19  ;;  %v1420_v29 = vmax.f32 %v1356_v21, 0.0  ;;  %v2168_v10 = vunpack.c.h.bf16 %v2377_v42  ;;  %v2100_v11 = vunpack.c.h.bf16 %v2360_v43  ;;  %v2362_v19 = vld [vmem:[%s2714_s25 + $0x50] sm:$0xff]  }
  0xfe   : > { %v2301_v31 = vpack.c.bf16 %v1422_v25, %v1421_v23  ;;  %v2216_v32 = vpack.c.bf16 %v1388_v26, %v1387_v24  ;;  %v2464_v33 = vpop.f32.mrb[12].mxu0  ;;  %v2378_v24 = vld [vmem:[%s2714_s25 + $0xd0] sm:$0xff]  }
  0xff   : > { %2388 = vst [vmem:[%s2728_s28 + $0x28] sm:$0xff] %v2221_v28   ;;  %v2296_v37 = vpack.c.bf16 %v1420_v29, %v1419_v27  ;;  %v1329_v38 = vadd.f32 %v2464_v33, %v2095_v13  ;;  %v2496_v39 = vpop.f32.mrb[12].mxu1  ;;  %v785_v40 = vpop.f32.mrb[13].mxu0  ;;  %v2111_v29 = vunpack.c.l.bf16 %v2767_v12 }
 0x100   : > { %2404 = vst [vmem:[%s2728_s28 + $0xa8] sm:$0xff] %v2301_v31   ;;  %2387 = vst [vmem:[%s2728_s28 + $0x20] sm:$0xff] %v2216_v32   ;;  %v1361_v44 = vadd.f32 %v2496_v39, %v2159_v17  ;;  %v1327_v45 = vadd.f32 %v2091_v18, %v785_v40  ;;  %v913_v46 = vpop.f32.mrb[13].mxu1  ;;  %v2465_v47 = vpop.f32.mrb[14].mxu0  ;;  %v2164_v17 = vunpack.c.h.bf16 %v2376_v48  ;;  %v2379_v18 = vld [vmem:[%s2714_s25 + $0xd8] sm:$0xff]  }
 0x101   : > { %2403 = vst [vmem:[%s2728_s28 + $0xa0] sm:$0xff] %v2296_v37   ;;  %v1359_v49 = vadd.f32 %v2155_v22, %v913_v46  ;;  %v1330_v50 = vadd.f32 %v2465_v47, %v2096_v30  ;;  %v2497_v51 = vpop.f32.mrb[14].mxu1  ;;  %v788_v52 = vpop.f32.mrb[15].mxu0  ;;  %v1393_v59 = vmax.f32 %v1329_v38, 0.0  ;;  %v2175_v33 = vunpack.c.l.bf16 %v2379_v18 }
 0x102   : > { %v1362_v54 = vadd.f32 %v2497_v51, %v2160_v34  ;;  %v1328_v55 = vadd.f32 %v2092_v35, %v788_v52  ;;  %v916_v56 = vpop.f32.mrb[15].mxu1  ;;  %v1425_v63 = vmax.f32 %v1361_v44, 0.0  ;;  %v1391_v0 = vmax.f32 %v1327_v45, 0.0  ;;  %v2779_v52 = vld [vmem:[%s2714_s25 + $0x68] sm:$0xff]  }
 0x103   : > { %v1394_v60 = vmax.f32 %v1330_v50, 0.0  ;;  %v1360_v61 = vadd.f32 %v2156_v41, %v916_v56  ;;  %v1423_v3 = vmax.f32 %v1359_v49, 0.0  ;;  %v2107_v34 = vunpack.c.l.bf16 %v2362_v19 }
 0x104   : > { %v1426_v1 = vmax.f32 %v1362_v54, 0.0  ;;  %v1392_v2 = vmax.f32 %v1328_v55, 0.0  ;;  %v2171_v38 = vunpack.c.l.bf16 %v2378_v24  ;;  %v2112_v46 = vunpack.c.h.bf16 %v2767_v12 }
 0x105   : > { %v2231_v4 = vpack.c.bf16 %v1394_v60, %v1393_v59  ;;  %v1424_v5 = vmax.f32 %v1360_v61, 0.0  ;;  %v2176_v50 = vunpack.c.h.bf16 %v2379_v18  ;;  %v2108_v51 = vunpack.c.h.bf16 %v2362_v19  ;;  %v2364_v59 = vld [vmem:[%s2714_s25 + $0x60] sm:$0xff]  }
 0x106   : > { %v2311_v7 = vpack.c.bf16 %v1426_v1, %v1425_v63  ;;  %v2226_v8 = vpack.c.bf16 %v1392_v2, %v1391_v0  ;;  %v2468_v9 = vpop.f32.mrb[16].mxu0  ;;  %v2380_v0 = vld [vmem:[%s2714_s25 + $0xe0] sm:$0xff]  }
 0x107   : > { %2390 = vst [vmem:[%s2728_s28 + $0x38] sm:$0xff] %v2231_v4   ;;  %v2306_v13 = vpack.c.bf16 %v1424_v5, %v1423_v3  ;;  %v1333_v14 = vadd.f32 %v2468_v9, %v2103_v53  ;;  %v2500_v15 = vpop.f32.mrb[16].mxu1  ;;  %v801_v16 = vpop.f32.mrb[17].mxu0  ;;  %v2119_v5 = vunpack.c.l.bf16 %v2779_v52 }
 0x108   : > { %2406 = vst [vmem:[%s2728_s28 + $0xb8] sm:$0xff] %v2311_v7   ;;  %2389 = vst [vmem:[%s2728_s28 + $0x30] sm:$0xff] %v2226_v8   ;;  %v1365_v20 = vadd.f32 %v2500_v15, %v2167_v57  ;;  %v1331_v21 = vadd.f32 %v2099_v58, %v801_v16  ;;  %v929_v22 = vpop.f32.mrb[17].mxu1  ;;  %v2469_v23 = vpop.f32.mrb[18].mxu0  ;;  %v2172_v57 = vunpack.c.h.bf16 %v2378_v24  ;;  %v2381_v58 = vld [vmem:[%s2714_s25 + $0xe8] sm:$0xff]  }
 0x109   : > { %2405 = vst [vmem:[%s2728_s28 + $0xb0] sm:$0xff] %v2306_v13   ;;  %v1363_v25 = vadd.f32 %v2163_v62, %v929_v22  ;;  %v1334_v26 = vadd.f32 %v2469_v23, %v2104_v6  ;;  %v2501_v27 = vpop.f32.mrb[18].mxu1  ;;  %v804_v28 = vpop.f32.mrb[19].mxu0  ;;  %v1397_v35 = vmax.f32 %v1333_v14, 0.0  ;;  %v2183_v9 = vunpack.c.l.bf16 %v2381_v58 }
 0x10a   : > { %v1366_v30 = vadd.f32 %v2501_v27, %v2168_v10  ;;  %v1332_v31 = vadd.f32 %v2100_v11, %v804_v28  ;;  %v932_v32 = vpop.f32.mrb[19].mxu1  ;;  %v1429_v39 = vmax.f32 %v1365_v20, 0.0  ;;  %v1395_v40 = vmax.f32 %v1331_v21, 0.0  ;;  %v2367_v28 = vld [vmem:[%s2714_s25 + $0x78] sm:$0xff]  }
 0x10b   : > { %v1398_v36 = vmax.f32 %v1334_v26, 0.0  ;;  %v1364_v37 = vadd.f32 %v2164_v17, %v932_v32  ;;  %v1427_v43 = vmax.f32 %v1363_v25, 0.0  ;;  %v2115_v10 = vunpack.c.l.bf16 %v2364_v59 }
 0x10c   : > { %v1430_v41 = vmax.f32 %v1366_v30, 0.0  ;;  %v1396_v42 = vmax.f32 %v1332_v31, 0.0  ;;  %v2179_v14 = vunpack.c.l.bf16 %v2380_v0  ;;  %v2120_v22 = vunpack.c.h.bf16 %v2779_v52 }
 0x10d   : > { %v2241_v44 = vpack.c.bf16 %v1398_v36, %v1397_v35  ;;  %v1428_v45 = vmax.f32 %v1364_v37, 0.0  ;;  %v2184_v26 = vunpack.c.h.bf16 %v2381_v58  ;;  %v2116_v27 = vunpack.c.h.bf16 %v2364_v59  ;;  %v2366_v35 = vld [vmem:[%s2714_s25 + $0x70] sm:$0xff]  }
 0x10e   : > { %v2321_v47 = vpack.c.bf16 %v1430_v41, %v1429_v39  ;;  %v2236_v48 = vpack.c.bf16 %v1396_v42, %v1395_v40  ;;  %v2472_v49 = vpop.f32.mrb[20].mxu0  ;;  %v2382_v40 = vld [vmem:[%s2714_s25 + $0xf0] sm:$0xff]  }
 0x10f   : > { %2392 = vst [vmem:[%s2728_s28 + $0x48] sm:$0xff] %v2241_v44   ;;  %v2316_v53 = vpack.c.bf16 %v1428_v45, %v1427_v43  ;;  %v1337_v54 = vadd.f32 %v2472_v49, %v2111_v29  ;;  %v2504_v55 = vpop.f32.mrb[20].mxu1  ;;  %v817_v56 = vpop.f32.mrb[21].mxu0  ;;  %v2127_v45 = vunpack.c.l.bf16 %v2367_v28 }
 0x110   : > { %2408 = vst [vmem:[%s2728_s28 + $0xc8] sm:$0xff] %v2321_v47   ;;  %2391 = vst [vmem:[%s2728_s28 + $0x40] sm:$0xff] %v2236_v48   ;;  %v1369_v60 = vadd.f32 %v2504_v55, %v2175_v33  ;;  %v1335_v61 = vadd.f32 %v2107_v34, %v817_v56  ;;  %v945_v62 = vpop.f32.mrb[21].mxu1  ;;  %v2473_v63 = vpop.f32.mrb[22].mxu0  ;;  %v2180_v33 = vunpack.c.h.bf16 %v2380_v0  ;;  %v2383_v34 = vld [vmem:[%s2714_s25 + $0xf8] sm:$0xff]  }
 0x111   : > { %2407 = vst [vmem:[%s2728_s28 + $0xc0] sm:$0xff] %v2316_v53   ;;  %v1367_v1 = vadd.f32 %v2171_v38, %v945_v62  ;;  %v1338_v2 = vadd.f32 %v2473_v63, %v2112_v46  ;;  %v2505_v3 = vpop.f32.mrb[22].mxu1  ;;  %v820_v4 = vpop.f32.mrb[23].mxu0  ;;  %v1401_v11 = vmax.f32 %v1337_v54, 0.0  ;;  %v2191_v49 = vunpack.c.l.bf16 %v2383_v34 }
 0x112   : > { %v1370_v6 = vadd.f32 %v2505_v3, %v2176_v50  ;;  %v1336_v7 = vadd.f32 %v2108_v51, %v820_v4  ;;  %v948_v8 = vpop.f32.mrb[23].mxu1  ;;  %v1433_v15 = vmax.f32 %v1369_v60, 0.0  ;;  %v1399_v16 = vmax.f32 %v1335_v61, 0.0 }
 0x113   : > { %v1402_v12 = vmax.f32 %v1338_v2, 0.0  ;;  %v1368_v13 = vadd.f32 %v2172_v57, %v948_v8  ;;  %v1431_v19 = vmax.f32 %v1367_v1, 0.0  ;;  %v2123_v50 = vunpack.c.l.bf16 %v2366_v35 }
 0x114   : > { %v1434_v17 = vmax.f32 %v1370_v6, 0.0  ;;  %v1400_v18 = vmax.f32 %v1336_v7, 0.0  ;;  %v2187_v54 = vunpack.c.l.bf16 %v2382_v40  ;;  %v2128_v62 = vunpack.c.h.bf16 %v2367_v28 }
 0x115   : > { %v2251_v20 = vpack.c.bf16 %v1402_v12, %v1401_v11  ;;  %v1432_v21 = vmax.f32 %v1368_v13, 0.0  ;;  %v2192_v2 = vunpack.c.h.bf16 %v2383_v34  ;;  %v2124_v3 = vunpack.c.h.bf16 %v2366_v35 }
 0x116   : > { %v2331_v23 = vpack.c.bf16 %v1434_v17, %v1433_v15  ;;  %v2246_v24 = vpack.c.bf16 %v1400_v18, %v1399_v16  ;;  %v2476_v25 = vpop.f32.mrb[24].mxu0  ;;  %v2188_v8 = vunpack.c.h.bf16 %v2382_v40 }
 0x117   : > { %2394 = vst [vmem:[%s2728_s28 + $0x58] sm:$0xff] %v2251_v20   ;;  %v2326_v29 = vpack.c.bf16 %v1432_v21, %v1431_v19  ;;  %v1341_v30 = vadd.f32 %v2476_v25, %v2119_v5  ;;  %v2508_v31 = vpop.f32.mrb[24].mxu1  ;;  %v833_v32 = vpop.f32.mrb[25].mxu0 }
 0x118   : > { %2410 = vst [vmem:[%s2728_s28 + $0xd8] sm:$0xff] %v2331_v23   ;;  %2393 = vst [vmem:[%s2728_s28 + $0x50] sm:$0xff] %v2246_v24   ;;  %v1373_v36 = vadd.f32 %v2508_v31, %v2183_v9  ;;  %v1339_v37 = vadd.f32 %v2115_v10, %v833_v32  ;;  %v961_v38 = vpop.f32.mrb[25].mxu1  ;;  %v2477_v39 = vpop.f32.mrb[26].mxu0 }
 0x119   : > { %2409 = vst [vmem:[%s2728_s28 + $0xd0] sm:$0xff] %v2326_v29   ;;  %v1371_v41 = vadd.f32 %v2179_v14, %v961_v38  ;;  %v1342_v42 = vadd.f32 %v2477_v39, %v2120_v22  ;;  %v2509_v43 = vpop.f32.mrb[26].mxu1  ;;  %v836_v44 = vpop.f32.mrb[27].mxu0  ;;  %v1405_v51 = vmax.f32 %v1341_v30, 0.0 }
 0x11a   : > { %v1374_v46 = vadd.f32 %v2509_v43, %v2184_v26  ;;  %v1340_v47 = vadd.f32 %v2116_v27, %v836_v44  ;;  %v964_v48 = vpop.f32.mrb[27].mxu1  ;;  %v1437_v55 = vmax.f32 %v1373_v36, 0.0  ;;  %v1403_v56 = vmax.f32 %v1339_v37, 0.0 }
 0x11b   : > { %v1406_v52 = vmax.f32 %v1342_v42, 0.0  ;;  %v1372_v53 = vadd.f32 %v2180_v33, %v964_v48  ;;  %v1435_v59 = vmax.f32 %v1371_v41, 0.0 }
 0x11c   : > { %v1438_v57 = vmax.f32 %v1374_v46, 0.0  ;;  %v1404_v58 = vmax.f32 %v1340_v47, 0.0 }
 0x11d   : > { %v2261_v60 = vpack.c.bf16 %v1406_v52, %v1405_v51  ;;  %v1436_v61 = vmax.f32 %v1372_v53, 0.0 }
 0x11e   : > { %v2341_v63 = vpack.c.bf16 %v1438_v57, %v1437_v55  ;;  %v2256_v0 = vpack.c.bf16 %v1404_v58, %v1403_v56  ;;  %v2480_v1 = vpop.f32.mrb[28].mxu0 }
 0x11f   : > { %2396 = vst [vmem:[%s2728_s28 + $0x68] sm:$0xff] %v2261_v60   ;;  %v2336_v4 = vpack.c.bf16 %v1436_v61, %v1435_v59  ;;  %v1345_v5 = vadd.f32 %v2480_v1, %v2127_v45  ;;  %v2512_v6 = vpop.f32.mrb[28].mxu1  ;;  %v849_v7 = vpop.f32.mrb[29].mxu0 }
 0x120   : > { %2412 = vst [vmem:[%s2728_s28 + $0xe8] sm:$0xff] %v2341_v63   ;;  %2395 = vst [vmem:[%s2728_s28 + $0x60] sm:$0xff] %v2256_v0   ;;  %v1377_v9 = vadd.f32 %v2512_v6, %v2191_v49  ;;  %v1343_v10 = vadd.f32 %v2123_v50, %v849_v7  ;;  %v977_v11 = vpop.f32.mrb[29].mxu1  ;;  %v2481_v12 = vpop.f32.mrb[30].mxu0 }
 0x121   : > { %2411 = vst [vmem:[%s2728_s28 + $0xe0] sm:$0xff] %v2336_v4   ;;  %v1375_v13 = vadd.f32 %v2187_v54, %v977_v11  ;;  %v1346_v14 = vadd.f32 %v2481_v12, %v2128_v62  ;;  %v2513_v15 = vpop.f32.mrb[30].mxu1  ;;  %v852_v16 = vpop.f32.mrb[31].mxu0  ;;  %v1409_v20 = vmax.f32 %v1345_v5, 0.0 }
 0x122   : > { %v1378_v17 = vadd.f32 %v2513_v15, %v2192_v2  ;;  %v1344_v18 = vadd.f32 %v2124_v3, %v852_v16  ;;  %v980_v19 = vpop.f32.mrb[31].mxu1  ;;  %v1441_v23 = vmax.f32 %v1377_v9, 0.0  ;;  %v1407_v24 = vmax.f32 %v1343_v10, 0.0 }
 0x123   : > { %v1410_v21 = vmax.f32 %v1346_v14, 0.0  ;;  %v1376_v22 = vadd.f32 %v2188_v8, %v980_v19  ;;  %v1439_v27 = vmax.f32 %v1375_v13, 0.0 }
 0x124   : > { %v1442_v25 = vmax.f32 %v1378_v17, 0.0  ;;  %v1408_v26 = vmax.f32 %v1344_v18, 0.0 }
 0x125   : > { %v2271_v28 = vpack.c.bf16 %v1410_v21, %v1409_v20  ;;  %v1440_v29 = vmax.f32 %v1376_v22, 0.0 }
 0x126   : > { %v2351_v30 = vpack.c.bf16 %v1442_v25, %v1441_v23  ;;  %v2266_v31 = vpack.c.bf16 %v1408_v26, %v1407_v24 }
 0x127   : > { %2398 = vst [vmem:[%s2728_s28 + $0x78] sm:$0xff] %v2271_v28   ;;  %v2346_v32 = vpack.c.bf16 %v1440_v29, %v1439_v27 }
 0x128   : > { %2414 = vst [vmem:[%s2728_s28 + $0xf8] sm:$0xff] %v2351_v30   ;;  %2397 = vst [vmem:[%s2728_s28 + $0x70] sm:$0xff] %v2266_v31  }
 0x129   : > { %2413 = vst [vmem:[%s2728_s28 + $0xf0] sm:$0xff] %v2346_v32  }
 0x12a PF: > { %s13_s14 = sadd.s32 1, %s2595_s14   ;;  %s2819_s12 = smov %s2591_s13 }
 0x12b   : > { %p10_p5 = scmp.ge.s32.totalorder %s13_s14, 4   ;;  %s2820_s13 = smov %s2822_s15 }
 0x12d   :  { %12 = sbr.rel (!%p10_p5) target bundleno = 2 (0x2), region = 76 }

// kernel: net_forward.16
= control target key start
LH: loop header
LB: loop body
LE: loop exit
PB: predicated region body
PF: predicated region fallthrough
CT: control target
= control target key end

     0   :  { %v1125_v0 = vmov 0   ;;  %vm328_vm0 = vcmask 130048   ;;  %s1328_s1 = inlined_call_operand.vmem [shape: bf16[144,128], index: 1, kind: input, shape index: {}]   ;;  %s1329_s0 = inlined_call_operand.vmem [shape: bf16[256,144], index: 0, kind: input, shape index: {}]   ;;  %s1330_s2 = inlined_call_operand.vmem [shape: bf16[256,128], index: 2, kind: output, shape index: {}]  }
   0x1   :  { %377 = vmatprep.subr.bf16.mxu0 %v1125_v0  ;;  %1049 = vmatprep.subr.bf16.mxu1 %v1125_v0  ;;  %v1068_v1 = vld [vmem:[%s1328_s1] sm:$0xff]   ;;  %v1069_v2 = vld [vmem:[%s1328_s1 + $0x8] sm:$0xff]   ;;  %v1070_v3 = vld [vmem:[%s1328_s1 + $0x10] sm:$0xff]  }
   0x2   :  { %378 = vmatpush1.bf16.msra.mxu0 %v1068_v1  ;;  %1058 = vmatpush1.bf16.msra.mxu1 %v1068_v1  ;;  %v1071_v4 = vld [vmem:[%s1328_s1 + $0x18] sm:$0xff]   ;;  %v1079_v5 = vld [vmem:[%s1329_s0 + $0x4] ss:$8 sps:$4 sm:$0xff]   ;;  %v1074_v9 = vld [vmem:[%s1328_s1 + $0x30] sm:$0xff]  }
   0x3   :  { %379 = vmatprep.subr.bf16.mxu0 %v1125_v0  ;;  %1050 = vmatprep.subr.bf16.mxu1 %v1125_v0  ;;  %v1082_v6 = vld [vmem:[%s1329_s0 + $0x84] ss:$8 sps:$4 sm:$0xff]   ;;  %v1075_v10 = vld [vmem:[%s1328_s1 + $0x38] sm:$0xff]   ;;  %v1077_v12 = vld [vmem:[%s1329_s0] ss:$8 sps:$4 sm:$0xff]  }
   0x4   :  { %874 = vmatprep.mubr.msk.bf16.mxu0 %vm328_vm0, %v1079_v5  ;;  %882 = vmatprep.mubr.msk.bf16.mxu1 %vm328_vm0, %v1082_v6  ;;  %v1072_v7 = vld [vmem:[%s1328_s1 + $0x20] sm:$0xff]   ;;  %v1073_v8 = vld [vmem:[%s1328_s1 + $0x28] sm:$0xff]   ;;  %v1083_v14 = vld [vmem:[%s1329_s0 + $0x14] ss:$8 sps:$4 sm:$0xff]  }
   0x5   :  { %v1076_v11 = vld [vmem:[%s1328_s1 + $0x40] sm:$0xff]   ;;  %v1085_v15 = vld [vmem:[%s1329_s0 + $0x94] ss:$8 sps:$4 sm:$0xff]   ;;  %v1087_v16 = vld [vmem:[%s1329_s0 + $0x10] ss:$8 sps:$4 sm:$0xff]  }
   0x6   :  { %380 = vmatpush1.bf16.msra.mxu0 %v1069_v2  ;;  %1059 = vmatpush1.bf16.msra.mxu1 %v1069_v2  ;;  %v1080_v13 = vld [vmem:[%s1329_s0 + $0x80] ss:$8 sps:$4 sm:$0xff]   ;;  %v1088_v17 = vld [vmem:[%s1329_s0 + $0x90] ss:$8 sps:$4 sm:$0xff]   ;;  %v1089_v18 = vld [vmem:[%s1329_s0 + $0x24] ss:$8 sps:$4 sm:$0xff]  }
   0x7   :  { %381 = vmatprep.subr.bf16.mxu0 %v1125_v0  ;;  %1051 = vmatprep.subr.bf16.mxu1 %v1125_v0  ;;  %v1091_v19 = vld [vmem:[%s1329_s0 + $0xa4] ss:$8 sps:$4 sm:$0xff]   ;;  %v1093_v20 = vld [vmem:[%s1329_s0 + $0x20] ss:$8 sps:$4 sm:$0xff]   ;;  %v1095_v22 = vld [vmem:[%s1329_s0 + $0x34] ss:$8 sps:$4 sm:$0xff]  }
   0x8   :  { %v1094_v21 = vld [vmem:[%s1329_s0 + $0xa0] ss:$8 sps:$4 sm:$0xff]   ;;  %v1097_v23 = vld [vmem:[%s1329_s0 + $0xb4] ss:$8 sps:$4 sm:$0xff]   ;;  %v1099_v24 = vld [vmem:[%s1329_s0 + $0x30] ss:$8 sps:$4 sm:$0xff]  }
   0x9   :  { %v1100_v25 = vld [vmem:[%s1329_s0 + $0xb0] ss:$8 sps:$4 sm:$0xff]   ;;  %v1101_v26 = vld [vmem:[%s1329_s0 + $0x44] ss:$8 sps:$4 sm:$0xff]   ;;  %v1105_v28 = vld [vmem:[%s1329_s0 + $0x40] ss:$8 sps:$4 sm:$0xff]  }
   0xa   :  { %382 = vmatpush1.bf16.msra.mxu0 %v1070_v3  ;;  %1060 = vmatpush1.bf16.msra.mxu1 %v1070_v3  ;;  %v1103_v27 = vld [vmem:[%s1329_s0 + $0xc4] ss:$8 sps:$4 sm:$0xff]   ;;  %v1106_v29 = vld [vmem:[%s1329_s0 + $0xc0] ss:$8 sps:$4 sm:$0xff]   ;;  %v1107_v30 = vld [vmem:[%s1329_s0 + $0x54] ss:$8 sps:$4 sm:$0xff]  }
   0xb   :  { %383 = vmatprep.subr.bf16.mxu0 %v1125_v0  ;;  %1052 = vmatprep.subr.bf16.mxu1 %v1125_v0  ;;  %v1109_v31 = vld [vmem:[%s1329_s0 + $0xd4] ss:$8 sps:$4 sm:$0xff]   ;;  %v1111_v32 = vld [vmem:[%s1329_s0 + $0x50] ss:$8 sps:$4 sm:$0xff]   ;;  %v1113_v34 = vld [vmem:[%s1329_s0 + $0x64] ss:$8 sps:$4 sm:$0xff]  }
   0xc   :  { %v1112_v33 = vld [vmem:[%s1329_s0 + $0xd0] ss:$8 sps:$4 sm:$0xff]   ;;  %v1115_v35 = vld [vmem:[%s1329_s0 + $0xe4] ss:$8 sps:$4 sm:$0xff]   ;;  %v1117_v36 = vld [vmem:[%s1329_s0 + $0x60] ss:$8 sps:$4 sm:$0xff]  }
   0xd   :  { %v1118_v37 = vld [vmem:[%s1329_s0 + $0xe0] ss:$8 sps:$4 sm:$0xff]   ;;  %v1119_v38 = vld [vmem:[%s1329_s0 + $0x74] ss:$8 sps:$4 sm:$0xff]   ;;  %v1123_v40 = vld [vmem:[%s1329_s0 + $0x70] ss:$8 sps:$4 sm:$0xff]  }
   0xe   :  { %384 = vmatpush1.bf16.msra.mxu0 %v1071_v4  ;;  %1061 = vmatpush1.bf16.msra.mxu1 %v1071_v4  ;;  %v1121_v39 = vld [vmem:[%s1329_s0 + $0xf4] ss:$8 sps:$4 sm:$0xff]   ;;  %v1124_v41 = vld [vmem:[%s1329_s0 + $0xf0] ss:$8 sps:$4 sm:$0xff]  }
   0xf   :  { %385 = vmatprep.subr.bf16.mxu0 %v1125_v0  ;;  %1053 = vmatprep.subr.bf16.mxu1 %v1125_v0 }
  0x12   :  { %386 = vmatpush1.bf16.msra.mxu0 %v1072_v7  ;;  %1062 = vmatpush1.bf16.msra.mxu1 %v1072_v7 }
  0x13   :  { %387 = vmatprep.subr.bf16.mxu0 %v1125_v0  ;;  %1054 = vmatprep.subr.bf16.mxu1 %v1125_v0 }
  0x16   :  { %388 = vmatpush1.bf16.msra.mxu0 %v1073_v8  ;;  %1063 = vmatpush1.bf16.msra.mxu1 %v1073_v8 }
  0x17   :  { %389 = vmatprep.subr.bf16.mxu0 %v1125_v0  ;;  %1055 = vmatprep.subr.bf16.mxu1 %v1125_v0 }
  0x1a   :  { %390 = vmatpush1.bf16.msra.mxu0 %v1074_v9  ;;  %1064 = vmatpush1.bf16.msra.mxu1 %v1074_v9 }
  0x1b   :  { %391 = vmatprep.subr.bf16.mxu0 %v1125_v0  ;;  %1056 = vmatprep.subr.bf16.mxu1 %v1125_v0 }
  0x1e   :  { %392 = vmatpush1.bf16.msra.mxu0 %v1075_v10  ;;  %1065 = vmatpush1.bf16.msra.mxu1 %v1075_v10 }
  0x1f   :  { %393 = vmatprep.subr.bf16.mxu0 %v1125_v0  ;;  %1057 = vmatprep.subr.bf16.mxu1 %v1125_v0 }
  0x22   :  { %394 = vmatpush1.bf16.msra.mxu0 %v1076_v11  ;;  %1066 = vmatpush1.bf16.msra.mxu1 %v1076_v11 }
  0x25   :  { %410 = vmatmul.mubr.bf16.vlgmr.msra.gmra.mrb[0].mxu0 %v1077_v12  ;;  %474 = vmatmul.mubr.bf16.vlgmr.msra.gmra.mrb[0].mxu1 %v1080_v13 }
  0x26   :  { %875 = vmatprep.mubr.msk.bf16.mxu0 %vm328_vm0, %v1083_v14  ;;  %883 = vmatprep.mubr.msk.bf16.mxu1 %vm328_vm0, %v1085_v15 }
  0x2d   :  { %418 = vmatmul.mubr.bf16.gmra.mrb[4].mxu0 %v1087_v16  ;;  %482 = vmatmul.mubr.bf16.gmra.mrb[4].mxu1 %v1088_v17 }
  0x2e   :  { %876 = vmatprep.mubr.msk.bf16.mxu0 %vm328_vm0, %v1089_v18  ;;  %884 = vmatprep.mubr.msk.bf16.mxu1 %vm328_vm0, %v1091_v19 }
  0x35   :  { %426 = vmatmul.mubr.bf16.gmra.mrb[8].mxu0 %v1093_v20  ;;  %490 = vmatmul.mubr.bf16.gmra.mrb[8].mxu1 %v1094_v21 }
  0x36   :  { %877 = vmatprep.mubr.msk.bf16.mxu0 %vm328_vm0, %v1095_v22  ;;  %885 = vmatprep.mubr.msk.bf16.mxu1 %vm328_vm0, %v1097_v23 }
  0x3d   :  { %434 = vmatmul.mubr.bf16.gmra.mrb[12].mxu0 %v1099_v24  ;;  %498 = vmatmul.mubr.bf16.gmra.mrb[12].mxu1 %v1100_v25 }
  0x3e   :  { %878 = vmatprep.mubr.msk.bf16.mxu0 %vm328_vm0, %v1101_v26  ;;  %886 = vmatprep.mubr.msk.bf16.mxu1 %vm328_vm0, %v1103_v27 }
  0x45   :  { %442 = vmatmul.mubr.bf16.gmra.mrb[16].mxu0 %v1105_v28  ;;  %506 = vmatmul.mubr.bf16.gmra.mrb[16].mxu1 %v1106_v29 }
  0x46   :  { %879 = vmatprep.mubr.msk.bf16.mxu0 %vm328_vm0, %v1107_v30  ;;  %887 = vmatprep.mubr.msk.bf16.mxu1 %vm328_vm0, %v1109_v31 }
  0x4d   :  { %450 = vmatmul.mubr.bf16.gmra.mrb[20].mxu0 %v1111_v32  ;;  %514 = vmatmul.mubr.bf16.gmra.mrb[20].mxu1 %v1112_v33 }
  0x4e   :  { %880 = vmatprep.mubr.msk.bf16.mxu0 %vm328_vm0, %v1113_v34  ;;  %888 = vmatprep.mubr.msk.bf16.mxu1 %vm328_vm0, %v1115_v35 }
  0x55   :  { %458 = vmatmul.mubr.bf16.gmra.mrb[24].mxu0 %v1117_v36  ;;  %522 = vmatmul.mubr.bf16.gmra.mrb[24].mxu1 %v1118_v37 }
  0x56   :  { %881 = vmatprep.mubr.msk.bf16.mxu0 %vm328_vm0, %v1119_v38  ;;  %889 = vmatprep.mubr.msk.bf16.mxu1 %vm328_vm0, %v1121_v39 }
  0x5d   :  { %466 = vmatmul.mubr.bf16.gmra.mrb[28].mxu0 %v1123_v40  ;;  %530 = vmatmul.mubr.bf16.gmra.mrb[28].mxu1 %v1124_v41 }
  0xf8   :  { %v411_v42 = vpop.f32.mrb[0].mxu0  ;;  %v475_v43 = vpop.f32.mrb[0].mxu1 }
  0xf9   :  { %v413_v44 = vpop.f32.mrb[1].mxu0  ;;  %v477_v45 = vpop.f32.mrb[1].mxu1  ;;  %v637_v48 = vmax.f32 %v411_v42, 0.0  ;;  %v653_v49 = vmax.f32 %v475_v43, 0.0 }
  0xfa   :  { %v414_v46 = vpop.f32.mrb[2].mxu0  ;;  %v478_v47 = vpop.f32.mrb[2].mxu1 }
  0xfb   :  { %v638_v50 = vmax.f32 %v414_v46, 0.0  ;;  %v654_v51 = vmax.f32 %v478_v47, 0.0  ;;  %v416_v52 = vpop.f32.mrb[3].mxu0  ;;  %v480_v53 = vpop.f32.mrb[3].mxu1 }
  0xfd   :  { %v957_v54 = vpack.c.bf16 %v638_v50, %v637_v48  ;;  %v997_v55 = vpack.c.bf16 %v654_v51, %v653_v49 }
  0xff   :  { %958 = vst [vmem:[%s1330_s2] sm:$0xff] %v957_v54   ;;  %1041 = vst [vmem:[%s1330_s2 + $0x40] sm:$0xff] %v997_v55  }
 0x100   :  { %v419_v56 = vpop.f32.mrb[4].mxu0  ;;  %v483_v57 = vpop.f32.mrb[4].mxu1 }
 0x101   :  { %v421_v58 = vpop.f32.mrb[5].mxu0  ;;  %v485_v59 = vpop.f32.mrb[5].mxu1  ;;  %v639_v62 = vmax.f32 %v419_v56, 0.0  ;;  %v655_v63 = vmax.f32 %v483_v57, 0.0 }
 0x102   :  { %v422_v60 = vpop.f32.mrb[6].mxu0  ;;  %v486_v61 = vpop.f32.mrb[6].mxu1 }
 0x103   :  { %v640_v0 = vmax.f32 %v422_v60, 0.0  ;;  %v656_v1 = vmax.f32 %v486_v61, 0.0  ;;  %v424_v2 = vpop.f32.mrb[7].mxu0  ;;  %v488_v3 = vpop.f32.mrb[7].mxu1 }
 0x105   :  { %v962_v4 = vpack.c.bf16 %v640_v0, %v639_v62  ;;  %v1002_v5 = vpack.c.bf16 %v656_v1, %v655_v63 }
 0x107   :  { %1034 = vst [vmem:[%s1330_s2 + $0x8] sm:$0xff] %v962_v4   ;;  %1042 = vst [vmem:[%s1330_s2 + $0x48] sm:$0xff] %v1002_v5  }
 0x108   :  { %v427_v6 = vpop.f32.mrb[8].mxu0  ;;  %v491_v7 = vpop.f32.mrb[8].mxu1 }
 0x109   :  { %v429_v8 = vpop.f32.mrb[9].mxu0  ;;  %v493_v9 = vpop.f32.mrb[9].mxu1  ;;  %v641_v12 = vmax.f32 %v427_v6, 0.0  ;;  %v657_v13 = vmax.f32 %v491_v7, 0.0 }
 0x10a   :  { %v430_v10 = vpop.f32.mrb[10].mxu0  ;;  %v494_v11 = vpop.f32.mrb[10].mxu1 }
 0x10b   :  { %v642_v14 = vmax.f32 %v430_v10, 0.0  ;;  %v658_v15 = vmax.f32 %v494_v11, 0.0  ;;  %v432_v16 = vpop.f32.mrb[11].mxu0  ;;  %v496_v17 = vpop.f32.mrb[11].mxu1 }
 0x10d   :  { %v967_v18 = vpack.c.bf16 %v642_v14, %v641_v12  ;;  %v1007_v19 = vpack.c.bf16 %v658_v15, %v657_v13 }
 0x10f   :  { %1035 = vst [vmem:[%s1330_s2 + $0x10] sm:$0xff] %v967_v18   ;;  %1043 = vst [vmem:[%s1330_s2 + $0x50] sm:$0xff] %v1007_v19  }
 0x110   :  { %v435_v20 = vpop.f32.mrb[12].mxu0  ;;  %v499_v21 = vpop.f32.mrb[12].mxu1 }
 0x111   :  { %v437_v22 = vpop.f32.mrb[13].mxu0  ;;  %v501_v23 = vpop.f32.mrb[13].mxu1  ;;  %v643_v26 = vmax.f32 %v435_v20, 0.0  ;;  %v659_v27 = vmax.f32 %v499_v21, 0.0 }
 0x112   :  { %v438_v24 = vpop.f32.mrb[14].mxu0  ;;  %v502_v25 = vpop.f32.mrb[14].mxu1 }
 0x113   :  { %v644_v28 = vmax.f32 %v438_v24, 0.0  ;;  %v660_v29 = vmax.f32 %v502_v25, 0.0  ;;  %v440_v30 = vpop.f32.mrb[15].mxu0  ;;  %v504_v31 = vpop.f32.mrb[15].mxu1 }
 0x115   :  { %v972_v32 = vpack.c.bf16 %v644_v28, %v643_v26  ;;  %v1012_v33 = vpack.c.bf16 %v660_v29, %v659_v27 }
 0x117   :  { %1036 = vst [vmem:[%s1330_s2 + $0x18] sm:$0xff] %v972_v32   ;;  %1044 = vst [vmem:[%s1330_s2 + $0x58] sm:$0xff] %v1012_v33  }
 0x118   :  { %v443_v34 = vpop.f32.mrb[16].mxu0  ;;  %v507_v35 = vpop.f32.mrb[16].mxu1 }
 0x119   :  { %v445_v36 = vpop.f32.mrb[17].mxu0  ;;  %v509_v37 = vpop.f32.mrb[17].mxu1  ;;  %v645_v40 = vmax.f32 %v443_v34, 0.0  ;;  %v661_v41 = vmax.f32 %v507_v35, 0.0 }
 0x11a   :  { %v446_v38 = vpop.f32.mrb[18].mxu0  ;;  %v510_v39 = vpop.f32.mrb[18].mxu1 }
 0x11b   :  { %v646_v42 = vmax.f32 %v446_v38, 0.0  ;;  %v662_v43 = vmax.f32 %v510_v39, 0.0  ;;  %v448_v44 = vpop.f32.mrb[19].mxu0  ;;  %v512_v45 = vpop.f32.mrb[19].mxu1 }
 0x11d   :  { %v977_v46 = vpack.c.bf16 %v646_v42, %v645_v40  ;;  %v1017_v47 = vpack.c.bf16 %v662_v43, %v661_v41 }
 0x11f   :  { %1037 = vst [vmem:[%s1330_s2 + $0x20] sm:$0xff] %v977_v46   ;;  %1045 = vst [vmem:[%s1330_s2 + $0x60] sm:$0xff] %v1017_v47  }
 0x120   :  { %v451_v48 = vpop.f32.mrb[20].mxu0  ;;  %v515_v49 = vpop.f32.mrb[20].mxu1 }
 0x121   :  { %v453_v50 = vpop.f32.mrb[21].mxu0  ;;  %v517_v51 = vpop.f32.mrb[21].mxu1  ;;  %v647_v54 = vmax.f32 %v451_v48, 0.0  ;;  %v663_v55 = vmax.f32 %v515_v49, 0.0 }
 0x122   :  { %v454_v52 = vpop.f32.mrb[22].mxu0  ;;  %v518_v53 = vpop.f32.mrb[22].mxu1 }
 0x123   :  { %v648_v56 = vmax.f32 %v454_v52, 0.0  ;;  %v664_v57 = vmax.f32 %v518_v53, 0.0  ;;  %v456_v58 = vpop.f32.mrb[23].mxu0  ;;  %v520_v59 = vpop.f32.mrb[23].mxu1 }
 0x125   :  { %v982_v60 = vpack.c.bf16 %v648_v56, %v647_v54  ;;  %v1022_v61 = vpack.c.bf16 %v664_v57, %v663_v55 }
 0x127   :  { %1038 = vst [vmem:[%s1330_s2 + $0x28] sm:$0xff] %v982_v60   ;;  %1046 = vst [vmem:[%s1330_s2 + $0x68] sm:$0xff] %v1022_v61  }
 0x128   :  { %v459_v62 = vpop.f32.mrb[24].mxu0  ;;  %v523_v63 = vpop.f32.mrb[24].mxu1 }
 0x129   :  { %v461_v0 = vpop.f32.mrb[25].mxu0  ;;  %v525_v1 = vpop.f32.mrb[25].mxu1  ;;  %v649_v4 = vmax.f32 %v459_v62, 0.0  ;;  %v665_v5 = vmax.f32 %v523_v63, 0.0 }
 0x12a   :  { %v462_v2 = vpop.f32.mrb[26].mxu0  ;;  %v526_v3 = vpop.f32.mrb[26].mxu1 }
 0x12b   :  { %v650_v6 = vmax.f32 %v462_v2, 0.0  ;;  %v666_v7 = vmax.f32 %v526_v3, 0.0  ;;  %v464_v8 = vpop.f32.mrb[27].mxu0  ;;  %v528_v9 = vpop.f32.mrb[27].mxu1 }
 0x12d   :  { %v987_v10 = vpack.c.bf16 %v650_v6, %v649_v4  ;;  %v1027_v11 = vpack.c.bf16 %v666_v7, %v665_v5 }
 0x12f   :  { %1039 = vst [vmem:[%s1330_s2 + $0x30] sm:$0xff] %v987_v10   ;;  %1047 = vst [vmem:[%s1330_s2 + $0x70] sm:$0xff] %v1027_v11  }
 0x130   :  { %v467_v12 = vpop.f32.mrb[28].mxu0  ;;  %v531_v13 = vpop.f32.mrb[28].mxu1 }
 0x131   :  { %v469_v14 = vpop.f32.mrb[29].mxu0  ;;  %v533_v15 = vpop.f32.mrb[29].mxu1  ;;  %v651_v18 = vmax.f32 %v467_v12, 0.0  ;;  %v667_v19 = vmax.f32 %v531_v13, 0.0 }
 0x132   :  { %v470_v16 = vpop.f32.mrb[30].mxu0  ;;  %v534_v17 = vpop.f32.mrb[30].mxu1 }
 0x133   :  { %v652_v20 = vmax.f32 %v470_v16, 0.0  ;;  %v668_v21 = vmax.f32 %v534_v17, 0.0  ;;  %v472_v22 = vpop.f32.mrb[31].mxu0  ;;  %v536_v23 = vpop.f32.mrb[31].mxu1 }
 0x135   :  { %v992_v24 = vpack.c.bf16 %v652_v20, %v651_v18  ;;  %v1032_v25 = vpack.c.bf16 %v668_v21, %v667_v19 }
 0x137   :  { %1040 = vst [vmem:[%s1330_s2 + $0x38] sm:$0xff] %v992_v24   ;;  %1048 = vst [vmem:[%s1330_s2 + $0x78] sm:$0xff] %v1032_v25  }

// kernel: net_forward.19
= control target key start
LH: loop header
LB: loop body
LE: loop exit
PB: predicated region body
PF: predicated region fallthrough
CT: control target
= control target key end

     0   :  { %vm384_vm0 = vcmask 261120   ;;  %s1580_s1 = inlined_call_operand.vmem [shape: bf16[32,128], index: 1, kind: input, shape index: {}]   ;;  %s1581_s0 = inlined_call_operand.vmem [shape: bf16[512,32], index: 0, kind: input, shape index: {}]   ;;  %s1582_s2 = inlined_call_operand.vmem [shape: f32[512,128], index: 2, kind: output, shape index: {}]  }
   0x1   :  { %v1205_v0 = vld [vmem:[%s1580_s1] sm:$0xff]   ;;  %v1206_v1 = vld [vmem:[%s1580_s1 + $0x8] sm:$0xff]   ;;  %v1211_v6 = vld [vmem:[%s1581_s0 + $0x10] sm:$0xff]  }
   0x2   :  { %1133 = vmatprep.subr.bf16.mxu0 %v1205_v0  ;;  %1201 = vmatprep.subr.bf16.mxu1 %v1205_v0  ;;  %v1207_v2 = vld [vmem:[%s1581_s0] sm:$0xff]   ;;  %v1209_v4 = vld [vmem:[%s1581_s0 + $0x8] sm:$0xff]   ;;  %v1212_v7 = vld [vmem:[%s1581_s0 + $0x90] sm:$0xff]  }
   0x3   :  { %1134 = vmatpush3.bf16.msra.mxu0 %v1205_v0  ;;  %1203 = vmatpush3.bf16.msra.mxu1 %v1205_v0  ;;  %v1208_v3 = vld [vmem:[%s1581_s0 + $0x80] sm:$0xff]   ;;  %v1210_v5 = vld [vmem:[%s1581_s0 + $0x88] sm:$0xff]   ;;  %v1213_v8 = vld [vmem:[%s1581_s0 + $0x18] sm:$0xff]  }
   0x4   :  { %1135 = vmatprep.subr.bf16.mxu0 %v1206_v1  ;;  %1202 = vmatprep.subr.bf16.mxu1 %v1206_v1  ;;  %v1214_v9 = vld [vmem:[%s1581_s0 + $0x98] sm:$0xff]   ;;  %v1215_v10 = vld [vmem:[%s1581_s0 + $0x20] sm:$0xff]   ;;  %v1217_v12 = vld [vmem:[%s1581_s0 + $0x28] sm:$0xff]  }
   0x5   :  { %1137 = vmatprep.mubr.msk.bf16.mxu0 %vm384_vm0, %v1207_v2  ;;  %1169 = vmatprep.mubr.msk.bf16.mxu1 %vm384_vm0, %v1208_v3  ;;  %v1216_v11 = vld [vmem:[%s1581_s0 + $0xa0] sm:$0xff]   ;;  %v1218_v13 = vld [vmem:[%s1581_s0 + $0xa8] sm:$0xff]   ;;  %v1219_v14 = vld [vmem:[%s1581_s0 + $0x30] sm:$0xff]  }
   0x6   :  { %v1220_v15 = vld [vmem:[%s1581_s0 + $0xb0] sm:$0xff]   ;;  %v1221_v16 = vld [vmem:[%s1581_s0 + $0x38] sm:$0xff]   ;;  %v1223_v18 = vld [vmem:[%s1581_s0 + $0x40] sm:$0xff]  }
   0x7   :  { %1136 = vmatpush3.bf16.msra.mxu0 %v1206_v1  ;;  %1204 = vmatpush3.bf16.msra.mxu1 %v1206_v1  ;;  %v1222_v17 = vld [vmem:[%s1581_s0 + $0xb8] sm:$0xff]   ;;  %v1224_v19 = vld [vmem:[%s1581_s0 + $0xc0] sm:$0xff]   ;;  %v1225_v20 = vld [vmem:[%s1581_s0 + $0x48] sm:$0xff]  }
   0x8   :  { %v1226_v21 = vld [vmem:[%s1581_s0 + $0xc8] sm:$0xff]   ;;  %v1227_v22 = vld [vmem:[%s1581_s0 + $0x50] sm:$0xff]   ;;  %v1229_v24 = vld [vmem:[%s1581_s0 + $0x58] sm:$0xff]  }
   0x9   :  { %v1228_v23 = vld [vmem:[%s1581_s0 + $0xd0] sm:$0xff]   ;;  %v1230_v25 = vld [vmem:[%s1581_s0 + $0xd8] sm:$0xff]   ;;  %v1231_v26 = vld [vmem:[%s1581_s0 + $0x60] sm:$0xff]  }
   0xa   :  { %1138 = vmatmul.mubr.msk.bf16.vlgmr.msra.gmra.mrb[0].mxu0 %vm384_vm0, %v1209_v4  ;;  %1170 = vmatmul.mubr.msk.bf16.vlgmr.msra.gmra.mrb[0].mxu1 %vm384_vm0, %v1210_v5  ;;  %v1232_v27 = vld [vmem:[%s1581_s0 + $0xe0] sm:$0xff]   ;;  %v1233_v28 = vld [vmem:[%s1581_s0 + $0x68] sm:$0xff]   ;;  %v1235_v30 = vld [vmem:[%s1581_s0 + $0x70] sm:$0xff]  }
   0xb   :  { %1141 = vmatprep.mubr.msk.bf16.mxu0 %vm384_vm0, %v1211_v6  ;;  %1173 = vmatprep.mubr.msk.bf16.mxu1 %vm384_vm0, %v1212_v7  ;;  %v1234_v29 = vld [vmem:[%s1581_s0 + $0xe8] sm:$0xff]   ;;  %v1236_v31 = vld [vmem:[%s1581_s0 + $0xf0] sm:$0xff]   ;;  %v1237_v32 = vld [vmem:[%s1581_s0 + $0x78] sm:$0xff]  }
   0xc   :  { %v1238_v33 = vld [vmem:[%s1581_s0 + $0xf8] sm:$0xff]  }
  0x12   :  { %1142 = vmatmul.mubr.msk.bf16.gmra.mrb[4].mxu0 %vm384_vm0, %v1213_v8  ;;  %1174 = vmatmul.mubr.msk.bf16.gmra.mrb[4].mxu1 %vm384_vm0, %v1214_v9 }
  0x13   :  { %1145 = vmatprep.mubr.msk.bf16.mxu0 %vm384_vm0, %v1215_v10  ;;  %1177 = vmatprep.mubr.msk.bf16.mxu1 %vm384_vm0, %v1216_v11 }
  0x1a   :  { %1146 = vmatmul.mubr.msk.bf16.gmra.mrb[8].mxu0 %vm384_vm0, %v1217_v12  ;;  %1178 = vmatmul.mubr.msk.bf16.gmra.mrb[8].mxu1 %vm384_vm0, %v1218_v13 }
  0x1b   :  { %1149 = vmatprep.mubr.msk.bf16.mxu0 %vm384_vm0, %v1219_v14  ;;  %1181 = vmatprep.mubr.msk.bf16.mxu1 %vm384_vm0, %v1220_v15 }
  0x22   :  { %1150 = vmatmul.mubr.msk.bf16.gmra.mrb[12].mxu0 %vm384_vm0, %v1221_v16  ;;  %1182 = vmatmul.mubr.msk.bf16.gmra.mrb[12].mxu1 %vm384_vm0, %v1222_v17 }
  0x23   :  { %1153 = vmatprep.mubr.msk.bf16.mxu0 %vm384_vm0, %v1223_v18  ;;  %1185 = vmatprep.mubr.msk.bf16.mxu1 %vm384_vm0, %v1224_v19 }
  0x2a   :  { %1154 = vmatmul.mubr.msk.bf16.gmra.mrb[16].mxu0 %vm384_vm0, %v1225_v20  ;;  %1186 = vmatmul.mubr.msk.bf16.gmra.mrb[16].mxu1 %vm384_vm0, %v1226_v21 }
  0x2b   :  { %1157 = vmatprep.mubr.msk.bf16.mxu0 %vm384_vm0, %v1227_v22  ;;  %1189 = vmatprep.mubr.msk.bf16.mxu1 %vm384_vm0, %v1228_v23 }
  0x32   :  { %1158 = vmatmul.mubr.msk.bf16.gmra.mrb[20].mxu0 %vm384_vm0, %v1229_v24  ;;  %1190 = vmatmul.mubr.msk.bf16.gmra.mrb[20].mxu1 %vm384_vm0, %v1230_v25 }
  0x33   :  { %1161 = vmatprep.mubr.msk.bf16.mxu0 %vm384_vm0, %v1231_v26  ;;  %1193 = vmatprep.mubr.msk.bf16.mxu1 %vm384_vm0, %v1232_v27 }
  0x3a   :  { %1162 = vmatmul.mubr.msk.bf16.gmra.mrb[24].mxu0 %vm384_vm0, %v1233_v28  ;;  %1194 = vmatmul.mubr.msk.bf16.gmra.mrb[24].mxu1 %vm384_vm0, %v1234_v29 }
  0x3b   :  { %1165 = vmatprep.mubr.msk.bf16.mxu0 %vm384_vm0, %v1235_v30  ;;  %1197 = vmatprep.mubr.msk.bf16.mxu1 %vm384_vm0, %v1236_v31 }
  0x42   :  { %1166 = vmatmul.mubr.msk.bf16.gmra.mrb[28].mxu0 %vm384_vm0, %v1237_v32  ;;  %1198 = vmatmul.mubr.msk.bf16.gmra.mrb[28].mxu1 %vm384_vm0, %v1238_v33 }
  0xdd   :  { %v1139_v34 = vpop.f32.mrb[0].mxu0  ;;  %v1171_v35 = vpop.f32.mrb[0].mxu1 }
  0xde   :  { %967 = vst [vmem:[%s1582_s2 + $0x10] sm:$0xff] %v1139_v34  ;;  %999 = vst [vmem:[%s1582_s2 + $0x110] sm:$0xff] %v1171_v35  ;;  %v515_v36 = vpop.f32.mrb[1].mxu0  ;;  %v643_v37 = vpop.f32.mrb[1].mxu1 }
  0xdf   :  { %965 = vst [vmem:[%s1582_s2] sm:$0xff] %v515_v36  ;;  %997 = vst [vmem:[%s1582_s2 + $0x100] sm:$0xff] %v643_v37  ;;  %v1140_v38 = vpop.f32.mrb[2].mxu0  ;;  %v1172_v39 = vpop.f32.mrb[2].mxu1 }
  0xe0   :  { %968 = vst [vmem:[%s1582_s2 + $0x18] sm:$0xff] %v1140_v38  ;;  %1000 = vst [vmem:[%s1582_s2 + $0x118] sm:$0xff] %v1172_v39  ;;  %v518_v40 = vpop.f32.mrb[3].mxu0  ;;  %v646_v41 = vpop.f32.mrb[3].mxu1 }
  0xe1   :  { %966 = vst [vmem:[%s1582_s2 + $0x8] sm:$0xff] %v518_v40  ;;  %998 = vst [vmem:[%s1582_s2 + $0x108] sm:$0xff] %v646_v41 }
  0xe5   :  { %v1143_v42 = vpop.f32.mrb[4].mxu0  ;;  %v1175_v43 = vpop.f32.mrb[4].mxu1 }
  0xe6   :  { %971 = vst [vmem:[%s1582_s2 + $0x30] sm:$0xff] %v1143_v42  ;;  %1003 = vst [vmem:[%s1582_s2 + $0x130] sm:$0xff] %v1175_v43  ;;  %v531_v44 = vpop.f32.mrb[5].mxu0  ;;  %v659_v45 = vpop.f32.mrb[5].mxu1 }
  0xe7   :  { %969 = vst [vmem:[%s1582_s2 + $0x20] sm:$0xff] %v531_v44  ;;  %1001 = vst [vmem:[%s1582_s2 + $0x120] sm:$0xff] %v659_v45  ;;  %v1144_v46 = vpop.f32.mrb[6].mxu0  ;;  %v1176_v47 = vpop.f32.mrb[6].mxu1 }
  0xe8   :  { %972 = vst [vmem:[%s1582_s2 + $0x38] sm:$0xff] %v1144_v46  ;;  %1004 = vst [vmem:[%s1582_s2 + $0x138] sm:$0xff] %v1176_v47  ;;  %v534_v48 = vpop.f32.mrb[7].mxu0  ;;  %v662_v49 = vpop.f32.mrb[7].mxu1 }
  0xe9   :  { %970 = vst [vmem:[%s1582_s2 + $0x28] sm:$0xff] %v534_v48  ;;  %1002 = vst [vmem:[%s1582_s2 + $0x128] sm:$0xff] %v662_v49 }
  0xed   :  { %v1147_v50 = vpop.f32.mrb[8].mxu0  ;;  %v1179_v51 = vpop.f32.mrb[8].mxu1 }
  0xee   :  { %975 = vst [vmem:[%s1582_s2 + $0x50] sm:$0xff] %v1147_v50  ;;  %1007 = vst [vmem:[%s1582_s2 + $0x150] sm:$0xff] %v1179_v51  ;;  %v547_v52 = vpop.f32.mrb[9].mxu0  ;;  %v675_v53 = vpop.f32.mrb[9].mxu1 }
  0xef   :  { %973 = vst [vmem:[%s1582_s2 + $0x40] sm:$0xff] %v547_v52  ;;  %1005 = vst [vmem:[%s1582_s2 + $0x140] sm:$0xff] %v675_v53  ;;  %v1148_v54 = vpop.f32.mrb[10].mxu0  ;;  %v1180_v55 = vpop.f32.mrb[10].mxu1 }
  0xf0   :  { %976 = vst [vmem:[%s1582_s2 + $0x58] sm:$0xff] %v1148_v54  ;;  %1008 = vst [vmem:[%s1582_s2 + $0x158] sm:$0xff] %v1180_v55  ;;  %v550_v56 = vpop.f32.mrb[11].mxu0  ;;  %v678_v57 = vpop.f32.mrb[11].mxu1 }
  0xf1   :  { %974 = vst [vmem:[%s1582_s2 + $0x48] sm:$0xff] %v550_v56  ;;  %1006 = vst [vmem:[%s1582_s2 + $0x148] sm:$0xff] %v678_v57 }
  0xf5   :  { %v1151_v58 = vpop.f32.mrb[12].mxu0  ;;  %v1183_v59 = vpop.f32.mrb[12].mxu1 }
  0xf6   :  { %979 = vst [vmem:[%s1582_s2 + $0x70] sm:$0xff] %v1151_v58  ;;  %1011 = vst [vmem:[%s1582_s2 + $0x170] sm:$0xff] %v1183_v59  ;;  %v563_v60 = vpop.f32.mrb[13].mxu0  ;;  %v691_v61 = vpop.f32.mrb[13].mxu1 }
  0xf7   :  { %977 = vst [vmem:[%s1582_s2 + $0x60] sm:$0xff] %v563_v60  ;;  %1009 = vst [vmem:[%s1582_s2 + $0x160] sm:$0xff] %v691_v61  ;;  %v1152_v62 = vpop.f32.mrb[14].mxu0  ;;  %v1184_v63 = vpop.f32.mrb[14].mxu1 }
  0xf8   :  { %980 = vst [vmem:[%s1582_s2 + $0x78] sm:$0xff] %v1152_v62  ;;  %1012 = vst [vmem:[%s1582_s2 + $0x178] sm:$0xff] %v1184_v63  ;;  %v566_v0 = vpop.f32.mrb[15].mxu0  ;;  %v694_v1 = vpop.f32.mrb[15].mxu1 }
  0xf9   :  { %978 = vst [vmem:[%s1582_s2 + $0x68] sm:$0xff] %v566_v0  ;;  %1010 = vst [vmem:[%s1582_s2 + $0x168] sm:$0xff] %v694_v1 }
  0xfd   :  { %v1155_v2 = vpop.f32.mrb[16].mxu0  ;;  %v1187_v3 = vpop.f32.mrb[16].mxu1 }
  0xfe   :  { %983 = vst [vmem:[%s1582_s2 + $0x90] sm:$0xff] %v1155_v2  ;;  %1015 = vst [vmem:[%s1582_s2 + $0x190] sm:$0xff] %v1187_v3  ;;  %v579_v4 = vpop.f32.mrb[17].mxu0  ;;  %v707_v5 = vpop.f32.mrb[17].mxu1 }
  0xff   :  { %981 = vst [vmem:[%s1582_s2 + $0x80] sm:$0xff] %v579_v4  ;;  %1013 = vst [vmem:[%s1582_s2 + $0x180] sm:$0xff] %v707_v5  ;;  %v1156_v6 = vpop.f32.mrb[18].mxu0  ;;  %v1188_v7 = vpop.f32.mrb[18].mxu1 }
 0x100   :  { %984 = vst [vmem:[%s1582_s2 + $0x98] sm:$0xff] %v1156_v6  ;;  %1016 = vst [vmem:[%s1582_s2 + $0x198] sm:$0xff] %v1188_v7  ;;  %v582_v8 = vpop.f32.mrb[19].mxu0  ;;  %v710_v9 = vpop.f32.mrb[19].mxu1 }
 0x101   :  { %982 = vst [vmem:[%s1582_s2 + $0x88] sm:$0xff] %v582_v8  ;;  %1014 = vst [vmem:[%s1582_s2 + $0x188] sm:$0xff] %v710_v9 }
 0x105   :  { %v1159_v10 = vpop.f32.mrb[20].mxu0  ;;  %v1191_v11 = vpop.f32.mrb[20].mxu1 }
 0x106   :  { %987 = vst [vmem:[%s1582_s2 + $0xb0] sm:$0xff] %v1159_v10  ;;  %1019 = vst [vmem:[%s1582_s2 + $0x1b0] sm:$0xff] %v1191_v11  ;;  %v595_v12 = vpop.f32.mrb[21].mxu0  ;;  %v723_v13 = vpop.f32.mrb[21].mxu1 }
 0x107   :  { %985 = vst [vmem:[%s1582_s2 + $0xa0] sm:$0xff] %v595_v12  ;;  %1017 = vst [vmem:[%s1582_s2 + $0x1a0] sm:$0xff] %v723_v13  ;;  %v1160_v14 = vpop.f32.mrb[22].mxu0  ;;  %v1192_v15 = vpop.f32.mrb[22].mxu1 }
 0x108   :  { %988 = vst [vmem:[%s1582_s2 + $0xb8] sm:$0xff] %v1160_v14  ;;  %1020 = vst [vmem:[%s1582_s2 + $0x1b8] sm:$0xff] %v1192_v15  ;;  %v598_v16 = vpop.f32.mrb[23].mxu0  ;;  %v726_v17 = vpop.f32.mrb[23].mxu1 }
 0x109   :  { %986 = vst [vmem:[%s1582_s2 + $0xa8] sm:$0xff] %v598_v16  ;;  %1018 = vst [vmem:[%s1582_s2 + $0x1a8] sm:$0xff] %v726_v17 }
 0x10d   :  { %v1163_v18 = vpop.f32.mrb[24].mxu0  ;;  %v1195_v19 = vpop.f32.mrb[24].mxu1 }
 0x10e   :  { %991 = vst [vmem:[%s1582_s2 + $0xd0] sm:$0xff] %v1163_v18  ;;  %1023 = vst [vmem:[%s1582_s2 + $0x1d0] sm:$0xff] %v1195_v19  ;;  %v611_v20 = vpop.f32.mrb[25].mxu0  ;;  %v739_v21 = vpop.f32.mrb[25].mxu1 }
 0x10f   :  { %989 = vst [vmem:[%s1582_s2 + $0xc0] sm:$0xff] %v611_v20  ;;  %1021 = vst [vmem:[%s1582_s2 + $0x1c0] sm:$0xff] %v739_v21  ;;  %v1164_v22 = vpop.f32.mrb[26].mxu0  ;;  %v1196_v23 = vpop.f32.mrb[26].mxu1 }
 0x110   :  { %992 = vst [vmem:[%s1582_s2 + $0xd8] sm:$0xff] %v1164_v22  ;;  %1024 = vst [vmem:[%s1582_s2 + $0x1d8] sm:$0xff] %v1196_v23  ;;  %v614_v24 = vpop.f32.mrb[27].mxu0  ;;  %v742_v25 = vpop.f32.mrb[27].mxu1 }
 0x111   :  { %990 = vst [vmem:[%s1582_s2 + $0xc8] sm:$0xff] %v614_v24  ;;  %1022 = vst [vmem:[%s1582_s2 + $0x1c8] sm:$0xff] %v742_v25 }
 0x115   :  { %v1167_v26 = vpop.f32.mrb[28].mxu0  ;;  %v1199_v27 = vpop.f32.mrb[28].mxu1 }
 0x116   :  { %995 = vst [vmem:[%s1582_s2 + $0xf0] sm:$0xff] %v1167_v26  ;;  %1027 = vst [vmem:[%s1582_s2 + $0x1f0] sm:$0xff] %v1199_v27  ;;  %v627_v28 = vpop.f32.mrb[29].mxu0  ;;  %v755_v29 = vpop.f32.mrb[29].mxu1 }
 0x117   :  { %993 = vst [vmem:[%s1582_s2 + $0xe0] sm:$0xff] %v627_v28  ;;  %1025 = vst [vmem:[%s1582_s2 + $0x1e0] sm:$0xff] %v755_v29  ;;  %v1168_v30 = vpop.f32.mrb[30].mxu0  ;;  %v1200_v31 = vpop.f32.mrb[30].mxu1 }
 0x118   :  { %996 = vst [vmem:[%s1582_s2 + $0xf8] sm:$0xff] %v1168_v30  ;;  %1028 = vst [vmem:[%s1582_s2 + $0x1f8] sm:$0xff] %v1200_v31  ;;  %v630_v32 = vpop.f32.mrb[31].mxu0  ;;  %v758_v33 = vpop.f32.mrb[31].mxu1 }
 0x119   :  { %994 = vst [vmem:[%s1582_s2 + $0xe8] sm:$0xff] %v630_v32  ;;  %1026 = vst [vmem:[%s1582_s2 + $0x1e8] sm:$0xff] %v758_v33 }

// kernel: net_forward.18
= control target key start
LH: loop header
LB: loop body
LE: loop exit
PB: predicated region body
PF: predicated region fallthrough
CT: control target
= control target key end

     0   :  { %v3784_v0 = vmov 0   ;;  %vm904_vm0 = vcmask 261120   ;;  %s4799_s1 = inlined_call_operand.vmem [shape: bf16[288,128], index: 1, kind: input, shape index: {}]   ;;  %s4800_s0 = inlined_call_operand.vmem [shape: bf16[512,288], index: 0, kind: input, shape index: {}]   ;;  %s4801_s3 = inlined_call_operand.vmem [shape: bf16[128,128], index: 3, kind: input, shape index: {}]   ;;  %s4802_s2 = inlined_call_operand.vmem [shape: bf16[512,128], index: 2, kind: input, shape index: {}]   ;;  %s4803_s4 = inlined_call_operand.vmem [shape: bf16[512,128], index: 4, kind: output, shape index: {0}]   ;;  %s4804_s5 = inlined_call_operand.vmem [shape: f32[512,128], index: 5, kind: output, shape index: {1}]  }
   0x1   :  { %1001 = vmatprep.subr.bf16.mxu0 %v3784_v0  ;;  %v3630_v1 = vld [vmem:[%s4799_s1] sm:$0xff]   ;;  %v3631_v2 = vld [vmem:[%s4799_s1 + $0x8] sm:$0xff]   ;;  %v3632_v3 = vld [vmem:[%s4799_s1 + $0x10] sm:$0xff]  }
   0x2   :  { %1002 = vmatpush1.bf16.msra.mxu0 %v3630_v1  ;;  %v3633_v4 = vld [vmem:[%s4799_s1 + $0x18] sm:$0xff]   ;;  %v3634_v5 = vld [vmem:[%s4799_s1 + $0x20] sm:$0xff]   ;;  %v3646_v7 = vld [vmem:[%s4799_s1 + $0x88] sm:$0xff]  }
   0x3   :  { %1003 = vmatprep.subr.bf16.mxu0 %v3784_v0  ;;  %v3644_v6 = vld [vmem:[%s4799_s1 + $0x80] sm:$0xff]   ;;  %v3635_v8 = vld [vmem:[%s4799_s1 + $0x28] sm:$0xff]   ;;  %v3636_v12 = vld [vmem:[%s4799_s1 + $0x30] sm:$0xff]  }
   0x4   :  { %3481 = vmatprep.subr.bf16.mxu1 %v3644_v6  ;;  %v3648_v9 = vld [vmem:[%s4800_s0 + $0x8] ss:$12 sps:$4 sm:$0xff]   ;;  %v3651_v10 = vld [vmem:[%s4800_s0 + $0x4] ss:$12 sps:$4 sm:$0xff]   ;;  %v3652_v11 = vld [vmem:[%s4800_s0 + $0x20] ss:$12 sps:$4 sm:$0xff]  }
   0x5   :  { %3482 = vmatpush3.bf16.msra.mxu1 %v3644_v6  ;;  %3485 = vmatprep.mubr.msk.bf16.mxu1 %vm904_vm0, %v3648_v9  ;;  %v3656_v13 = vld [vmem:[%s4800_s0 + $0x38] ss:$12 sps:$4 sm:$0xff]   ;;  %v3659_v15 = vld [vmem:[%s4800_s0 + $0x50] ss:$12 sps:$4 sm:$0xff]   ;;  %v3664_v16 = vld [vmem:[%s4800_s0 + $0x68] ss:$12 sps:$4 sm:$0xff]  }
   0x6   :  { %1004 = vmatpush1.bf16.msra.mxu0 %v3631_v2  ;;  %3483 = vmatprep.subr.bf16.mxu1 %v3646_v7  ;;  %v3637_v14 = vld [vmem:[%s4799_s1 + $0x38] sm:$0xff]   ;;  %v3638_v17 = vld [vmem:[%s4799_s1 + $0x40] sm:$0xff]   ;;  %v3639_v18 = vld [vmem:[%s4799_s1 + $0x48] sm:$0xff]  }
   0x7   :  { %1005 = vmatprep.subr.bf16.mxu0 %v3784_v0  ;;  %1033 = vmatprep.mubr.bf16.mxu0 %v3651_v10  ;;  %v3667_v19 = vld [vmem:[%s4800_s0 + $0x80] ss:$12 sps:$4 sm:$0xff]   ;;  %v3672_v20 = vld [vmem:[%s4800_s0 + $0x98] ss:$12 sps:$4 sm:$0xff]   ;;  %v3640_v21 = vld [vmem:[%s4799_s1 + $0x50] sm:$0xff]  }
   0x8   :  { %v3641_v22 = vld [vmem:[%s4799_s1 + $0x58] sm:$0xff]   ;;  %v3680_v24 = vld [vmem:[%s4800_s0 + $0xc8] ss:$12 sps:$4 sm:$0xff]   ;;  %v3642_v25 = vld [vmem:[%s4799_s1 + $0x60] sm:$0xff]  }
   0x9   :  { %3484 = vmatpush3.bf16.msra.mxu1 %v3646_v7  ;;  %v3675_v23 = vld [vmem:[%s4800_s0 + $0xb0] ss:$12 sps:$4 sm:$0xff]   ;;  %v3643_v26 = vld [vmem:[%s4799_s1 + $0x68] sm:$0xff]   ;;  %v3688_v28 = vld [vmem:[%s4800_s0 + $0xf8] ss:$12 sps:$4 sm:$0xff]  }
   0xa   :  { %1006 = vmatpush1.bf16.msra.mxu0 %v3632_v3  ;;  %v3683_v27 = vld [vmem:[%s4800_s0 + $0xe0] ss:$12 sps:$4 sm:$0xff]   ;;  %v3645_v29 = vld [vmem:[%s4799_s1 + $0x70] sm:$0xff]   ;;  %v3647_v30 = vld [vmem:[%s4799_s1 + $0x78] sm:$0xff]  }
   0xb   :  { %1007 = vmatprep.subr.bf16.mxu0 %v3784_v0  ;;  %v3691_v31 = vld [vmem:[%s4800_s0 + $0x110] ss:$12 sps:$4 sm:$0xff]   ;;  %v3649_v32 = vld [vmem:[%s4800_s0] ss:$12 sps:$4 sm:$0xff]   ;;  %v3696_v33 = vld [vmem:[%s4800_s0 + $0x128] ss:$12 sps:$4 sm:$0xff]  }
   0xc   :  { %3486 = vmatmul.mubr.msk.bf16.vlgmr.msra.gmra.mrb[0].mxu1 %vm904_vm0, %v3652_v11  ;;  %v3653_v34 = vld [vmem:[%s4800_s0 + $0x1c] ss:$12 sps:$4 sm:$0xff]   ;;  %v3699_v35 = vld [vmem:[%s4800_s0 + $0x140] ss:$12 sps:$4 sm:$0xff]   ;;  %v3655_v36 = vld [vmem:[%s4800_s0 + $0x18] ss:$12 sps:$4 sm:$0xff]  }
   0xd   :  { %3489 = vmatprep.mubr.msk.bf16.mxu1 %vm904_vm0, %v3656_v13  ;;  %v3704_v37 = vld [vmem:[%s4800_s0 + $0x158] ss:$12 sps:$4 sm:$0xff]   ;;  %v3657_v38 = vld [vmem:[%s4800_s0 + $0x34] ss:$12 sps:$4 sm:$0xff]   ;;  %v3707_v39 = vld [vmem:[%s4800_s0 + $0x170] ss:$12 sps:$4 sm:$0xff]  }
   0xe   :  { %1008 = vmatpush1.bf16.msra.mxu0 %v3633_v4  ;;  %v3660_v40 = vld [vmem:[%s4800_s0 + $0x30] ss:$12 sps:$4 sm:$0xff]   ;;  %v3712_v41 = vld [vmem:[%s4800_s0 + $0x188] ss:$12 sps:$4 sm:$0xff]   ;;  %v3661_v42 = vld [vmem:[%s4800_s0 + $0x4c] ss:$12 sps:$4 sm:$0xff]  }
   0xf   :  { %1009 = vmatprep.subr.bf16.mxu0 %v3784_v0  ;;  %v3715_v43 = vld [vmem:[%s4800_s0 + $0x1a0] ss:$12 sps:$4 sm:$0xff]   ;;  %v3663_v44 = vld [vmem:[%s4800_s0 + $0x48] ss:$12 sps:$4 sm:$0xff]   ;;  %v3720_v45 = vld [vmem:[%s4800_s0 + $0x1b8] ss:$12 sps:$4 sm:$0xff]  }
  0x10   :  { %v3665_v46 = vld [vmem:[%s4800_s0 + $0x64] ss:$12 sps:$4 sm:$0xff]   ;;  %v3668_v48 = vld [vmem:[%s4800_s0 + $0x60] ss:$12 sps:$4 sm:$0xff]   ;;  %v3728_v49 = vld [vmem:[%s4800_s0 + $0x1e8] ss:$12 sps:$4 sm:$0xff]  }
  0x11   :  { %v3723_v47 = vld [vmem:[%s4800_s0 + $0x1d0] ss:$12 sps:$4 sm:$0xff]   ;;  %v3731_v51 = vld [vmem:[%s4800_s0 + $0x200] ss:$12 sps:$4 sm:$0xff]   ;;  %v3671_v52 = vld [vmem:[%s4800_s0 + $0x78] ss:$12 sps:$4 sm:$0xff]  }
  0x12   :  { %1010 = vmatpush1.bf16.msra.mxu0 %v3634_v5  ;;  %v3669_v50 = vld [vmem:[%s4800_s0 + $0x7c] ss:$12 sps:$4 sm:$0xff]   ;;  %v3673_v53 = vld [vmem:[%s4800_s0 + $0x94] ss:$12 sps:$4 sm:$0xff]   ;;  %v3736_v54 = vld [vmem:[%s4800_s0 + $0x218] ss:$12 sps:$4 sm:$0xff]  }
  0x13   :  { %1011 = vmatprep.subr.bf16.mxu0 %v3784_v0  ;;  %v3739_v55 = vld [vmem:[%s4800_s0 + $0x230] ss:$12 sps:$4 sm:$0xff]   ;;  %v3677_v57 = vld [vmem:[%s4800_s0 + $0xac] ss:$12 sps:$4 sm:$0xff]   ;;  %v3679_v58 = vld [vmem:[%s4800_s0 + $0xa8] ss:$12 sps:$4 sm:$0xff]  }
  0x14   :  { %3490 = vmatmul.mubr.msk.bf16.gmra.mrb[4].mxu1 %vm904_vm0, %v3659_v15  ;;  %v3676_v56 = vld [vmem:[%s4800_s0 + $0x90] ss:$12 sps:$4 sm:$0xff]   ;;  %v3744_v60 = vld [vmem:[%s4800_s0 + $0x248] ss:$12 sps:$4 sm:$0xff]   ;;  %v3747_v61 = vld [vmem:[%s4800_s0 + $0x260] ss:$12 sps:$4 sm:$0xff]  }
  0x15   :  { %3493 = vmatprep.mubr.msk.bf16.mxu1 %vm904_vm0, %v3664_v16  ;;  %v3681_v59 = vld [vmem:[%s4800_s0 + $0xc4] ss:$12 sps:$4 sm:$0xff]   ;;  %v3684_v62 = vld [vmem:[%s4800_s0 + $0xc0] ss:$12 sps:$4 sm:$0xff]   ;;  %v3685_v63 = vld [vmem:[%s4800_s0 + $0xdc] ss:$12 sps:$4 sm:$0xff]  }
  0x16   :  { %1012 = vmatpush1.bf16.msra.mxu0 %v3635_v8  ;;  %v3687_v1 = vld [vmem:[%s4800_s0 + $0xd8] ss:$12 sps:$4 sm:$0xff]   ;;  %v3689_v2 = vld [vmem:[%s4800_s0 + $0xf4] ss:$12 sps:$4 sm:$0xff]   ;;  %v3753_v3 = vld [vmem:[%s4801_s3 + $0x8] sm:$0xff]  }
  0x17   :  { %1013 = vmatprep.subr.bf16.mxu0 %v3784_v0  ;;  %v3754_v4 = vld [vmem:[%s4800_s0 + $0x278] ss:$12 sps:$4 sm:$0xff]   ;;  %v3755_v5 = vld [vmem:[%s4800_s0 + $0x290] ss:$12 sps:$4 sm:$0xff]   ;;  %v3761_v10 = vld [vmem:[%s4800_s0 + $0x2a8] ss:$12 sps:$4 sm:$0xff]  }
  0x18   :  { %v3756_v6 = vld [vmem:[%s4801_s3 + $0x10] sm:$0xff]   ;;  %v3693_v8 = vld [vmem:[%s4800_s0 + $0x10c] ss:$12 sps:$4 sm:$0xff]   ;;  %v3763_v13 = vld [vmem:[%s4801_s3 + $0x20] sm:$0xff]  }
  0x19   :  { %v3692_v7 = vld [vmem:[%s4800_s0 + $0xf0] ss:$12 sps:$4 sm:$0xff]   ;;  %v3762_v11 = vld [vmem:[%s4800_s0 + $0x2c0] ss:$12 sps:$4 sm:$0xff]   ;;  %v3768_v16 = vld [vmem:[%s4800_s0 + $0x2d8] ss:$12 sps:$4 sm:$0xff]  }
  0x1a   :  { %1014 = vmatpush1.bf16.msra.mxu0 %v3636_v12  ;;  %v3760_v9 = vld [vmem:[%s4801_s3 + $0x18] sm:$0xff]   ;;  %v3695_v12 = vld [vmem:[%s4800_s0 + $0x108] ss:$12 sps:$4 sm:$0xff]  }
  0x1b   :  { %1015 = vmatprep.subr.bf16.mxu0 %v3784_v0  ;;  %v3767_v15 = vld [vmem:[%s4801_s3 + $0x28] sm:$0xff]  }
  0x1c   :  { %3494 = vmatmul.mubr.msk.bf16.gmra.mrb[8].mxu1 %vm904_vm0, %v3667_v19  ;;  %v3770_v19 = vld [vmem:[%s4801_s3 + $0x30] sm:$0xff]  }
  0x1d   :  { %3497 = vmatprep.mubr.msk.bf16.mxu1 %vm904_vm0, %v3672_v20  ;;  %v3701_v20 = vld [vmem:[%s4800_s0 + $0x13c] ss:$12 sps:$4 sm:$0xff]  }
  0x1e   :  { %1016 = vmatpush1.bf16.msra.mxu0 %v3637_v14  ;;  %v3697_v14 = vld [vmem:[%s4800_s0 + $0x124] ss:$12 sps:$4 sm:$0xff]  }
  0x1f   :  { %1017 = vmatprep.subr.bf16.mxu0 %v3784_v0 }
  0x22   :  { %1018 = vmatpush1.bf16.msra.mxu0 %v3638_v17  ;;  %v3769_v17 = vld [vmem:[%s4800_s0 + $0x2f0] ss:$12 sps:$4 sm:$0xff]  }
  0x23   :  { %1019 = vmatprep.subr.bf16.mxu0 %v3784_v0 }
  0x24   :  { %3498 = vmatmul.mubr.msk.bf16.gmra.mrb[12].mxu1 %vm904_vm0, %v3675_v23  ;;  %v3705_v23 = vld [vmem:[%s4800_s0 + $0x154] ss:$12 sps:$4 sm:$0xff]  }
  0x25   :  { %3501 = vmatprep.mubr.msk.bf16.mxu1 %vm904_vm0, %v3680_v24  ;;  %v3708_v24 = vld [vmem:[%s4800_s0 + $0x150] ss:$12 sps:$4 sm:$0xff]  }
  0x26   :  { %1020 = vmatpush1.bf16.msra.mxu0 %v3639_v18  ;;  %v3700_v18 = vld [vmem:[%s4800_s0 + $0x120] ss:$12 sps:$4 sm:$0xff]  }
  0x27   :  { %1021 = vmatprep.subr.bf16.mxu0 %v3784_v0 }
  0x2a   :  { %1022 = vmatpush1.bf16.msra.mxu0 %v3640_v21  ;;  %v3774_v21 = vld [vmem:[%s4801_s3 + $0x38] sm:$0xff]  }
  0x2b   :  { %1023 = vmatprep.subr.bf16.mxu0 %v3784_v0 }
  0x2c   :  { %3502 = vmatmul.mubr.msk.bf16.gmra.mrb[16].mxu1 %vm904_vm0, %v3683_v27  ;;  %v3713_v27 = vld [vmem:[%s4800_s0 + $0x184] ss:$12 sps:$4 sm:$0xff]  }
  0x2d   :  { %3505 = vmatprep.mubr.msk.bf16.mxu1 %vm904_vm0, %v3688_v28  ;;  %v3716_v28 = vld [vmem:[%s4800_s0 + $0x180] ss:$12 sps:$4 sm:$0xff]  }
  0x2e   :  { %1024 = vmatpush1.bf16.msra.mxu0 %v3641_v22  ;;  %v3703_v22 = vld [vmem:[%s4800_s0 + $0x138] ss:$12 sps:$4 sm:$0xff]  }
  0x2f   :  { %1025 = vmatprep.subr.bf16.mxu0 %v3784_v0 }
  0x32   :  { %1026 = vmatpush1.bf16.msra.mxu0 %v3642_v25  ;;  %v3709_v25 = vld [vmem:[%s4800_s0 + $0x16c] ss:$12 sps:$4 sm:$0xff]  }
  0x33   :  { %1027 = vmatprep.subr.bf16.mxu0 %v3784_v0 }
  0x34   :  { %3506 = vmatmul.mubr.msk.bf16.gmra.mrb[20].mxu1 %vm904_vm0, %v3691_v31  ;;  %v3721_v31 = vld [vmem:[%s4800_s0 + $0x1b4] ss:$12 sps:$4 sm:$0xff]  }
  0x35   :  { %3509 = vmatprep.mubr.msk.bf16.mxu1 %vm904_vm0, %v3696_v33  ;;  %v3725_v33 = vld [vmem:[%s4800_s0 + $0x1cc] ss:$12 sps:$4 sm:$0xff]  }
  0x36   :  { %1028 = vmatpush1.bf16.msra.mxu0 %v3643_v26  ;;  %v3711_v26 = vld [vmem:[%s4800_s0 + $0x168] ss:$12 sps:$4 sm:$0xff]  }
  0x37   :  { %1029 = vmatprep.subr.bf16.mxu0 %v3784_v0 }
  0x3a   :  { %1030 = vmatpush1.bf16.msra.mxu0 %v3645_v29  ;;  %v3717_v29 = vld [vmem:[%s4800_s0 + $0x19c] ss:$12 sps:$4 sm:$0xff]  }
  0x3b   :  { %1031 = vmatprep.subr.bf16.mxu0 %v3784_v0  ;;  %v3749_v0 = vld [vmem:[%s4801_s3] sm:$0xff]  }
  0x3c   :  { %3510 = vmatmul.mubr.msk.bf16.gmra.mrb[24].mxu1 %vm904_vm0, %v3699_v35  ;;  %3549 = vmatprep.subr.bf16.mxu1 %v3749_v0  ;;  %v3729_v35 = vld [vmem:[%s4800_s0 + $0x1e4] ss:$12 sps:$4 sm:$0xff]  }
  0x3d   :  { %3513 = vmatprep.mubr.msk.bf16.mxu1 %vm904_vm0, %v3704_v37  ;;  %3550 = vmatpush3.bf16.msra.mxu1 %v3749_v0  ;;  %v3733_v37 = vld [vmem:[%s4800_s0 + $0x1fc] ss:$12 sps:$4 sm:$0xff]  }
  0x3e   :  { %1032 = vmatpush1.bf16.msra.mxu0 %v3647_v30  ;;  %3551 = vmatprep.subr.bf16.mxu1 %v3753_v3  ;;  %v3719_v30 = vld [vmem:[%s4800_s0 + $0x198] ss:$12 sps:$4 sm:$0xff]  }
  0x41   :  { %1034 = vmatmul.mubr.bf16.vlgmr.msra.gmra.mrb[0].mxu0 %v3649_v32  ;;  %3552 = vmatpush3.bf16.msra.mxu1 %v3753_v3  ;;  %v3724_v32 = vld [vmem:[%s4800_s0 + $0x1b0] ss:$12 sps:$4 sm:$0xff]  }
  0x42   :  { %1041 = vmatprep.mubr.bf16.mxu0 %v3653_v34  ;;  %3553 = vmatprep.subr.bf16.mxu1 %v3756_v6  ;;  %v3727_v34 = vld [vmem:[%s4800_s0 + $0x1c8] ss:$12 sps:$4 sm:$0xff]  }
  0x44   :  { %3514 = vmatmul.mubr.msk.bf16.gmra.mrb[28].mxu1 %vm904_vm0, %v3707_v39  ;;  %v3737_v39 = vld [vmem:[%s4800_s0 + $0x214] ss:$12 sps:$4 sm:$0xff]  }
  0x45   :  { %3517 = vmatprep.mubr.msk.bf16.mxu1 %vm904_vm0, %v3712_v41  ;;  %3554 = vmatpush3.bf16.msra.mxu1 %v3756_v6  ;;  %v3058_v6 = vld [vmem:[%s4802_s2] sm:$0xff]  }
  0x46   :  { %3555 = vmatprep.subr.bf16.mxu1 %v3760_v9 }
  0x49   :  { %1042 = vmatmul.mubr.bf16.gmra.mrb[4].mxu0 %v3655_v36  ;;  %3556 = vmatpush3.bf16.msra.mxu1 %v3760_v9  ;;  %v3732_v36 = vld [vmem:[%s4800_s0 + $0x1e0] ss:$12 sps:$4 sm:$0xff]  }
  0x4a   :  { %1049 = vmatprep.mubr.bf16.mxu0 %v3657_v38  ;;  %3557 = vmatprep.subr.bf16.mxu1 %v3763_v13  ;;  %v3735_v38 = vld [vmem:[%s4800_s0 + $0x1f8] ss:$12 sps:$4 sm:$0xff]  }
  0x4c   :  { %3518 = vmatmul.mubr.msk.bf16.gmra.mrb[32].mxu1 %vm904_vm0, %v3715_v43 }
  0x4d   :  { %3521 = vmatprep.mubr.msk.bf16.mxu1 %vm904_vm0, %v3720_v45  ;;  %3558 = vmatpush3.bf16.msra.mxu1 %v3763_v13  ;;  %v3060_v13 = vunpack.c.h.bf16 %v3058_v6 }
  0x4e   :  { %3559 = vmatprep.subr.bf16.mxu1 %v3767_v15 }
  0x51   :  { %1050 = vmatmul.mubr.bf16.gmra.mrb[8].mxu0 %v3660_v40  ;;  %3560 = vmatpush3.bf16.msra.mxu1 %v3767_v15 }
  0x52   :  { %1057 = vmatprep.mubr.bf16.mxu0 %v3661_v42  ;;  %3561 = vmatprep.subr.bf16.mxu1 %v3770_v19  ;;  %v3740_v42 = vld [vmem:[%s4800_s0 + $0x210] ss:$12 sps:$4 sm:$0xff]  }
  0x54   :  { %3522 = vmatmul.mubr.msk.bf16.gmra.mrb[36].mxu1 %vm904_vm0, %v3723_v47 }
  0x55   :  { %3525 = vmatprep.mubr.msk.bf16.mxu1 %vm904_vm0, %v3728_v49  ;;  %3562 = vmatpush3.bf16.msra.mxu1 %v3770_v19 }
  0x56   :  { %3563 = vmatprep.subr.bf16.mxu1 %v3774_v21 }
  0x59   :  { %1058 = vmatmul.mubr.bf16.gmra.mrb[12].mxu0 %v3663_v44  ;;  %3564 = vmatpush3.bf16.msra.mxu1 %v3774_v21  ;;  %v3741_v44 = vld [vmem:[%s4800_s0 + $0x22c] ss:$12 sps:$4 sm:$0xff]  }
  0x5a   :  { %1065 = vmatprep.mubr.bf16.mxu0 %v3665_v46 }
  0x5c   :  { %3526 = vmatmul.mubr.msk.bf16.gmra.mrb[40].mxu1 %vm904_vm0, %v3731_v51 }
  0x5d   :  { %3529 = vmatprep.mubr.msk.bf16.mxu1 %vm904_vm0, %v3736_v54  ;;  %v3748_v54 = vld [vmem:[%s4800_s0 + $0x240] ss:$12 sps:$4 sm:$0xff]  }
  0x61   :  { %1066 = vmatmul.mubr.bf16.gmra.mrb[16].mxu0 %v3668_v48  ;;  %v3743_v48 = vld [vmem:[%s4800_s0 + $0x228] ss:$12 sps:$4 sm:$0xff]  }
  0x62   :  { %1073 = vmatprep.mubr.bf16.mxu0 %v3669_v50  ;;  %v3745_v50 = vld [vmem:[%s4800_s0 + $0x244] ss:$12 sps:$4 sm:$0xff]  }
  0x64   :  { %3530 = vmatmul.mubr.msk.bf16.gmra.mrb[44].mxu1 %vm904_vm0, %v3739_v55 }
  0x65   :  { %3533 = vmatprep.mubr.msk.bf16.mxu1 %vm904_vm0, %v3744_v60  ;;  %v3752_v60 = vld [vmem:[%s4800_s0 + $0x258] ss:$12 sps:$4 sm:$0xff]  }
  0x69   :  { %1074 = vmatmul.mubr.bf16.gmra.mrb[20].mxu0 %v3671_v52 }
  0x6a   :  { %1081 = vmatprep.mubr.bf16.mxu0 %v3673_v53 }
  0x6c   :  { %3534 = vmatmul.mubr.msk.bf16.gmra.mrb[48].mxu1 %vm904_vm0, %v3747_v61 }
  0x6d   :  { %3537 = vmatprep.mubr.msk.bf16.mxu1 %vm904_vm0, %v3754_v4  ;;  %v3764_v4 = vld [vmem:[%s4800_s0 + $0x28c] ss:$12 sps:$4 sm:$0xff]  }
  0x71   :  { %1082 = vmatmul.mubr.bf16.gmra.mrb[24].mxu0 %v3676_v56  ;;  %v3750_v56 = vld [vmem:[%s4800_s0 + $0x25c] ss:$12 sps:$4 sm:$0xff]  }
  0x72   :  { %1089 = vmatprep.mubr.bf16.mxu0 %v3677_v57 }
  0x74   :  { %3538 = vmatmul.mubr.msk.bf16.gmra.mrb[52].mxu1 %vm904_vm0, %v3755_v5 }
  0x75   :  { %3541 = vmatprep.mubr.msk.bf16.mxu1 %vm904_vm0, %v3761_v10 }
  0x79   :  { %1090 = vmatmul.mubr.bf16.gmra.mrb[28].mxu0 %v3679_v58 }
  0x7a   :  { %1097 = vmatprep.mubr.bf16.mxu0 %v3681_v59 }
  0x7c   :  { %3542 = vmatmul.mubr.msk.bf16.gmra.mrb[56].mxu1 %vm904_vm0, %v3762_v11 }
  0x7d   :  { %3545 = vmatprep.mubr.msk.bf16.mxu1 %vm904_vm0, %v3768_v16 }
  0x81   :  { %1098 = vmatmul.mubr.bf16.gmra.mrb[32].mxu0 %v3684_v62  ;;  %v3757_v62 = vld [vmem:[%s4800_s0 + $0x274] ss:$12 sps:$4 sm:$0xff]  }
  0x82   :  { %1105 = vmatprep.mubr.bf16.mxu0 %v3685_v63 }
  0x84   :  { %3546 = vmatmul.mubr.msk.bf16.gmra.mrb[60].mxu1 %vm904_vm0, %v3769_v17  ;;  %v3771_v17 = vld [vmem:[%s4800_s0 + $0x2a4] ss:$12 sps:$4 sm:$0xff]  }
  0x89   :  { %1106 = vmatmul.mubr.bf16.gmra.mrb[36].mxu0 %v3687_v1 }
  0x8a   :  { %1113 = vmatprep.mubr.bf16.mxu0 %v3689_v2  ;;  %v3759_v2 = vld [vmem:[%s4800_s0 + $0x270] ss:$12 sps:$4 sm:$0xff]  }
  0x91   :  { %1114 = vmatmul.mubr.bf16.gmra.mrb[40].mxu0 %v3692_v7  ;;  %v3059_v7 = vunpack.c.l.bf16 %v3058_v6  ;;  %v3777_v6 = vld [vmem:[%s4800_s0 + $0x2b8] ss:$12 sps:$4 sm:$0xff]  }
  0x92   :  { %1121 = vmatprep.mubr.bf16.mxu0 %v3693_v8 }
  0x99   :  { %1122 = vmatmul.mubr.bf16.gmra.mrb[44].mxu0 %v3695_v12 }
  0x9a   :  { %1129 = vmatprep.mubr.bf16.mxu0 %v3697_v14  ;;  %v3766_v14 = vld [vmem:[%s4800_s0 + $0x288] ss:$12 sps:$4 sm:$0xff]  }
  0xa1   :  { %1130 = vmatmul.mubr.bf16.gmra.mrb[48].mxu0 %v3700_v18 }
  0xa2   :  { %1137 = vmatprep.mubr.bf16.mxu0 %v3701_v20 }
  0xa9   :  { %1138 = vmatmul.mubr.bf16.gmra.mrb[52].mxu0 %v3703_v22  ;;  %v3345_v22 = vld [vmem:[%s4802_s2 + $0x8] sm:$0xff]  }
  0xaa   :  { %1145 = vmatprep.mubr.bf16.mxu0 %v3705_v23 }
  0xb1   :  { %1146 = vmatmul.mubr.bf16.gmra.mrb[56].mxu0 %v3708_v24 }
  0xb2   :  { %1153 = vmatprep.mubr.bf16.mxu0 %v3709_v25 }
  0xb9   :  { %1154 = vmatmul.mubr.bf16.gmra.mrb[60].mxu0 %v3711_v26  ;;  %v3063_v26 = vunpack.c.l.bf16 %v3345_v22 }
  0xba   :  { %1161 = vmatprep.mubr.bf16.mxu0 %v3713_v27 }
  0xc1   :  { %1162 = vmatmul.mubr.bf16.gmra.mrb[64].mxu0 %v3716_v28 }
  0xc2   :  { %1169 = vmatprep.mubr.bf16.mxu0 %v3717_v29 }
  0xc9   :  { %1170 = vmatmul.mubr.bf16.gmra.mrb[68].mxu0 %v3719_v30 }
  0xca   :  { %1177 = vmatprep.mubr.bf16.mxu0 %v3721_v31 }
  0xd1   :  { %1178 = vmatmul.mubr.bf16.gmra.mrb[72].mxu0 %v3724_v32  ;;  %v3064_v32 = vunpack.c.h.bf16 %v3345_v22 }
  0xd2   :  { %1185 = vmatprep.mubr.bf16.mxu0 %v3725_v33 }
  0xd9   :  { %1186 = vmatmul.mubr.bf16.gmra.mrb[76].mxu0 %v3727_v34  ;;  %v3773_v34 = vld [vmem:[%s4800_s0 + $0x2a0] ss:$12 sps:$4 sm:$0xff]  }
  0xda   :  { %1193 = vmatprep.mubr.bf16.mxu0 %v3729_v35 }
  0xdf   :  { %v4172_v40 = vpop.f32.mrb[0].mxu1 }
  0xe0   :  { %v1324_v41 = vpop.f32.mrb[1].mxu1 }
  0xe1   :  { %1194 = vmatmul.mubr.bf16.gmra.mrb[80].mxu0 %v3732_v36  ;;  %v4177_v43 = vpop.f32.mrb[2].mxu1 }
  0xe2   :  { %1201 = vmatprep.mubr.bf16.mxu0 %v3733_v37  ;;  %v1327_v45 = vpop.f32.mrb[3].mxu1  ;;  %v3775_v37 = vld [vmem:[%s4800_s0 + $0x2bc] ss:$12 sps:$4 sm:$0xff]  }
  0xe7   :  { %v4182_v46 = vpop.f32.mrb[4].mxu1 }
  0xe8   :  { %v4184_v47 = vpop.f32.mrb[5].mxu1 }
  0xe9   :  { %1202 = vmatmul.mubr.bf16.gmra.mrb[84].mxu0 %v3735_v38  ;;  %v4189_v49 = vpop.f32.mrb[6].mxu1 }
  0xea   :  { %1209 = vmatprep.mubr.bf16.mxu0 %v3737_v39  ;;  %v4194_v51 = vpop.f32.mrb[7].mxu1 }
  0xef   :  { %v4196_v52 = vpop.f32.mrb[8].mxu1 }
  0xf0   :  { %v4198_v53 = vpop.f32.mrb[9].mxu1 }
  0xf1   :  { %1210 = vmatmul.mubr.bf16.gmra.mrb[88].mxu0 %v3740_v42  ;;  %v4203_v55 = vpop.f32.mrb[10].mxu1  ;;  %v3346_v42 = vld [vmem:[%s4802_s2 + $0x10] sm:$0xff]  }
  0xf2   :  { %1217 = vmatprep.mubr.bf16.mxu0 %v3741_v44  ;;  %v4208_v57 = vpop.f32.mrb[11].mxu1 }
  0xf7   :  { %v4210_v58 = vpop.f32.mrb[12].mxu1 }
  0xf8   :  { %v4212_v59 = vpop.f32.mrb[13].mxu1 }
  0xf9   :  { %1218 = vmatmul.mubr.bf16.gmra.mrb[92].mxu0 %v3743_v48  ;;  %v4217_v61 = vpop.f32.mrb[14].mxu1 }
  0xfa   :  { %1225 = vmatprep.mubr.bf16.mxu0 %v3745_v50  ;;  %v4222_v63 = vpop.f32.mrb[15].mxu1  ;;  %v3067_v50 = vunpack.c.l.bf16 %v3346_v42 }
  0xff   :  { %v4224_v0 = vpop.f32.mrb[16].mxu1 }
 0x100   :  { %v4226_v1 = vpop.f32.mrb[17].mxu1 }
 0x101   :  { %1226 = vmatmul.mubr.bf16.gmra.mrb[96].mxu0 %v3748_v54  ;;  %v4231_v3 = vpop.f32.mrb[18].mxu1 }
 0x102   :  { %1233 = vmatprep.mubr.bf16.mxu0 %v3750_v56  ;;  %v4236_v5 = vpop.f32.mrb[19].mxu1 }
 0x107   :  { %v4241_v8 = vpop.f32.mrb[20].mxu1 }
 0x108   :  { %v4243_v10 = vpop.f32.mrb[21].mxu1 }
 0x109   :  { %1234 = vmatmul.mubr.bf16.gmra.mrb[100].mxu0 %v3752_v60  ;;  %v4248_v15 = vpop.f32.mrb[22].mxu1 }
 0x10a   :  { %1241 = vmatprep.mubr.bf16.mxu0 %v3757_v62  ;;  %v4253_v18 = vpop.f32.mrb[23].mxu1 }
 0x10f   :  { %v4258_v27 = vpop.f32.mrb[24].mxu1 }
 0x110   :  { %v4260_v29 = vpop.f32.mrb[25].mxu1 }
 0x111   :  { %1242 = vmatmul.mubr.bf16.gmra.mrb[104].mxu0 %v3759_v2  ;;  %v4266_v35 = vpop.f32.mrb[26].mxu1 }
 0x112   :  { %1249 = vmatprep.mubr.bf16.mxu0 %v3764_v4  ;;  %v4271_v38 = vpop.f32.mrb[27].mxu1  ;;  %v3068_v4 = vunpack.c.h.bf16 %v3346_v42 }
 0x114   :  { %v1035_v9 = vpop.f32.mrb[0].mxu0 }
 0x115   :  { %v1325_v11 = vadd.f32 %v1324_v41, %v1035_v9  ;;  %v1037_v12 = vpop.f32.mrb[1].mxu0 }
 0x116   :  { %v1038_v16 = vpop.f32.mrb[2].mxu0 }
 0x117   :  { %v1902_v19 = vadd.f32 %v3059_v7, %v1325_v11  ;;  %v1328_v20 = vadd.f32 %v1327_v45, %v1038_v16  ;;  %v1040_v21 = vpop.f32.mrb[3].mxu0  ;;  %v4280_v54 = vpop.f32.mrb[28].mxu1  ;;  %v3778_v11 = vld [vmem:[%s4800_s0 + $0x2d4] ss:$12 sps:$4 sm:$0xff]   ;;  %v3347_v16 = vld [vmem:[%s4802_s2 + $0x18] sm:$0xff]  }
 0x118   :  { %v3071_v21 = vunpack.c.l.bf16 %v3347_v16 }
 0x119   :  { %v1903_v23 = vadd.f32 %v3060_v13, %v1328_v20  ;;  %1250 = vmatmul.mubr.bf16.gmra.mrb[108].mxu0 %v3766_v14  ;;  %v1966_v24 = vmax.f32 %v1902_v19, 0.0 }
 0x11a   :  { %1257 = vmatprep.mubr.bf16.mxu0 %v3771_v17 }
 0x11b   :  { %v1967_v25 = vmax.f32 %v1903_v23, 0.0 }
 0x11c   :  { %v1043_v28 = vpop.f32.mrb[4].mxu0 }
 0x11d   :  { %v1333_v30 = vadd.f32 %v4172_v40, %v1043_v28  ;;  %v1045_v31 = vpop.f32.mrb[5].mxu0  ;;  %v2030_v33 = vpack.c.bf16 %v1967_v25, %v1966_v24 }
 0x11e   :  { %v1046_v36 = vpop.f32.mrb[6].mxu0 }
 0x11f   :  { %v1904_v39 = vadd.f32 %v3063_v26, %v1333_v30  ;;  %v1336_v41 = vadd.f32 %v4177_v43, %v1046_v36  ;;  %v1048_v40 = vpop.f32.mrb[7].mxu0  ;;  %3189 = vst [vmem:[%s4803_s4] sm:$0xff] %v2030_v33   ;;  %3565 = vmatprep.mubr.bf16.mxu1 %v2030_v33  ;;  %v4282_v43 = vpop.f32.mrb[29].mxu1  ;;  %v3072_v26 = vunpack.c.h.bf16 %v3347_v16  ;;  %v3780_v30 = vld [vmem:[%s4800_s0 + $0x2d0] ss:$12 sps:$4 sm:$0xff]   ;;  %v3781_v33 = vld [vmem:[%s4800_s0 + $0x2ec] ss:$12 sps:$4 sm:$0xff]  }
 0x120   :  { %v4288_v7 = vpop.f32.mrb[30].mxu1 }
 0x121   :  { %v1905_v44 = vadd.f32 %v3064_v32, %v1336_v41  ;;  %1258 = vmatmul.mubr.bf16.gmra.mrb[112].mxu0 %v3773_v34  ;;  %v1968_v45 = vmax.f32 %v1904_v39, 0.0  ;;  %v4293_v12 = vpop.f32.mrb[31].mxu1  ;;  %v3348_v39 = vld [vmem:[%s4802_s2 + $0x20] sm:$0xff]  }
 0x122   :  { %1265 = vmatprep.mubr.bf16.mxu0 %v3775_v37  ;;  %v4302_v22 = vpop.f32.mrb[32].mxu1 }
 0x123   :  { %v1969_v48 = vmax.f32 %v1905_v44, 0.0  ;;  %v4304_v24 = vpop.f32.mrb[33].mxu1  ;;  %v3075_v44 = vunpack.c.l.bf16 %v3348_v39 }
 0x124   :  { %v1051_v56 = vpop.f32.mrb[8].mxu0  ;;  %v4310_v31 = vpop.f32.mrb[34].mxu1 }
 0x125   :  { %v2031_v60 = vpack.c.bf16 %v1969_v48, %v1968_v45  ;;  %v1341_v62 = vadd.f32 %v4184_v47, %v1051_v56  ;;  %v1053_v2 = vpop.f32.mrb[9].mxu0  ;;  %v4315_v34 = vpop.f32.mrb[35].mxu1 }
 0x126   :  { %v1054_v9 = vpop.f32.mrb[10].mxu0  ;;  %v3783_v2 = vld [vmem:[%s4800_s0 + $0x2e8] ss:$12 sps:$4 sm:$0xff]  }
 0x127   :  { %3376 = vst [vmem:[%s4803_s4 + $0x8] sm:$0xff] %v2031_v60   ;;  %v1906_v47 = vadd.f32 %v3067_v50, %v1341_v62  ;;  %v1344_v13 = vadd.f32 %v4194_v51, %v1054_v9  ;;  %v1056_v14 = vpop.f32.mrb[11].mxu0  ;;  %3566 = vmatmul.mubr.bf16.vlgmr.msra.gmra.mrb[64].mxu1 %v2031_v60  ;;  %v4324_v45 = vpop.f32.mrb[36].mxu1  ;;  %v3076_v60 = vunpack.c.h.bf16 %v3348_v39 }
 0x129   :  { %v1907_v17 = vadd.f32 %v3068_v4, %v1344_v13  ;;  %1266 = vmatmul.mubr.bf16.gmra.mrb[116].mxu0 %v3777_v6  ;;  %v1970_v19 = vmax.f32 %v1906_v47, 0.0 }
 0x12a   :  { %1273 = vmatprep.mubr.bf16.mxu0 %v3778_v11 }
 0x12b   :  { %v1971_v20 = vmax.f32 %v1907_v17, 0.0 }
 0x12c   :  { %v1059_v23 = vpop.f32.mrb[12].mxu0 }
 0x12d   :  { %v1349_v25 = vadd.f32 %v4182_v46, %v1059_v23  ;;  %v1061_v51 = vpop.f32.mrb[13].mxu0  ;;  %v2032_v28 = vpack.c.bf16 %v1971_v20, %v1970_v19 }
 0x12e   :  { %v1062_v32 = vpop.f32.mrb[14].mxu0 }
 0x12f   :  { %v1908_v36 = vadd.f32 %v3071_v21, %v1349_v25  ;;  %v1352_v37 = vadd.f32 %v4189_v49, %v1062_v32  ;;  %v1064_v46 = vpop.f32.mrb[15].mxu0  ;;  %3377 = vst [vmem:[%s4803_s4 + $0x10] sm:$0xff] %v2032_v28   ;;  %3569 = vmatprep.mubr.bf16.mxu1 %v2032_v28  ;;  %v4326_v49 = vpop.f32.mrb[37].mxu1 }
 0x130   :  { %v4332_v4 = vpop.f32.mrb[38].mxu1 }
 0x131   :  { %v1909_v41 = vadd.f32 %v3072_v26, %v1352_v37  ;;  %1274 = vmatmul.mubr.bf16.gmra.mrb[120].mxu0 %v3780_v30  ;;  %v1972_v40 = vmax.f32 %v1908_v36, 0.0  ;;  %v4334_v9 = vpop.f32.mrb[39].mxu1 }
 0x132   :  { %1281 = vmatprep.mubr.bf16.mxu0 %v3781_v33  ;;  %v4343_v20 = vpop.f32.mrb[40].mxu1 }
 0x133   :  { %v1973_v42 = vmax.f32 %v1909_v41, 0.0  ;;  %v4345_v23 = vpop.f32.mrb[41].mxu1 }
 0x134   :  { %v1067_v48 = vpop.f32.mrb[16].mxu0  ;;  %v4348_v28 = vpop.f32.mrb[42].mxu1 }
 0x135   :  { %v1357_v50 = vadd.f32 %v4198_v53, %v1067_v48  ;;  %v1069_v56 = vpop.f32.mrb[17].mxu0  ;;  %v2033_v62 = vpack.c.bf16 %v1973_v42, %v1972_v40  ;;  %v3349_v53 = vld [vmem:[%s4802_s2 + $0x28] sm:$0xff]   ;;  %v4350_v32 = vpop.f32.mrb[43].mxu1 }
 0x136   :  { %v1070_v6 = vpop.f32.mrb[18].mxu0  ;;  %v3079_v19 = vunpack.c.l.bf16 %v3349_v53  ;;  %v3080_v51 = vunpack.c.h.bf16 %v3349_v53 }
 0x137   :  { %v1910_v11 = vadd.f32 %v3075_v44, %v1357_v50  ;;  %v1360_v47 = vadd.f32 %v4208_v57, %v1070_v6  ;;  %v1072_v13 = vpop.f32.mrb[19].mxu0  ;;  %3378 = vst [vmem:[%s4803_s4 + $0x18] sm:$0xff] %v2033_v62   ;;  %3570 = vmatmul.mubr.bf16.gmra.mrb[68].mxu1 %v2033_v62  ;;  %v4359_v42 = vpop.f32.mrb[44].mxu1 }
 0x138   :  { %v4361_v48 = vpop.f32.mrb[45].mxu1 }
 0x139   :  { %v1911_v14 = vadd.f32 %v3076_v60, %v1360_v47  ;;  %1282 = vmatmul.mubr.bf16.gmra.mrb[124].mxu0 %v3783_v2  ;;  %v1974_v16 = vmax.f32 %v1910_v11, 0.0  ;;  %v4364_v62 = vpop.f32.mrb[46].mxu1 }
 0x13a   :  { %v4366_v6 = vpop.f32.mrb[47].mxu1 }
 0x13b   :  { %v1975_v17 = vmax.f32 %v1911_v14, 0.0 }
 0x13c   :  { %v1075_v21 = vpop.f32.mrb[20].mxu0 }
 0x13d   :  { %v1365_v57 = vadd.f32 %v4196_v52, %v1075_v21  ;;  %v1077_v25 = vpop.f32.mrb[21].mxu0  ;;  %v2034_v26 = vpack.c.bf16 %v1975_v17, %v1974_v16  ;;  %v3350_v52 = vld [vmem:[%s4802_s2 + $0x30] sm:$0xff]  }
 0x13e   :  { %v1078_v30 = vpop.f32.mrb[22].mxu0  ;;  %v3083_v40 = vunpack.c.l.bf16 %v3350_v52  ;;  %v3084_v56 = vunpack.c.h.bf16 %v3350_v52 }
 0x13f   :  { %v1912_v33 = vadd.f32 %v3079_v19, %v1365_v57  ;;  %v1368_v36 = vadd.f32 %v4203_v55, %v1078_v30  ;;  %v1080_v37 = vpop.f32.mrb[23].mxu0  ;;  %3379 = vst [vmem:[%s4803_s4 + $0x20] sm:$0xff] %v2034_v26   ;;  %3573 = vmatprep.mubr.bf16.mxu1 %v2034_v26 }
 0x141   :  { %v1913_v46 = vadd.f32 %v3080_v51, %v1368_v36  ;;  %v1976_v39 = vmax.f32 %v1912_v33, 0.0  ;;  %v3352_v36 = vld [vmem:[%s4802_s2 + $0x40] sm:$0xff]  }
 0x143   :  { %v1977_v41 = vmax.f32 %v1913_v46, 0.0  ;;  %v3091_v46 = vunpack.c.l.bf16 %v3352_v36 }
 0x144   :  { %v1083_v44 = vpop.f32.mrb[24].mxu0 }
 0x145   :  { %v1373_v55 = vadd.f32 %v4212_v59, %v1083_v44  ;;  %v1085_v50 = vpop.f32.mrb[25].mxu0  ;;  %v2035_v60 = vpack.c.bf16 %v1977_v41, %v1976_v39  ;;  %v3351_v59 = vld [vmem:[%s4802_s2 + $0x38] sm:$0xff]   ;;  %v4383_v39 = vpop.f32.mrb[48].mxu1 }
 0x146   :  { %v1086_v2 = vpop.f32.mrb[26].mxu0  ;;  %v3087_v17 = vunpack.c.l.bf16 %v3351_v59  ;;  %v3088_v25 = vunpack.c.h.bf16 %v3351_v59 }
 0x147   :  { %v1914_v11 = vadd.f32 %v3083_v40, %v1373_v55  ;;  %v1376_v47 = vadd.f32 %v4222_v63, %v1086_v2  ;;  %v1088_v13 = vpop.f32.mrb[27].mxu0  ;;  %3380 = vst [vmem:[%s4803_s4 + $0x28] sm:$0xff] %v2035_v60   ;;  %3574 = vmatmul.mubr.bf16.gmra.mrb[72].mxu1 %v2035_v60  ;;  %v4385_v40 = vpop.f32.mrb[49].mxu1  ;;  %v3092_v55 = vunpack.c.h.bf16 %v3352_v36 }
 0x149   :  { %v1915_v53 = vadd.f32 %v3084_v56, %v1376_v47  ;;  %v1978_v14 = vmax.f32 %v1914_v11, 0.0  ;;  %v4388_v56 = vpop.f32.mrb[50].mxu1 }
 0x14a   :  { %v4390_v2 = vpop.f32.mrb[51].mxu1 }
 0x14b   :  { %v1979_v16 = vmax.f32 %v1915_v53, 0.0 }
 0x14c   :  { %v1091_v19 = vpop.f32.mrb[28].mxu0 }
 0x14d   :  { %v1381_v21 = vadd.f32 %v4210_v58, %v1091_v19  ;;  %v1093_v57 = vpop.f32.mrb[29].mxu0  ;;  %v2036_v63 = vpack.c.bf16 %v1979_v16, %v1978_v14 }
 0x14e   :  { %v1094_v51 = vpop.f32.mrb[30].mxu0 }
 0x14f   :  { %v1916_v26 = vadd.f32 %v3087_v17, %v1381_v21  ;;  %v1384_v30 = vadd.f32 %v4217_v61, %v1094_v51  ;;  %v1096_v33 = vpop.f32.mrb[31].mxu0  ;;  %3381 = vst [vmem:[%s4803_s4 + $0x30] sm:$0xff] %v2036_v63   ;;  %3577 = vmatprep.mubr.bf16.mxu1 %v2036_v63 }
 0x151   :  { %v1917_v37 = vadd.f32 %v3088_v25, %v1384_v30  ;;  %v1980_v52 = vmax.f32 %v1916_v26, 0.0  ;;  %v3354_v30 = vld [vmem:[%s4802_s2 + $0x50] sm:$0xff]  }
 0x153   :  { %v1981_v58 = vmax.f32 %v1917_v37, 0.0  ;;  %v3099_v37 = vunpack.c.l.bf16 %v3354_v30 }
 0x154   :  { %v1099_v41 = vpop.f32.mrb[32].mxu0 }
 0x155   :  { %v1389_v61 = vadd.f32 %v4226_v1, %v1099_v41  ;;  %v1101_v44 = vpop.f32.mrb[33].mxu0  ;;  %v2037_v50 = vpack.c.bf16 %v1981_v58, %v1980_v52  ;;  %v3353_v1 = vld [vmem:[%s4802_s2 + $0x48] sm:$0xff]   ;;  %v4407_v52 = vpop.f32.mrb[52].mxu1 }
 0x156   :  { %v1102_v60 = vpop.f32.mrb[34].mxu0  ;;  %v3095_v16 = vunpack.c.l.bf16 %v3353_v1  ;;  %v3096_v57 = vunpack.c.h.bf16 %v3353_v1 }
 0x157   :  { %v1918_v11 = vadd.f32 %v3091_v46, %v1389_v61  ;;  %v1392_v47 = vadd.f32 %v4236_v5, %v1102_v60  ;;  %v1104_v13 = vpop.f32.mrb[35].mxu0  ;;  %3382 = vst [vmem:[%s4803_s4 + $0x38] sm:$0xff] %v2037_v50   ;;  %3578 = vmatmul.mubr.bf16.gmra.mrb[76].mxu1 %v2037_v50  ;;  %v4409_v46 = vpop.f32.mrb[53].mxu1  ;;  %v3100_v61 = vunpack.c.h.bf16 %v3354_v30 }
 0x159   :  { %v1919_v59 = vadd.f32 %v3092_v55, %v1392_v47  ;;  %v1982_v53 = vmax.f32 %v1918_v11, 0.0  ;;  %v4412_v55 = vpop.f32.mrb[54].mxu1 }
 0x15a   :  { %v4414_v60 = vpop.f32.mrb[55].mxu1 }
 0x15b   :  { %v1983_v14 = vmax.f32 %v1919_v59, 0.0  ;;  %v4431_v30 = vpop.f32.mrb[56].mxu1 }
 0x15c   :  { %v1107_v17 = vpop.f32.mrb[36].mxu0 }
 0x15d   :  { %v1397_v19 = vadd.f32 %v4224_v0, %v1107_v17  ;;  %v1109_v21 = vpop.f32.mrb[37].mxu0  ;;  %v2038_v5 = vpack.c.bf16 %v1983_v14, %v1982_v53 }
 0x15e   :  { %v1110_v25 = vpop.f32.mrb[38].mxu0 }
 0x15f   :  { %v1920_v63 = vadd.f32 %v3095_v16, %v1397_v19  ;;  %v1400_v51 = vadd.f32 %v4231_v3, %v1110_v25  ;;  %v1112_v26 = vpop.f32.mrb[39].mxu0  ;;  %3383 = vst [vmem:[%s4803_s4 + $0x40] sm:$0xff] %v2038_v5   ;;  %3581 = vmatprep.mubr.bf16.mxu1 %v2038_v5 }
 0x161   :  { %v1921_v33 = vadd.f32 %v3096_v57, %v1400_v51  ;;  %v1984_v36 = vmax.f32 %v1920_v63, 0.0  ;;  %v3356_v51 = vld [vmem:[%s4802_s2 + $0x60] sm:$0xff]  }
 0x163   :  { %v1985_v0 = vmax.f32 %v1921_v33, 0.0 }
 0x164   :  { %v1115_v58 = vpop.f32.mrb[40].mxu0 }
 0x165   :  { %v1405_v3 = vadd.f32 %v4243_v10, %v1115_v58  ;;  %v1117_v41 = vpop.f32.mrb[41].mxu0  ;;  %v2039_v44 = vpack.c.bf16 %v1985_v0, %v1984_v36  ;;  %v3355_v10 = vld [vmem:[%s4802_s2 + $0x58] sm:$0xff]   ;;  %v3107_v36 = vunpack.c.l.bf16 %v3356_v51  ;;  %v4433_v0 = vpop.f32.mrb[57].mxu1 }
 0x166   :  { %v1118_v50 = vpop.f32.mrb[42].mxu0  ;;  %v3103_v14 = vunpack.c.l.bf16 %v3355_v10  ;;  %v3104_v21 = vunpack.c.h.bf16 %v3355_v10  ;;  %v3108_v41 = vunpack.c.h.bf16 %v3356_v51 }
 0x167   :  { %v1922_v11 = vadd.f32 %v3099_v37, %v1405_v3  ;;  %v1408_v47 = vadd.f32 %v4253_v18, %v1118_v50  ;;  %v1120_v13 = vpop.f32.mrb[43].mxu0  ;;  %3384 = vst [vmem:[%s4803_s4 + $0x48] sm:$0xff] %v2039_v44   ;;  %3582 = vmatmul.mubr.bf16.gmra.mrb[80].mxu1 %v2039_v44 }
 0x169   :  { %v1923_v1 = vadd.f32 %v3100_v61, %v1408_v47  ;;  %v1986_v59 = vmax.f32 %v1922_v11, 0.0 }
 0x16b   :  { %v1987_v53 = vmax.f32 %v1923_v1, 0.0 }
 0x16c   :  { %v1123_v16 = vpop.f32.mrb[44].mxu0 }
 0x16d   :  { %v1413_v17 = vadd.f32 %v4241_v8, %v1123_v16  ;;  %v1125_v19 = vpop.f32.mrb[45].mxu0  ;;  %v2040_v18 = vpack.c.bf16 %v1987_v53, %v1986_v59 }
 0x16e   :  { %v1126_v57 = vpop.f32.mrb[46].mxu0 }
 0x16f   :  { %v1924_v5 = vadd.f32 %v3103_v14, %v1413_v17  ;;  %v1416_v25 = vadd.f32 %v4248_v15, %v1126_v57  ;;  %v1128_v63 = vpop.f32.mrb[47].mxu0  ;;  %3385 = vst [vmem:[%s4803_s4 + $0x50] sm:$0xff] %v2040_v18   ;;  %3585 = vmatprep.mubr.bf16.mxu1 %v2040_v18  ;;  %v4435_v15 = vpop.f32.mrb[58].mxu1 }
 0x170   :  { %v4438_v44 = vpop.f32.mrb[59].mxu1 }
 0x171   :  { %v1925_v26 = vadd.f32 %v3104_v21, %v1416_v25  ;;  %v1988_v8 = vmax.f32 %v1924_v5, 0.0  ;;  %v4440_v11 = vpop.f32.mrb[60].mxu1 }
 0x172   :  { %v4446_v1 = vpop.f32.mrb[61].mxu1 }
 0x173   :  { %v1989_v33 = vmax.f32 %v1925_v26, 0.0  ;;  %v4451_v59 = vpop.f32.mrb[62].mxu1 }
 0x174   :  { %v1131_v37 = vpop.f32.mrb[48].mxu0  ;;  %v4453_v14 = vpop.f32.mrb[63].mxu1 }
 0x175   :  { %v1421_v58 = vadd.f32 %v4260_v29, %v1131_v37  ;;  %v1133_v3 = vpop.f32.mrb[49].mxu0  ;;  %v2041_v61 = vpack.c.bf16 %v1989_v33, %v1988_v8  ;;  %v3357_v29 = vld [vmem:[%s4802_s2 + $0x68] sm:$0xff]   ;;  %v3358_v8 = vld [vmem:[%s4802_s2 + $0x70] sm:$0xff]  }
 0x176   :  { %v1134_v50 = vpop.f32.mrb[50].mxu0  ;;  %v3112_v57 = vunpack.c.h.bf16 %v3357_v29  ;;  %v3115_v37 = vunpack.c.l.bf16 %v3358_v8 }
 0x177   :  { %v1926_v47 = vadd.f32 %v3107_v36, %v1421_v58  ;;  %v1424_v13 = vadd.f32 %v4271_v38, %v1134_v50  ;;  %v1136_v10 = vpop.f32.mrb[51].mxu0  ;;  %3386 = vst [vmem:[%s4803_s4 + $0x58] sm:$0xff] %v2041_v61   ;;  %3586 = vmatmul.mubr.bf16.gmra.mrb[84].mxu1 %v2041_v61  ;;  %v3111_v38 = vunpack.c.l.bf16 %v3357_v29  ;;  %v3116_v61 = vunpack.c.h.bf16 %v3358_v8  ;;  %v3359_v29 = vld [vmem:[%s4802_s2 + $0x78] sm:$0xff]  }
 0x179   :  { %v1927_v53 = vadd.f32 %v3108_v41, %v1424_v13  ;;  %v1990_v16 = vmax.f32 %v1926_v47, 0.0 }
 0x17b   :  { %v1991_v17 = vmax.f32 %v1927_v53, 0.0 }
 0x17c   :  { %v1139_v19 = vpop.f32.mrb[52].mxu0 }
 0x17d   :  { %v1429_v21 = vadd.f32 %v4258_v27, %v1139_v19  ;;  %v1141_v18 = vpop.f32.mrb[53].mxu0  ;;  %v2042_v5 = vpack.c.bf16 %v1991_v17, %v1990_v16  ;;  %v3119_v17 = vunpack.c.l.bf16 %v3359_v29 }
 0x17e   :  { %v1142_v25 = vpop.f32.mrb[54].mxu0  ;;  %v3120_v18 = vunpack.c.h.bf16 %v3359_v29 }
 0x17f   :  { %v1928_v63 = vadd.f32 %v3111_v38, %v1429_v21  ;;  %v1432_v51 = vadd.f32 %v4266_v35, %v1142_v25  ;;  %v1144_v26 = vpop.f32.mrb[55].mxu0  ;;  %3387 = vst [vmem:[%s4803_s4 + $0x60] sm:$0xff] %v2042_v5   ;;  %3589 = vmatprep.mubr.bf16.mxu1 %v2042_v5 }
 0x181   :  { %v1929_v33 = vadd.f32 %v3112_v57, %v1432_v51  ;;  %v1992_v36 = vmax.f32 %v1928_v63, 0.0  ;;  %v3360_v51 = vld [vmem:[%s4802_s2 + $0x80] sm:$0xff]  }
 0x183   :  { %v1993_v27 = vmax.f32 %v1929_v33, 0.0  ;;  %v3123_v33 = vunpack.c.l.bf16 %v3360_v51 }
 0x184   :  { %v1147_v58 = vpop.f32.mrb[56].mxu0 }
 0x185   :  { %v1437_v3 = vadd.f32 %v4282_v43, %v1147_v58  ;;  %v1149_v41 = vpop.f32.mrb[57].mxu0  ;;  %v2043_v35 = vpack.c.bf16 %v1993_v27, %v1992_v36  ;;  %v3124_v58 = vunpack.c.h.bf16 %v3360_v51 }
 0x186   :  { %v1150_v50 = vpop.f32.mrb[58].mxu0 }
 0x187   :  { %v1930_v47 = vadd.f32 %v3115_v37, %v1437_v3  ;;  %v1440_v13 = vadd.f32 %v4293_v12, %v1150_v50  ;;  %v1152_v10 = vpop.f32.mrb[59].mxu0  ;;  %3388 = vst [vmem:[%s4803_s4 + $0x68] sm:$0xff] %v2043_v35   ;;  %3590 = vmatmul.mubr.bf16.gmra.mrb[88].mxu1 %v2043_v35  ;;  %v3361_v50 = vld [vmem:[%s4802_s2 + $0x88] sm:$0xff]  }
 0x188   :  { %v3127_v10 = vunpack.c.l.bf16 %v3361_v50 }
 0x189   :  { %v1931_v53 = vadd.f32 %v3116_v61, %v1440_v13  ;;  %v1994_v16 = vmax.f32 %v1930_v47, 0.0 }
 0x18b   :  { %v1995_v43 = vmax.f32 %v1931_v53, 0.0 }
 0x18c   :  { %v1155_v38 = vpop.f32.mrb[60].mxu0 }
 0x18d   :  { %v1445_v19 = vadd.f32 %v4280_v54, %v1155_v38  ;;  %v1157_v21 = vpop.f32.mrb[61].mxu0  ;;  %v2044_v12 = vpack.c.bf16 %v1995_v43, %v1994_v16  ;;  %v3128_v43 = vunpack.c.h.bf16 %v3361_v50 }
 0x18e   :  { %v1158_v57 = vpop.f32.mrb[62].mxu0 }
 0x18f   :  { %v1932_v5 = vadd.f32 %v3119_v17, %v1445_v19  ;;  %v1448_v25 = vadd.f32 %v4288_v7, %v1158_v57  ;;  %v1160_v63 = vpop.f32.mrb[63].mxu0  ;;  %3389 = vst [vmem:[%s4803_s4 + $0x70] sm:$0xff] %v2044_v12   ;;  %3593 = vmatprep.mubr.bf16.mxu1 %v2044_v12 }
 0x191   :  { %v1933_v26 = vadd.f32 %v3120_v18, %v1448_v25  ;;  %v1996_v8 = vmax.f32 %v1932_v5, 0.0  ;;  %v3362_v18 = vld [vmem:[%s4802_s2 + $0x90] sm:$0xff]  }
 0x192   :  { %v3131_v5 = vunpack.c.l.bf16 %v3362_v18 }
 0x193   :  { %v1997_v54 = vmax.f32 %v1933_v26, 0.0  ;;  %v3132_v26 = vunpack.c.h.bf16 %v3362_v18 }
 0x194   :  { %v1163_v36 = vpop.f32.mrb[64].mxu0 }
 0x195   :  { %v1453_v27 = vadd.f32 %v4304_v24, %v1163_v36  ;;  %v1165_v37 = vpop.f32.mrb[65].mxu0  ;;  %v2045_v7 = vpack.c.bf16 %v1997_v54, %v1996_v8 }
 0x196   :  { %v1166_v3 = vpop.f32.mrb[66].mxu0 }
 0x197   :  { %v1934_v41 = vadd.f32 %v3123_v33, %v1453_v27  ;;  %v1456_v61 = vadd.f32 %v4315_v34, %v1166_v3  ;;  %v1168_v35 = vpop.f32.mrb[67].mxu0  ;;  %3390 = vst [vmem:[%s4803_s4 + $0x78] sm:$0xff] %v2045_v7   ;;  %3594 = vmatmul.mubr.bf16.gmra.mrb[92].mxu1 %v2045_v7  ;;  %v3363_v27 = vld [vmem:[%s4802_s2 + $0x98] sm:$0xff]  }
 0x198   :  { %v3135_v7 = vunpack.c.l.bf16 %v3363_v27  ;;  %v3136_v35 = vunpack.c.h.bf16 %v3363_v27  ;;  %v3366_v27 = vld [vmem:[%s4802_s2 + $0xb0] sm:$0xff]  }
 0x199   :  { %v1935_v47 = vadd.f32 %v3124_v58, %v1456_v61  ;;  %v1998_v13 = vmax.f32 %v1934_v41, 0.0 }
 0x19b   :  { %v1999_v24 = vmax.f32 %v1935_v47, 0.0 }
 0x19c   :  { %v1171_v29 = vpop.f32.mrb[68].mxu0 }
 0x19d   :  { %v1461_v53 = vadd.f32 %v4302_v22, %v1171_v29  ;;  %v1173_v16 = vpop.f32.mrb[69].mxu0  ;;  %v2046_v34 = vpack.c.bf16 %v1999_v24, %v1998_v13 }
 0x19e   :  { %v1174_v17 = vpop.f32.mrb[70].mxu0 }
 0x19f   :  { %v1936_v38 = vadd.f32 %v3127_v10, %v1461_v53  ;;  %v1464_v19 = vadd.f32 %v4310_v31, %v1174_v17  ;;  %v1176_v21 = vpop.f32.mrb[71].mxu0  ;;  %3391 = vst [vmem:[%s4803_s4 + $0x80] sm:$0xff] %v2046_v34   ;;  %3597 = vmatprep.mubr.bf16.mxu1 %v2046_v34  ;;  %v3364_v10 = vld [vmem:[%s4802_s2 + $0xa0] sm:$0xff]  }
 0x1a0   :  { %v3139_v16 = vunpack.c.l.bf16 %v3364_v10 }
 0x1a1   :  { %v1937_v12 = vadd.f32 %v3128_v43, %v1464_v19  ;;  %v2000_v57 = vmax.f32 %v1936_v38, 0.0  ;;  %v3140_v38 = vunpack.c.h.bf16 %v3364_v10 }
 0x1a3   :  { %v2001_v22 = vmax.f32 %v1937_v12, 0.0 }
 0x1a4   :  { %v1179_v25 = vpop.f32.mrb[72].mxu0 }
 0x1a5   :  { %v1469_v63 = vadd.f32 %v4326_v49, %v1179_v25  ;;  %v1181_v51 = vpop.f32.mrb[73].mxu0  ;;  %v2047_v31 = vpack.c.bf16 %v2001_v22, %v2000_v57  ;;  %v3365_v57 = vld [vmem:[%s4802_s2 + $0xa8] sm:$0xff]  }
 0x1a6   :  { %v1182_v8 = vpop.f32.mrb[74].mxu0  ;;  %v3143_v25 = vunpack.c.l.bf16 %v3365_v57 }
 0x1a7   :  { %v1938_v54 = vadd.f32 %v3131_v5, %v1469_v63  ;;  %v1472_v33 = vadd.f32 %v4334_v9, %v1182_v8  ;;  %v1184_v36 = vpop.f32.mrb[75].mxu0  ;;  %3392 = vst [vmem:[%s4803_s4 + $0x88] sm:$0xff] %v2047_v31   ;;  %3598 = vmatmul.mubr.bf16.gmra.mrb[96].mxu1 %v2047_v31  ;;  %v3144_v31 = vunpack.c.h.bf16 %v3365_v57 }
 0x1a9   :  { %v1939_v37 = vadd.f32 %v3132_v26, %v1472_v33  ;;  %v2002_v58 = vmax.f32 %v1938_v54, 0.0 }
 0x1ab   :  { %v2003_v49 = vmax.f32 %v1939_v37, 0.0 }
 0x1ac   :  { %v1187_v3 = vpop.f32.mrb[76].mxu0 }
 0x1ad   :  { %v1477_v41 = vadd.f32 %v4324_v45, %v1187_v3  ;;  %v1189_v61 = vpop.f32.mrb[77].mxu0  ;;  %v2048_v9 = vpack.c.bf16 %v2003_v49, %v2002_v58  ;;  %v3147_v49 = vunpack.c.l.bf16 %v3366_v27 }
 0x1ae   :  { %v1190_v50 = vpop.f32.mrb[78].mxu0  ;;  %v3148_v61 = vunpack.c.h.bf16 %v3366_v27 }
 0x1af   :  { %v1940_v47 = vadd.f32 %v3135_v7, %v1477_v41  ;;  %v1480_v13 = vadd.f32 %v4332_v4, %v1190_v50  ;;  %v1192_v24 = vpop.f32.mrb[79].mxu0  ;;  %3393 = vst [vmem:[%s4803_s4 + $0x90] sm:$0xff] %v2048_v9   ;;  %3601 = vmatprep.mubr.bf16.mxu1 %v2048_v9 }
 0x1b1   :  { %v1941_v29 = vadd.f32 %v3136_v35, %v1480_v13  ;;  %v2004_v53 = vmax.f32 %v1940_v47, 0.0  ;;  %v3367_v13 = vld [vmem:[%s4802_s2 + $0xb8] sm:$0xff]  }
 0x1b3   :  { %v2005_v45 = vmax.f32 %v1941_v29, 0.0  ;;  %v3151_v29 = vunpack.c.l.bf16 %v3367_v13 }
 0x1b4   :  { %v1195_v43 = vpop.f32.mrb[80].mxu0 }
 0x1b5   :  { %v1485_v34 = vadd.f32 %v4345_v23, %v1195_v43  ;;  %v1197_v17 = vpop.f32.mrb[81].mxu0  ;;  %v2049_v4 = vpack.c.bf16 %v2005_v45, %v2004_v53  ;;  %v3152_v43 = vunpack.c.h.bf16 %v3367_v13 }
 0x1b6   :  { %v1198_v19 = vpop.f32.mrb[82].mxu0 }
 0x1b7   :  { %v1942_v21 = vadd.f32 %v3139_v16, %v1485_v34  ;;  %v1488_v18 = vadd.f32 %v4350_v32, %v1198_v19  ;;  %v1200_v12 = vpop.f32.mrb[83].mxu0  ;;  %3394 = vst [vmem:[%s4803_s4 + $0x98] sm:$0xff] %v2049_v4   ;;  %3602 = vmatmul.mubr.bf16.gmra.mrb[100].mxu1 %v2049_v4  ;;  %v3368_v19 = vld [vmem:[%s4802_s2 + $0xc0] sm:$0xff]  }
 0x1b8   :  { %v3155_v12 = vunpack.c.l.bf16 %v3368_v19 }
 0x1b9   :  { %v1943_v22 = vadd.f32 %v3140_v38, %v1488_v18  ;;  %v2006_v5 = vmax.f32 %v1942_v21, 0.0 }
 0x1bb   :  { %v2007_v23 = vmax.f32 %v1943_v22, 0.0 }
 0x1bc   :  { %v1203_v63 = vpop.f32.mrb[84].mxu0 }
 0x1bd   :  { %v1493_v51 = vadd.f32 %v4343_v20, %v1203_v63  ;;  %v1205_v26 = vpop.f32.mrb[85].mxu0  ;;  %v2050_v32 = vpack.c.bf16 %v2007_v23, %v2006_v5  ;;  %v3156_v23 = vunpack.c.h.bf16 %v3368_v19 }
 0x1be   :  { %v1206_v8 = vpop.f32.mrb[86].mxu0 }
 0x1bf   :  { %v1944_v54 = vadd.f32 %v3143_v25, %v1493_v51  ;;  %v1496_v33 = vadd.f32 %v4348_v28, %v1206_v8  ;;  %v1208_v36 = vpop.f32.mrb[87].mxu0  ;;  %3395 = vst [vmem:[%s4803_s4 + $0xa0] sm:$0xff] %v2050_v32   ;;  %3605 = vmatprep.mubr.bf16.mxu1 %v2050_v32 }
 0x1c1   :  { %v1945_v37 = vadd.f32 %v3144_v31, %v1496_v33  ;;  %v2008_v58 = vmax.f32 %v1944_v54, 0.0  ;;  %v3369_v31 = vld [vmem:[%s4802_s2 + $0xc8] sm:$0xff]  }
 0x1c2   :  { %v3159_v54 = vunpack.c.l.bf16 %v3369_v31 }
 0x1c3   :  { %v2009_v20 = vmax.f32 %v1945_v37, 0.0  ;;  %v3160_v37 = vunpack.c.h.bf16 %v3369_v31  ;;  %v3373_v31 = vld [vmem:[%s4802_s2 + $0xe8] sm:$0xff]  }
 0x1c4   :  { %v1211_v7 = vpop.f32.mrb[88].mxu0 }
 0x1c5   :  { %v1501_v3 = vadd.f32 %v4361_v48, %v1211_v7  ;;  %v1213_v41 = vpop.f32.mrb[89].mxu0  ;;  %v2051_v28 = vpack.c.bf16 %v2009_v20, %v2008_v58 }
 0x1c6   :  { %v1214_v35 = vpop.f32.mrb[90].mxu0 }
 0x1c7   :  { %v1946_v9 = vadd.f32 %v3147_v49, %v1501_v3  ;;  %v1504_v50 = vadd.f32 %v4366_v6, %v1214_v35  ;;  %v1216_v47 = vpop.f32.mrb[91].mxu0  ;;  %3396 = vst [vmem:[%s4803_s4 + $0xa8] sm:$0xff] %v2051_v28   ;;  %3606 = vmatmul.mubr.bf16.gmra.mrb[104].mxu1 %v2051_v28  ;;  %v3370_v3 = vld [vmem:[%s4802_s2 + $0xd0] sm:$0xff]  }
 0x1c8   :  { %v3163_v28 = vunpack.c.l.bf16 %v3370_v3  ;;  %v3164_v47 = vunpack.c.h.bf16 %v3370_v3 }
 0x1c9   :  { %v1947_v24 = vadd.f32 %v3148_v61, %v1504_v50  ;;  %v2010_v10 = vmax.f32 %v1946_v9, 0.0 }
 0x1cb   :  { %v2011_v48 = vmax.f32 %v1947_v24, 0.0 }
 0x1cc   :  { %v1219_v53 = vpop.f32.mrb[92].mxu0 }
 0x1cd   :  { %v1509_v45 = vadd.f32 %v4359_v42, %v1219_v53  ;;  %v1221_v16 = vpop.f32.mrb[93].mxu0  ;;  %v2052_v6 = vpack.c.bf16 %v2011_v48, %v2010_v10 }
 0x1ce   :  { %v1222_v34 = vpop.f32.mrb[94].mxu0 }
 0x1cf   :  { %v1948_v17 = vadd.f32 %v3151_v29, %v1509_v45  ;;  %v1512_v38 = vadd.f32 %v4364_v62, %v1222_v34  ;;  %v1224_v4 = vpop.f32.mrb[95].mxu0  ;;  %3397 = vst [vmem:[%s4803_s4 + $0xb0] sm:$0xff] %v2052_v6   ;;  %3609 = vmatprep.mubr.bf16.mxu1 %v2052_v6  ;;  %v3371_v29 = vld [vmem:[%s4802_s2 + $0xd8] sm:$0xff]  }
 0x1d0   :  { %v3167_v16 = vunpack.c.l.bf16 %v3371_v29 }
 0x1d1   :  { %v1949_v21 = vadd.f32 %v3152_v43, %v1512_v38  ;;  %v2012_v18 = vmax.f32 %v1948_v17, 0.0  ;;  %v3168_v17 = vunpack.c.h.bf16 %v3371_v29  ;;  %v3375_v29 = vld [vmem:[%s4802_s2 + $0xf8] sm:$0xff]  }
 0x1d3   :  { %v2013_v42 = vmax.f32 %v1949_v21, 0.0 }
 0x1d4   :  { %v1227_v57 = vpop.f32.mrb[96].mxu0 }
 0x1d5   :  { %v1517_v22 = vadd.f32 %v4385_v40, %v1227_v57  ;;  %v1229_v5 = vpop.f32.mrb[97].mxu0  ;;  %v2053_v62 = vpack.c.bf16 %v2013_v42, %v2012_v18  ;;  %v3372_v18 = vld [vmem:[%s4802_s2 + $0xe0] sm:$0xff]  }
 0x1d6   :  { %v1230_v25 = vpop.f32.mrb[98].mxu0  ;;  %v3171_v57 = vunpack.c.l.bf16 %v3372_v18 }
 0x1d7   :  { %v1950_v63 = vadd.f32 %v3155_v12, %v1517_v22  ;;  %v1520_v51 = vadd.f32 %v4390_v2, %v1230_v25  ;;  %v1232_v26 = vpop.f32.mrb[99].mxu0  ;;  %3398 = vst [vmem:[%s4803_s4 + $0xb8] sm:$0xff] %v2053_v62   ;;  %3610 = vmatmul.mubr.bf16.gmra.mrb[108].mxu1 %v2053_v62  ;;  %v3172_v62 = vunpack.c.h.bf16 %v3372_v18 }
 0x1d9   :  { %v1951_v32 = vadd.f32 %v3156_v23, %v1520_v51  ;;  %v2014_v8 = vmax.f32 %v1950_v63, 0.0 }
 0x1db   :  { %v2015_v40 = vmax.f32 %v1951_v32, 0.0 }
 0x1dc   :  { %v1235_v33 = vpop.f32.mrb[100].mxu0 }
 0x1dd   :  { %v1525_v36 = vadd.f32 %v4383_v39, %v1235_v33  ;;  %v1237_v27 = vpop.f32.mrb[101].mxu0  ;;  %v2054_v2 = vpack.c.bf16 %v2015_v40, %v2014_v8 }
 0x1de   :  { %v1238_v58 = vpop.f32.mrb[102].mxu0 }
 0x1df   :  { %v1952_v20 = vadd.f32 %v3159_v54, %v1525_v36  ;;  %v1528_v49 = vadd.f32 %v4388_v56, %v1238_v58  ;;  %v1240_v7 = vpop.f32.mrb[103].mxu0  ;;  %3399 = vst [vmem:[%s4803_s4 + $0xc0] sm:$0xff] %v2054_v2   ;;  %3613 = vmatprep.mubr.bf16.mxu1 %v2054_v2  ;;  %v3176_v58 = vunpack.c.h.bf16 %v3373_v31 }
 0x1e1   :  { %v1953_v41 = vadd.f32 %v3160_v37, %v1528_v49  ;;  %v2016_v61 = vmax.f32 %v1952_v20, 0.0 }
 0x1e3   :  { %v2017_v39 = vmax.f32 %v1953_v41, 0.0 }
 0x1e4   :  { %v1243_v35 = vpop.f32.mrb[104].mxu0 }
 0x1e5   :  { %v1533_v9 = vadd.f32 %v4409_v46, %v1243_v35  ;;  %v1245_v50 = vpop.f32.mrb[105].mxu0  ;;  %v2055_v56 = vpack.c.bf16 %v2017_v39, %v2016_v61 }
 0x1e6   :  { %v1246_v13 = vpop.f32.mrb[106].mxu0 }
 0x1e7   :  { %v1954_v24 = vadd.f32 %v3163_v28, %v1533_v9  ;;  %v1536_v10 = vadd.f32 %v4414_v60, %v1246_v13  ;;  %v1248_v48 = vpop.f32.mrb[107].mxu0  ;;  %3400 = vst [vmem:[%s4803_s4 + $0xc8] sm:$0xff] %v2055_v56   ;;  %3614 = vmatmul.mubr.bf16.gmra.mrb[112].mxu1 %v2055_v56 }
 0x1e9   :  { %v1955_v53 = vadd.f32 %v3164_v47, %v1536_v10  ;;  %v2018_v45 = vmax.f32 %v1954_v24, 0.0 }
 0x1eb   :  { %v2019_v46 = vmax.f32 %v1955_v53, 0.0 }
 0x1ec   :  { %v1251_v43 = vpop.f32.mrb[108].mxu0 }
 0x1ed   :  { %v1541_v6 = vadd.f32 %v4407_v52, %v1251_v43  ;;  %v1253_v34 = vpop.f32.mrb[109].mxu0  ;;  %v2056_v60 = vpack.c.bf16 %v2019_v46, %v2018_v45 }
 0x1ee   :  { %v1254_v38 = vpop.f32.mrb[110].mxu0 }
 0x1ef   :  { %v1956_v4 = vadd.f32 %v3167_v16, %v1541_v6  ;;  %v1544_v19 = vadd.f32 %v4412_v55, %v1254_v38  ;;  %v1256_v21 = vpop.f32.mrb[111].mxu0  ;;  %3401 = vst [vmem:[%s4803_s4 + $0xd0] sm:$0xff] %v2056_v60   ;;  %3617 = vmatprep.mubr.bf16.mxu1 %v2056_v60  ;;  %v3184_v38 = vunpack.c.h.bf16 %v3375_v29 }
 0x1f1   :  { %v1957_v42 = vadd.f32 %v3168_v17, %v1544_v19  ;;  %v2020_v12 = vmax.f32 %v1956_v4, 0.0 }
 0x1f3   :  { %v2021_v52 = vmax.f32 %v1957_v42, 0.0 }
 0x1f4   :  { %v1259_v22 = vpop.f32.mrb[112].mxu0 }
 0x1f5   :  { %v1549_v5 = vadd.f32 %v4433_v0, %v1259_v22  ;;  %v1261_v23 = vpop.f32.mrb[113].mxu0  ;;  %v2057_v55 = vpack.c.bf16 %v2021_v52, %v2020_v12 }
 0x1f6   :  { %v1262_v25 = vpop.f32.mrb[114].mxu0 }
 0x1f7   :  { %v1958_v63 = vadd.f32 %v3171_v57, %v1549_v5  ;;  %v1552_v51 = vadd.f32 %v4438_v44, %v1262_v25  ;;  %v1264_v26 = vpop.f32.mrb[115].mxu0  ;;  %3402 = vst [vmem:[%s4803_s4 + $0xd8] sm:$0xff] %v2057_v55   ;;  %3618 = vmatmul.mubr.bf16.gmra.mrb[116].mxu1 %v2057_v55  ;;  %v3175_v44 = vunpack.c.l.bf16 %v3373_v31 }
 0x1f9   :  { %v1959_v32 = vadd.f32 %v3172_v62, %v1552_v51  ;;  %v2022_v0 = vmax.f32 %v1958_v63, 0.0 }
 0x1fa   :  { %v3567_v8 = vpop.f32.mrb[64].mxu1 }
 0x1fb   :  { %v2023_v40 = vmax.f32 %v1959_v32, 0.0  ;;  %2705 = vst [vmem:[%s4804_s5 + $0x10] sm:$0xff] %v3567_v8  ;;  %v2448_v54 = vpop.f32.mrb[65].mxu1 }
 0x1fc   :  { %2703 = vst [vmem:[%s4804_s5] sm:$0xff] %v2448_v54  ;;  %v1267_v33 = vpop.f32.mrb[116].mxu0  ;;  %v3568_v36 = vpop.f32.mrb[66].mxu1 }
 0x1fd   :  { %v1557_v27 = vadd.f32 %v4431_v30, %v1267_v33  ;;  %2706 = vst [vmem:[%s4804_s5 + $0x18] sm:$0xff] %v3568_v36  ;;  %v1269_v37 = vpop.f32.mrb[117].mxu0  ;;  %v2451_v2 = vpop.f32.mrb[67].mxu1  ;;  %v2058_v20 = vpack.c.bf16 %v2023_v40, %v2022_v0  ;;  %v3374_v30 = vld [vmem:[%s4802_s2 + $0xf0] sm:$0xff]  }
 0x1fe   :  { %2704 = vst [vmem:[%s4804_s5 + $0x8] sm:$0xff] %v2451_v2  ;;  %v1270_v49 = vpop.f32.mrb[118].mxu0  ;;  %v3179_v35 = vunpack.c.l.bf16 %v3374_v30  ;;  %v3180_v56 = vunpack.c.h.bf16 %v3374_v30 }
 0x1ff   :  { %v1960_v7 = vadd.f32 %v3175_v44, %v1557_v27  ;;  %v1560_v3 = vadd.f32 %v4435_v15, %v1270_v49  ;;  %v1272_v41 = vpop.f32.mrb[119].mxu0  ;;  %3403 = vst [vmem:[%s4803_s4 + $0xe0] sm:$0xff] %v2058_v20   ;;  %3621 = vmatprep.mubr.bf16.mxu1 %v2058_v20 }
 0x201   :  { %v1961_v61 = vadd.f32 %v3176_v58, %v1560_v3  ;;  %v2024_v39 = vmax.f32 %v1960_v7, 0.0 }
 0x203   :  { %v2025_v28 = vmax.f32 %v1961_v61, 0.0 }
 0x204   :  { %v1275_v9 = vpop.f32.mrb[120].mxu0 }
 0x205   :  { %v1565_v50 = vadd.f32 %v4446_v1, %v1275_v9  ;;  %v1277_v47 = vpop.f32.mrb[121].mxu0  ;;  %v2059_v15 = vpack.c.bf16 %v2025_v28, %v2024_v39 }
 0x206   :  { %v1278_v13 = vpop.f32.mrb[122].mxu0 }
 0x207   :  { %v1962_v24 = vadd.f32 %v3179_v35, %v1565_v50  ;;  %v1568_v10 = vadd.f32 %v4453_v14, %v1278_v13  ;;  %v1280_v48 = vpop.f32.mrb[123].mxu0  ;;  %3404 = vst [vmem:[%s4803_s4 + $0xe8] sm:$0xff] %v2059_v15   ;;  %3622 = vmatmul.mubr.bf16.gmra.mrb[120].mxu1 %v2059_v15  ;;  %v3183_v14 = vunpack.c.l.bf16 %v3375_v29 }
 0x209   :  { %v1963_v53 = vadd.f32 %v3180_v56, %v1568_v10  ;;  %v2026_v1 = vmax.f32 %v1962_v24, 0.0 }
 0x20a   :  { %v3571_v45 = vpop.f32.mrb[68].mxu1 }
 0x20b   :  { %v2027_v46 = vmax.f32 %v1963_v53, 0.0  ;;  %2709 = vst [vmem:[%s4804_s5 + $0x30] sm:$0xff] %v3571_v45  ;;  %v2464_v16 = vpop.f32.mrb[69].mxu1 }
 0x20c   :  { %2707 = vst [vmem:[%s4804_s5 + $0x20] sm:$0xff] %v2464_v16  ;;  %v1283_v43 = vpop.f32.mrb[124].mxu0  ;;  %v3572_v6 = vpop.f32.mrb[70].mxu1 }
 0x20d   :  { %v1573_v34 = vadd.f32 %v4440_v11, %v1283_v43  ;;  %2710 = vst [vmem:[%s4804_s5 + $0x38] sm:$0xff] %v3572_v6  ;;  %v1285_v17 = vpop.f32.mrb[125].mxu0  ;;  %v2467_v60 = vpop.f32.mrb[71].mxu1  ;;  %v2060_v4 = vpack.c.bf16 %v2027_v46, %v2026_v1 }
 0x20e   :  { %2708 = vst [vmem:[%s4804_s5 + $0x28] sm:$0xff] %v2467_v60  ;;  %v1286_v19 = vpop.f32.mrb[126].mxu0 }
 0x20f   :  { %v1964_v21 = vadd.f32 %v3183_v14, %v1573_v34  ;;  %v1576_v18 = vadd.f32 %v4451_v59, %v1286_v19  ;;  %v1288_v42 = vpop.f32.mrb[127].mxu0  ;;  %3405 = vst [vmem:[%s4803_s4 + $0xf0] sm:$0xff] %v2060_v4   ;;  %3625 = vmatprep.mubr.bf16.mxu1 %v2060_v4 }
 0x211   :  { %v1965_v11 = vadd.f32 %v3184_v38, %v1576_v18  ;;  %v2028_v12 = vmax.f32 %v1964_v21, 0.0 }
 0x213   :  { %v2029_v52 = vmax.f32 %v1965_v11, 0.0 }
 0x215   :  { %v2061_v57 = vpack.c.bf16 %v2029_v52, %v2028_v12 }
 0x217   :  { %3406 = vst [vmem:[%s4803_s4 + $0xf8] sm:$0xff] %v2061_v57   ;;  %3626 = vmatmul.mubr.bf16.gmra.mrb[124].mxu1 %v2061_v57 }
 0x21a   :  { %v3575_v22 = vpop.f32.mrb[72].mxu1 }
 0x21b   :  { %2713 = vst [vmem:[%s4804_s5 + $0x50] sm:$0xff] %v3575_v22  ;;  %v2480_v59 = vpop.f32.mrb[73].mxu1 }
 0x21c   :  { %2711 = vst [vmem:[%s4804_s5 + $0x40] sm:$0xff] %v2480_v59  ;;  %v3576_v5 = vpop.f32.mrb[74].mxu1 }
 0x21d   :  { %2714 = vst [vmem:[%s4804_s5 + $0x58] sm:$0xff] %v3576_v5  ;;  %v2483_v23 = vpop.f32.mrb[75].mxu1 }
 0x21e   :  { %2712 = vst [vmem:[%s4804_s5 + $0x48] sm:$0xff] %v2483_v23 }
 0x22a   :  { %v3579_v62 = vpop.f32.mrb[76].mxu1 }
 0x22b   :  { %2717 = vst [vmem:[%s4804_s5 + $0x70] sm:$0xff] %v3579_v62  ;;  %v2496_v55 = vpop.f32.mrb[77].mxu1 }
 0x22c   :  { %2715 = vst [vmem:[%s4804_s5 + $0x60] sm:$0xff] %v2496_v55  ;;  %v3580_v25 = vpop.f32.mrb[78].mxu1 }
 0x22d   :  { %2718 = vst [vmem:[%s4804_s5 + $0x78] sm:$0xff] %v3580_v25  ;;  %v2499_v63 = vpop.f32.mrb[79].mxu1 }
 0x22e   :  { %2716 = vst [vmem:[%s4804_s5 + $0x68] sm:$0xff] %v2499_v63 }
 0x23a   :  { %v3583_v51 = vpop.f32.mrb[80].mxu1 }
 0x23b   :  { %2721 = vst [vmem:[%s4804_s5 + $0x90] sm:$0xff] %v3583_v51  ;;  %v2512_v26 = vpop.f32.mrb[81].mxu1 }
 0x23c   :  { %2719 = vst [vmem:[%s4804_s5 + $0x80] sm:$0xff] %v2512_v26  ;;  %v3584_v31 = vpop.f32.mrb[82].mxu1 }
 0x23d   :  { %2722 = vst [vmem:[%s4804_s5 + $0x98] sm:$0xff] %v3584_v31  ;;  %v2515_v32 = vpop.f32.mrb[83].mxu1 }
 0x23e   :  { %2720 = vst [vmem:[%s4804_s5 + $0x88] sm:$0xff] %v2515_v32 }
 0x24a   :  { %v3587_v8 = vpop.f32.mrb[84].mxu1 }
 0x24b   :  { %2725 = vst [vmem:[%s4804_s5 + $0xb0] sm:$0xff] %v3587_v8  ;;  %v2528_v0 = vpop.f32.mrb[85].mxu1 }
 0x24c   :  { %2723 = vst [vmem:[%s4804_s5 + $0xa0] sm:$0xff] %v2528_v0  ;;  %v3588_v40 = vpop.f32.mrb[86].mxu1 }
 0x24d   :  { %2726 = vst [vmem:[%s4804_s5 + $0xb8] sm:$0xff] %v3588_v40  ;;  %v2531_v54 = vpop.f32.mrb[87].mxu1 }
 0x24e   :  { %2724 = vst [vmem:[%s4804_s5 + $0xa8] sm:$0xff] %v2531_v54 }
 0x25a   :  { %v3591_v44 = vpop.f32.mrb[88].mxu1 }
 0x25b   :  { %2729 = vst [vmem:[%s4804_s5 + $0xd0] sm:$0xff] %v3591_v44  ;;  %v2544_v33 = vpop.f32.mrb[89].mxu1 }
 0x25c   :  { %2727 = vst [vmem:[%s4804_s5 + $0xc0] sm:$0xff] %v2544_v33  ;;  %v3592_v36 = vpop.f32.mrb[90].mxu1 }
 0x25d   :  { %2730 = vst [vmem:[%s4804_s5 + $0xd8] sm:$0xff] %v3592_v36  ;;  %v2547_v27 = vpop.f32.mrb[91].mxu1 }
 0x25e   :  { %2728 = vst [vmem:[%s4804_s5 + $0xc8] sm:$0xff] %v2547_v27 }
 0x26a   :  { %v3595_v37 = vpop.f32.mrb[92].mxu1 }
 0x26b   :  { %2733 = vst [vmem:[%s4804_s5 + $0xf0] sm:$0xff] %v3595_v37  ;;  %v2560_v2 = vpop.f32.mrb[93].mxu1 }
 0x26c   :  { %2731 = vst [vmem:[%s4804_s5 + $0xe0] sm:$0xff] %v2560_v2  ;;  %v3596_v58 = vpop.f32.mrb[94].mxu1 }
 0x26d   :  { %2734 = vst [vmem:[%s4804_s5 + $0xf8] sm:$0xff] %v3596_v58  ;;  %v2563_v20 = vpop.f32.mrb[95].mxu1 }
 0x26e   :  { %2732 = vst [vmem:[%s4804_s5 + $0xe8] sm:$0xff] %v2563_v20 }
 0x27a   :  { %v3599_v49 = vpop.f32.mrb[96].mxu1 }
 0x27b   :  { %2737 = vst [vmem:[%s4804_s5 + $0x110] sm:$0xff] %v3599_v49  ;;  %v2576_v7 = vpop.f32.mrb[97].mxu1 }
 0x27c   :  { %2735 = vst [vmem:[%s4804_s5 + $0x100] sm:$0xff] %v2576_v7  ;;  %v3600_v3 = vpop.f32.mrb[98].mxu1 }
 0x27d   :  { %2738 = vst [vmem:[%s4804_s5 + $0x118] sm:$0xff] %v3600_v3  ;;  %v2579_v41 = vpop.f32.mrb[99].mxu1 }
 0x27e   :  { %2736 = vst [vmem:[%s4804_s5 + $0x108] sm:$0xff] %v2579_v41 }
 0x28a   :  { %v3603_v30 = vpop.f32.mrb[100].mxu1 }
 0x28b   :  { %2741 = vst [vmem:[%s4804_s5 + $0x130] sm:$0xff] %v3603_v30  ;;  %v2592_v61 = vpop.f32.mrb[101].mxu1 }
 0x28c   :  { %2739 = vst [vmem:[%s4804_s5 + $0x120] sm:$0xff] %v2592_v61  ;;  %v3604_v39 = vpop.f32.mrb[102].mxu1 }
 0x28d   :  { %2742 = vst [vmem:[%s4804_s5 + $0x138] sm:$0xff] %v3604_v39  ;;  %v2595_v28 = vpop.f32.mrb[103].mxu1 }
 0x28e   :  { %2740 = vst [vmem:[%s4804_s5 + $0x128] sm:$0xff] %v2595_v28 }
 0x29a   :  { %v3607_v35 = vpop.f32.mrb[104].mxu1 }
 0x29b   :  { %2745 = vst [vmem:[%s4804_s5 + $0x150] sm:$0xff] %v3607_v35  ;;  %v2608_v9 = vpop.f32.mrb[105].mxu1 }
 0x29c   :  { %2743 = vst [vmem:[%s4804_s5 + $0x140] sm:$0xff] %v2608_v9  ;;  %v3608_v50 = vpop.f32.mrb[106].mxu1 }
 0x29d   :  { %2746 = vst [vmem:[%s4804_s5 + $0x158] sm:$0xff] %v3608_v50  ;;  %v2611_v47 = vpop.f32.mrb[107].mxu1 }
 0x29e   :  { %2744 = vst [vmem:[%s4804_s5 + $0x148] sm:$0xff] %v2611_v47 }
 0x2aa   :  { %v3611_v56 = vpop.f32.mrb[108].mxu1 }
 0x2ab   :  { %2749 = vst [vmem:[%s4804_s5 + $0x170] sm:$0xff] %v3611_v56  ;;  %v2624_v15 = vpop.f32.mrb[109].mxu1 }
 0x2ac   :  { %2747 = vst [vmem:[%s4804_s5 + $0x160] sm:$0xff] %v2624_v15  ;;  %v3612_v13 = vpop.f32.mrb[110].mxu1 }
 0x2ad   :  { %2750 = vst [vmem:[%s4804_s5 + $0x178] sm:$0xff] %v3612_v13  ;;  %v2627_v24 = vpop.f32.mrb[111].mxu1 }
 0x2ae   :  { %2748 = vst [vmem:[%s4804_s5 + $0x168] sm:$0xff] %v2627_v24 }
 0x2ba   :  { %v3615_v10 = vpop.f32.mrb[112].mxu1 }
 0x2bb   :  { %2753 = vst [vmem:[%s4804_s5 + $0x190] sm:$0xff] %v3615_v10  ;;  %v2640_v48 = vpop.f32.mrb[113].mxu1 }
 0x2bc   :  { %2751 = vst [vmem:[%s4804_s5 + $0x180] sm:$0xff] %v2640_v48  ;;  %v3616_v29 = vpop.f32.mrb[114].mxu1 }
 0x2bd   :  { %2754 = vst [vmem:[%s4804_s5 + $0x198] sm:$0xff] %v3616_v29  ;;  %v2643_v53 = vpop.f32.mrb[115].mxu1 }
 0x2be   :  { %2752 = vst [vmem:[%s4804_s5 + $0x188] sm:$0xff] %v2643_v53 }
 0x2ca   :  { %v3619_v45 = vpop.f32.mrb[116].mxu1 }
 0x2cb   :  { %2757 = vst [vmem:[%s4804_s5 + $0x1b0] sm:$0xff] %v3619_v45  ;;  %v2656_v1 = vpop.f32.mrb[117].mxu1 }
 0x2cc   :  { %2755 = vst [vmem:[%s4804_s5 + $0x1a0] sm:$0xff] %v2656_v1  ;;  %v3620_v46 = vpop.f32.mrb[118].mxu1 }
 0x2cd   :  { %2758 = vst [vmem:[%s4804_s5 + $0x1b8] sm:$0xff] %v3620_v46  ;;  %v2659_v16 = vpop.f32.mrb[119].mxu1 }
 0x2ce   :  { %2756 = vst [vmem:[%s4804_s5 + $0x1a8] sm:$0xff] %v2659_v16 }
 0x2da   :  { %v3623_v14 = vpop.f32.mrb[120].mxu1 }
 0x2db   :  { %2761 = vst [vmem:[%s4804_s5 + $0x1d0] sm:$0xff] %v3623_v14  ;;  %v2672_v43 = vpop.f32.mrb[121].mxu1 }
 0x2dc   :  { %2759 = vst [vmem:[%s4804_s5 + $0x1c0] sm:$0xff] %v2672_v43  ;;  %v3624_v6 = vpop.f32.mrb[122].mxu1 }
 0x2dd   :  { %2762 = vst [vmem:[%s4804_s5 + $0x1d8] sm:$0xff] %v3624_v6  ;;  %v2675_v34 = vpop.f32.mrb[123].mxu1 }
 0x2de   :  { %2760 = vst [vmem:[%s4804_s5 + $0x1c8] sm:$0xff] %v2675_v34 }
 0x2ea   :  { %v3627_v17 = vpop.f32.mrb[124].mxu1 }
 0x2eb   :  { %2765 = vst [vmem:[%s4804_s5 + $0x1f0] sm:$0xff] %v3627_v17  ;;  %v2688_v60 = vpop.f32.mrb[125].mxu1 }
 0x2ec   :  { %2763 = vst [vmem:[%s4804_s5 + $0x1e0] sm:$0xff] %v2688_v60  ;;  %v3628_v38 = vpop.f32.mrb[126].mxu1 }
 0x2ed   :  { %2766 = vst [vmem:[%s4804_s5 + $0x1f8] sm:$0xff] %v3628_v38  ;;  %v2691_v4 = vpop.f32.mrb[127].mxu1 }
 0x2ee   :  { %2764 = vst [vmem:[%s4804_s5 + $0x1e8] sm:$0xff] %v2691_v4 }

</bundles_post_ra>
